<compile_context>
chip_gen: v6e
topology: v6e:2x2x1
jax: 0.10.0
libtpu: 0.0.40
codegen_flags: <defaults>
</compile_context>

<pallas_src>
import jax
import jax.numpy as jnp
from jax import lax
from jax.experimental import pallas as pl
from jax.experimental.pallas import tpu as pltpu

# ----------------------------- hyperparameters ------------------------------
NUM_CLASSES = 10
INPUT_DIM = 16          # spectrogram feature dim
ENCODER_DIM = 32
DECODER_DIM = 32        # LSTM hidden dim
NUM_ENCODER_LAYERS = 2
NUM_HEADS = 4
FF_EXPANSION = 4
CONV_EXPANSION = 2
CONV_KERNEL = 31
BATCH = 2
SEQ_LEN = 20            # input time steps
TGT_LEN = 6             # target tokens

LN_EPS = 1e-5
BN_EPS = 1e-5
BN_SCALE = (1.0 + BN_EPS) ** -0.5
CLASS_PAD = 128         # lane-dense padded class dim

# front-end dims after the two Conv2d(k=3, s=2) stages
T1 = (SEQ_LEN - 3) // 2 + 1        # 9
F1 = (INPUT_DIM - 3) // 2 + 1      # 7
T_SUB = (T1 - 3) // 2 + 1          # 4
F2 = (F1 - 3) // 2 + 1             # 3

_VMEM = pl.BlockSpec(memory_space=pltpu.MemorySpace.VMEM)


def _vmem_specs(n):
    return [_VMEM] * n


# ------------------------- in-kernel helper functions ------------------------
def _ln(x, g, b, eps=LN_EPS):
    mu = jnp.mean(x, axis=-1, keepdims=True)
    var = jnp.mean(jnp.square(x - mu), axis=-1, keepdims=True)
    return (x - mu) * lax.rsqrt(var + eps) * g + b


def _swish(x):
    return x * jax.nn.sigmoid(x)


def _bf(x):
    return x.astype(jnp.bfloat16)


def _mm(a, w, b=None):
    """bf16-operand MXU matmul with f32 accumulation; optional (1,N) bias."""
    out = jnp.dot(_bf(a), w, preferred_element_type=jnp.float32)
    return out if b is None else out + b


# ----------------------------- Pallas kernels --------------------------------
def _conv1_kernel(p_ref, w_ref, b_ref, o_ref):
    """Subsampling conv1 as im2col matmul + ReLU."""
    h = _mm(p_ref[...], w_ref[...], b_ref[...])
    o_ref[...] = jnp.maximum(h, 0.0)


def _mega_kernel(
        # subsample tail (conv2 block-diag + input projection)
        p2_ref, w2bd_ref, b2_ref, wproj_ref, bproj_ref,
        # conformer blocks, stacked over (layer, [ff1|ff2]) / (layer)
        ff_lng_ref, ff_lnb_ref, ff_w1_ref, ff_b1_ref, ff_w2_ref, ff_b2_ref,
        mh_lng_ref, mh_lnb_ref, mh_wqkv_ref, mh_bqkv_ref, mh_wo_ref, mh_bo_ref,
        cv_lng_ref, cv_lnb_ref, cv_pw1w_ref, cv_pw1b_ref, cv_dww_ref,
        cv_bng_ref, cv_bnb_ref, cv_pw2w_ref, cv_pw2b_ref,
        fin_lng_ref, fin_lnb_ref,
        # RNNT decoder
        emb_ref, dwih_ref, dbih_ref, dwhh_ref, dbhh_ref, doutw_ref, doutb_ref,
        # joint
        we_ref, wd_ref,
        # output
        o_ref):
    U, B, H = emb_ref.shape
    BT = p2_ref.shape[0]
    T = BT // B
    E = wproj_ref.shape[1]
    CP = we_ref.shape[1]
    nh = NUM_HEADS
    dh = E // nh
    scale = 1.0 / float(dh) ** 0.5
    pad = (CONV_KERNEL - 1) // 2

    # ---- subsample tail: conv2 (block-diagonal) + ReLU + input projection ----
    h2 = jnp.maximum(_mm(p2_ref[...], w2bd_ref[...], b2_ref[...]), 0.0)  # (BT, F2*E)
    x = _mm(h2, wproj_ref[...], bproj_ref[...])                          # (BT, E)

    # ---- conformer blocks ----
    def ffn(x, g, b, w1, b1, w2, b2):
        y = _ln(x, g, b)
        h = _swish(_mm(y, w1, b1))
        h = _mm(h, w2, b2)
        return x + 0.5 * h                                               # half-step residual

    for layer in range(NUM_ENCODER_LAYERS):
        # ---------------- FF1 ----------------
        x = ffn(x, ff_lng_ref[layer, 0], ff_lnb_ref[layer, 0],
                ff_w1_ref[layer, 0], ff_b1_ref[layer, 0],
                ff_w2_ref[layer, 0], ff_b2_ref[layer, 0])

        # ---------------- MHSA (standard SDPA) ----------------
        y = _ln(x, mh_lng_ref[layer], mh_lnb_ref[layer])
        qkv = _mm(y, mh_wqkv_ref[layer], mh_bqkv_ref[layer])             # (BT, 3E)
        qkv3 = qkv.reshape(B, T, 3 * E)
        q, k, v = qkv3[..., :E], qkv3[..., E:2 * E], qkv3[..., 2 * E:]
        wo = mh_wo_ref[layer]                                            # (E, E) bf16
        attn = jnp.zeros((BT, E), jnp.float32)
        for hh in range(nh):                                             # static, 4 heads
            sl = slice(hh * dh, (hh + 1) * dh)
            s = jnp.einsum('btd,bsd->bts', _bf(q[..., sl]), _bf(k[..., sl]),
                           preferred_element_type=jnp.float32) * scale
            s = s - jnp.max(s, axis=-1, keepdims=True)
            p = jnp.exp(s)
            p = p * pl.reciprocal(jnp.sum(p, axis=-1, keepdims=True), approx=True)
            ctx = jnp.einsum('bts,bsd->btd', _bf(p), _bf(v[..., sl]),
                             preferred_element_type=jnp.float32)         # (B, T, dh)
            # concat folded into the output projection (per-head accumulate)
            attn = attn + _mm(ctx.reshape(BT, dh), wo[sl, :])
        x = x + attn + mh_bo_ref[layer]

        # ---------------- convolution module ----------------
        y = _ln(x, cv_lng_ref[layer], cv_lnb_ref[layer])
        h = _mm(y, cv_pw1w_ref[layer], cv_pw1b_ref[layer])               # (BT, 2E)
        glu = h[:, :E] * jax.nn.sigmoid(h[:, E:])                        # GLU -> (BT, E)
        glu3 = glu.reshape(B, T, E)
        dww = cv_dww_ref[layer]                                          # (K, E) f32
        # depthwise 'same' conv: only taps hitting real data (T << K) are used
        rows = []
        for t in range(T):
            acc = glu3[:, 0, :] * dww[pad - t:pad - t + 1, :]
            for j in range(1, T):
                acc = acc + glu3[:, j, :] * dww[pad + j - t:pad + j - t + 1, :]
            rows.append(acc)
        conv = jnp.stack(rows, axis=1).reshape(BT, E)
        conv = conv * (cv_bng_ref[layer] * BN_SCALE) + cv_bnb_ref[layer]  # eval BN
        conv = _swish(conv)
        x = x + _mm(conv, cv_pw2w_ref[layer], cv_pw2b_ref[layer])

        # ---------------- FF2 + block LayerNorm ----------------
        x = ffn(x, ff_lng_ref[layer, 1], ff_lnb_ref[layer, 1],
                ff_w1_ref[layer, 1], ff_b1_ref[layer, 1],
                ff_w2_ref[layer, 1], ff_b2_ref[layer, 1])
        x = _ln(x, fin_lng_ref[layer], fin_lnb_ref[layer])

    enc = x                                                              # (BT, E)

    # ---- RNNT decoder: resident LSTM, recurrence unrolled over U ----
    xw = _mm(emb_ref[...].reshape(U * B, H), dwih_ref[...], dbih_ref[...])
    xw = xw.reshape(U, B, 4 * H)
    whh = dwhh_ref[...]
    bhh = dbhh_ref[...]
    hcur = jnp.zeros((B, H), jnp.float32)
    ccur = jnp.zeros((B, H), jnp.float32)
    hs = []
    for u in range(U):                                                   # static, U = 6
        gates = xw[u] + _mm(hcur, whh, bhh)                              # (B, 4H)
        i = jax.nn.sigmoid(gates[:, :H])
        f = jax.nn.sigmoid(gates[:, H:2 * H])
        g = jnp.tanh(gates[:, 2 * H:3 * H])
        o = jax.nn.sigmoid(gates[:, 3 * H:])
        ccur = f * ccur + i * g
        hcur = o * jnp.tanh(ccur)
        hs.append(hcur)
    hall = jnp.stack(hs, axis=1).reshape(B * U, H)                       # (B*U, H)
    dec = _mm(hall, doutw_ref[...], doutb_ref[...])                      # (B*U, E)

    # ---- joint: concat + Linear(no bias); classes pre-padded to 128 (lane-dense) ----
    e = _mm(enc, we_ref[...]).reshape(B, T, CP)
    d = _mm(dec, wd_ref[...]).reshape(B, U, CP)
    o_ref[...] = (e[:, :, None, :] + d[:, None, :, :]).astype(o_ref.dtype)


# ------------------------------ model glue -----------------------------------
def _patches_2d(x, k, stride):
    """x: (B, H, W) single channel -> (B, Ho, Wo, k*k) im2col patches (XLA glue)."""
    _, H, W = x.shape
    Ho = (H - k) // stride + 1
    Wo = (W - k) // stride + 1
    cols = []
    for di in range(k):
        for dj in range(k):
            cols.append(x[:, di:di + stride * (Ho - 1) + 1:stride,
                          dj:dj + stride * (Wo - 1) + 1:stride])
    return jnp.stack(cols, axis=-1)


def _patches_cl(x, k, stride):
    """x: (B, H, W, C) channels-last -> (B, Ho, Wo, k*k*C) patches (XLA glue)."""
    _, H, W, _ = x.shape
    Ho = (H - k) // stride + 1
    Wo = (W - k) // stride + 1
    cols = []
    for di in range(k):
        for dj in range(k):
            cols.append(x[:, di:di + stride * (Ho - 1) + 1:stride,
                          dj:dj + stride * (Wo - 1) + 1:stride, :])
    return jnp.concatenate(cols, axis=-1)


def conformer_forward(params, inputs, input_lengths, targets, target_lengths):
    del input_lengths, target_lengths                      # lengths unused by forward output
    enc_p = params['encoder']
    dec_p = params['decoder']
    B = inputs.shape[0]
    E = ENCODER_DIM

    # ---- front-end conv1: im2col glue + fused matmul+ReLU kernel ----
    p1 = _patches_2d(inputs, 3, 2).reshape(B * T1 * F1, 9)
    c1 = pl.pallas_call(
        _conv1_kernel,
        out_shape=jax.ShapeDtypeStruct((B * T1 * F1, E), jnp.float32),
        in_specs=_vmem_specs(3),
        out_specs=_VMEM,
    )(p1, enc_p['sub_w1'], enc_p['sub_b1'])
    c1 = c1.reshape(B, T1, F1, E)
    p2 = _patches_cl(c1, 3, 2).reshape(B * T_SUB, F2 * 9 * E)   # (B*T', F2*9*E)

    # ---- decoder embedding gather (glue), time-major (U, B, H) ----
    emb_t = dec_p['embedding'][targets.T]

    operands = [
        p2, enc_p['w2bd'], enc_p['b2t'], enc_p['wproj'], enc_p['bproj'],
        enc_p['ff_lng'], enc_p['ff_lnb'], enc_p['ff_w1'], enc_p['ff_b1'],
        enc_p['ff_w2'], enc_p['ff_b2'],
        enc_p['mh_lng'], enc_p['mh_lnb'], enc_p['mh_wqkv'], enc_p['mh_bqkv'],
        enc_p['mh_wo'], enc_p['mh_bo'],
        enc_p['cv_lng'], enc_p['cv_lnb'], enc_p['cv_pw1w'], enc_p['cv_pw1b'],
        enc_p['cv_dww'], enc_p['cv_bng'], enc_p['cv_bnb'], enc_p['cv_pw2w'],
        enc_p['cv_pw2b'],
        enc_p['fin_lng'], enc_p['fin_lnb'],
        emb_t, dec_p['w_ih'], dec_p['b_ih'], dec_p['w_hh'], dec_p['b_hh'],
        dec_p['out_w'], dec_p['out_b'],
        params['we_pad'], params['wd_pad'],
    ]
    out = pl.pallas_call(
        _mega_kernel,
        out_shape=jax.ShapeDtypeStruct((B, T_SUB, TGT_LEN, CLASS_PAD), jnp.float32),
        in_specs=_vmem_specs(len(operands)),
        out_specs=_VMEM,
    )(*operands)
    return out[..., :NUM_CLASSES]                           # crop class padding (glue)


# ------------------------------ parameters -----------------------------------
class KeyGen:
    def __init__(self, key):
        self.key = key

    def __call__(self):
        self.key, sub = jax.random.split(self.key)
        return sub


def init_params(key):
    """Parameters pre-laid-out in kernel-ready form (bf16 matmul weights,
    (1,N) biases, block-diagonal conv2 weight, padded joint weights)."""
    kg = KeyGen(key)
    bf16 = jnp.bfloat16

    def nrm(shape):
        return 0.02 * jax.random.normal(kg(), shape, jnp.float32)

    def zeros(shape):
        return jnp.zeros(shape, jnp.float32)

    def ones(shape):
        return jnp.ones(shape, jnp.float32)

    E = ENCODER_DIM
    L = NUM_ENCODER_LAYERS
    K = CONV_KERNEL
    FFH = E * FF_EXPANSION
    CH = E * CONV_EXPANSION

    # conv2 weight as one block-diagonal matrix over the F2 frequency positions
    w2_base = nrm((9 * E, E))
    w2bd = jnp.zeros((F2 * 9 * E, F2 * E), jnp.float32)
    for f in range(F2):
        w2bd = w2bd.at[f * 9 * E:(f + 1) * 9 * E, f * E:(f + 1) * E].set(w2_base)

    encoder = {
        'sub_w1': nrm((9, E)).astype(bf16), 'sub_b1': nrm((1, E)),
        'w2bd': w2bd.astype(bf16),
        'b2t': jnp.tile(nrm((E,)), F2).reshape(1, F2 * E),
        'wproj': nrm((F2 * E, E)).astype(bf16), 'bproj': nrm((1, E)),
        'ff_lng': ones((L, 2, 1, E)), 'ff_lnb': zeros((L, 2, 1, E)),
        'ff_w1': nrm((L, 2, E, FFH)).astype(bf16), 'ff_b1': nrm((L, 2, 1, FFH)),
        'ff_w2': nrm((L, 2, FFH, E)).astype(bf16), 'ff_b2': nrm((L, 2, 1, E)),
        'mh_lng': ones((L, 1, E)), 'mh_lnb': zeros((L, 1, E)),
        'mh_wqkv': nrm((L, E, 3 * E)).astype(bf16), 'mh_bqkv': nrm((L, 1, 3 * E)),
        'mh_wo': nrm((L, E, E)).astype(bf16), 'mh_bo': nrm((L, 1, E)),
        'cv_lng': ones((L, 1, E)), 'cv_lnb': zeros((L, 1, E)),
        'cv_pw1w': nrm((L, E, CH)).astype(bf16), 'cv_pw1b': nrm((L, 1, CH)),
        'cv_dww': nrm((L, K, E)),
        'cv_bng': ones((L, 1, E)), 'cv_bnb': zeros((L, 1, E)),
        'cv_pw2w': nrm((L, E, E)).astype(bf16), 'cv_pw2b': nrm((L, 1, E)),
        'fin_lng': ones((L, 1, E)), 'fin_lnb': zeros((L, 1, E)),
    }

    H = DECODER_DIM
    decoder = {
        'embedding': nrm((NUM_CLASSES, H)),
        'w_ih': nrm((H, 4 * H)).astype(bf16), 'b_ih': nrm((1, 4 * H)),
        'w_hh': nrm((H, 4 * H)).astype(bf16), 'b_hh': nrm((1, 4 * H)),
        'out_w': nrm((H, E)).astype(bf16), 'out_b': nrm((1, E)),
    }

    fc_w = nrm((2 * E, NUM_CLASSES))
    fc_pad = jnp.pad(fc_w, ((0, 0), (0, CLASS_PAD - NUM_CLASSES)))
    return {'encoder': encoder, 'decoder': decoder,
            'we_pad': fc_pad[:E].astype(bf16), 'wd_pad': fc_pad[E:].astype(bf16)}


# --------------------------------- main ---------------------------------------
if __name__ == "__main__":
    root = jax.random.PRNGKey(0)
    k_par, k_in, k_tgt = jax.random.split(root, 3)

    params = init_params(k_par)
    inputs = jax.random.normal(k_in, (BATCH, SEQ_LEN, INPUT_DIM), jnp.float32)
    input_lengths = jnp.array([SEQ_LEN, SEQ_LEN - 2], jnp.int32)
    targets = jax.random.randint(k_tgt, (BATCH, TGT_LEN), 0, NUM_CLASSES,
                                 dtype=jnp.int32)
    target_lengths = jnp.array([TGT_LEN, TGT_LEN - 1], jnp.int32)

    fwd = jax.jit(conformer_forward)
    out = jax.block_until_ready(
        fwd(params, inputs, input_lengths, targets, target_lengths))

    assert out.shape == (BATCH, T_SUB, TGT_LEN, NUM_CLASSES), out.shape
    assert bool(jnp.all(jnp.isfinite(out)))
    print("KERNEL_OK")
</pallas_src>

<mosaic_0001>
module attributes {stable_mosaic.version = 11 : i64} {
  func.func @_conv1_kernel(%arg0: memref<126x9xf32, #tpu.memory_space<vmem>>, %arg1: memref<9x32xbf16, #tpu.memory_space<vmem>>, %arg2: memref<1x32xf32, #tpu.memory_space<vmem>>, %arg3: memref<126x32xf32, #tpu.memory_space<vmem>>) attributes {dimension_semantics = [], scalar_prefetch = 0 : i64, scratch_operands = 0 : i64, tpu.core_type = #tpu.core_type<tc>} {
    %c0 = arith.constant 0 : index
    %c0_0 = arith.constant 0 : index
    %0 = vector.load %arg0[%c0, %c0_0] : memref<126x9xf32, #tpu.memory_space<vmem>>, vector<126x9xf32>
    %c0_1 = arith.constant 0 : index
    %c0_2 = arith.constant 0 : index
    %1 = vector.load %arg1[%c0_1, %c0_2] : memref<9x32xbf16, #tpu.memory_space<vmem>>, vector<9x32xbf16>
    %c0_3 = arith.constant 0 : index
    %c0_4 = arith.constant 0 : index
    %2 = vector.load %arg2[%c0_3, %c0_4] : memref<1x32xf32, #tpu.memory_space<vmem>>, vector<1x32xf32>
    %3 = arith.truncf %0 : vector<126x9xf32> to vector<126x9xbf16>
    %cst = arith.constant dense<0.000000e+00> : vector<126x32xf32>
    %4 = tpu.matmul %3, %1, %cst {dimension_numbers = #tpu.dot_dimension_numbers<[1], [0], [0], [1], [0, 0, 1, 1], [], []>} : vector<126x9xbf16>, vector<9x32xbf16>, vector<126x32xf32> -> vector<126x32xf32>
    %5 = vector.broadcast %2 : vector<1x32xf32> to vector<126x32xf32>
    %6 = arith.addf %4, %5 : vector<126x32xf32>
    %cst_5 = arith.constant 0.000000e+00 : f32
    %7 = vector.broadcast %cst_5 : f32 to vector<126x32xf32>
    %8 = arith.maximumf %6, %7 : vector<126x32xf32>
    %c0_6 = arith.constant 0 : index
    %c0_7 = arith.constant 0 : index
    %9 = vector.load %arg3[%c0_6, %c0_7] : memref<126x32xf32, #tpu.memory_space<vmem>>, vector<126x32xf32>
    tpu.vector_store %arg3[%c0_6, %c0_7], %8 {strides = array<i32>} : memref<126x32xf32, #tpu.memory_space<vmem>>, vector<126x32xf32>,
    return
  }
}

module attributes {stable_mosaic.version = 11 : i64} {
  func.func @_mega_kernel(%arg0: memref<8x864xf32, #tpu.memory_space<vmem>>, %arg1: memref<864x96xbf16, #tpu.memory_space<vmem>>, %arg2: memref<1x96xf32, #tpu.memory_space<vmem>>, %arg3: memref<96x32xbf16, #tpu.memory_space<vmem>>, %arg4: memref<1x32xf32, #tpu.memory_space<vmem>>, %arg5: memref<2x2x1x32xf32, #tpu.memory_space<vmem>>, %arg6: memref<2x2x1x32xf32, #tpu.memory_space<vmem>>, %arg7: memref<2x2x32x128xbf16, #tpu.memory_space<vmem>>, %arg8: memref<2x2x1x128xf32, #tpu.memory_space<vmem>>, %arg9: memref<2x2x128x32xbf16, #tpu.memory_space<vmem>>, %arg10: memref<2x2x1x32xf32, #tpu.memory_space<vmem>>, %arg11: memref<2x1x32xf32, #tpu.memory_space<vmem>>, %arg12: memref<2x1x32xf32, #tpu.memory_space<vmem>>, %arg13: memref<2x32x96xbf16, #tpu.memory_space<vmem>>, %arg14: memref<2x1x96xf32, #tpu.memory_space<vmem>>, %arg15: memref<2x32x32xbf16, #tpu.memory_space<vmem>>, %arg16: memref<2x1x32xf32, #tpu.memory_space<vmem>>, %arg17: memref<2x1x32xf32, #tpu.memory_space<vmem>>, %arg18: memref<2x1x32xf32, #tpu.memory_space<vmem>>, %arg19: memref<2x32x64xbf16, #tpu.memory_space<vmem>>, %arg20: memref<2x1x64xf32, #tpu.memory_space<vmem>>, %arg21: memref<2x31x32xf32, #tpu.memory_space<vmem>>, %arg22: memref<2x1x32xf32, #tpu.memory_space<vmem>>, %arg23: memref<2x1x32xf32, #tpu.memory_space<vmem>>, %arg24: memref<2x32x32xbf16, #tpu.memory_space<vmem>>, %arg25: memref<2x1x32xf32, #tpu.memory_space<vmem>>, %arg26: memref<2x1x32xf32, #tpu.memory_space<vmem>>, %arg27: memref<2x1x32xf32, #tpu.memory_space<vmem>>, %arg28: memref<6x2x32xf32, #tpu.memory_space<vmem>>, %arg29: memref<32x128xbf16, #tpu.memory_space<vmem>>, %arg30: memref<1x128xf32, #tpu.memory_space<vmem>>, %arg31: memref<32x128xbf16, #tpu.memory_space<vmem>>, %arg32: memref<1x128xf32, #tpu.memory_space<vmem>>, %arg33: memref<32x32xbf16, #tpu.memory_space<vmem>>, %arg34: memref<1x32xf32, #tpu.memory_space<vmem>>, %arg35: memref<32x128xbf16, #tpu.memory_space<vmem>>, %arg36: memref<32x128xbf16, #tpu.memory_space<vmem>>, %arg37: memref<2x4x6x128xf32, #tpu.memory_space<vmem>>) attributes {dimension_semantics = [], scalar_prefetch = 0 : i64, scratch_operands = 0 : i64, tpu.core_type = #tpu.core_type<tc>} {
    %c0 = arith.constant 0 : index
    %c0_0 = arith.constant 0 : index
    %0 = vector.load %arg0[%c0, %c0_0] : memref<8x864xf32, #tpu.memory_space<vmem>>, vector<8x864xf32>
    %c0_1 = arith.constant 0 : index
    %c0_2 = arith.constant 0 : index
    %1 = vector.load %arg1[%c0_1, %c0_2] : memref<864x96xbf16, #tpu.memory_space<vmem>>, vector<864x96xbf16>
    %c0_3 = arith.constant 0 : index
    %c0_4 = arith.constant 0 : index
    %2 = vector.load %arg2[%c0_3, %c0_4] : memref<1x96xf32, #tpu.memory_space<vmem>>, vector<1x96xf32>
    %3 = arith.truncf %0 : vector<8x864xf32> to vector<8x864xbf16>
    %cst = arith.constant dense<0.000000e+00> : vector<8x96xf32>
    %4 = tpu.matmul %3, %1, %cst {dimension_numbers = #tpu.dot_dimension_numbers<[1], [0], [0], [1], [0, 0, 1, 1], [], []>} : vector<8x864xbf16>, vector<864x96xbf16>, vector<8x96xf32> -> vector<8x96xf32>
    %5 = vector.broadcast %2 : vector<1x96xf32> to vector<8x96xf32>
    %6 = arith.addf %4, %5 : vector<8x96xf32>
    %cst_5 = arith.constant 0.000000e+00 : f32
    %7 = vector.broadcast %cst_5 : f32 to vector<8x96xf32>
    %8 = arith.maximumf %6, %7 : vector<8x96xf32>
    %c0_6 = arith.constant 0 : index
    %c0_7 = arith.constant 0 : index
    %9 = vector.load %arg3[%c0_6, %c0_7] : memref<96x32xbf16, #tpu.memory_space<vmem>>, vector<96x32xbf16>
    %c0_8 = arith.constant 0 : index
    %c0_9 = arith.constant 0 : index
    %10 = vector.load %arg4[%c0_8, %c0_9] : memref<1x32xf32, #tpu.memory_space<vmem>>, vector<1x32xf32>
    %11 = arith.truncf %8 : vector<8x96xf32> to vector<8x96xbf16>
    %cst_10 = arith.constant dense<0.000000e+00> : vector<8x32xf32>
    %12 = tpu.matmul %11, %9, %cst_10 {dimension_numbers = #tpu.dot_dimension_numbers<[1], [0], [0], [1], [0, 0, 1, 1], [], []>} : vector<8x96xbf16>, vector<96x32xbf16>, vector<8x32xf32> -> vector<8x32xf32>
    %13 = vector.broadcast %10 : vector<1x32xf32> to vector<8x32xf32>
    %14 = arith.addf %12, %13 : vector<8x32xf32>
    %c0_11 = arith.constant 0 : index
    %c0_12 = arith.constant 0 : index
    %c0_13 = arith.constant 0 : index
    %c0_14 = arith.constant 0 : index
    %15 = vector.load %arg5[%c0_11, %c0_12, %c0_13, %c0_14] : memref<2x2x1x32xf32, #tpu.memory_space<vmem>>, vector<1x1x1x32xf32>
    %16 = vector.shape_cast %15 : vector<1x1x1x32xf32> to vector<1x32xf32>
    %c0_15 = arith.constant 0 : index
    %c0_16 = arith.constant 0 : index
    %c0_17 = arith.constant 0 : index
    %c0_18 = arith.constant 0 : index
    %17 = vector.load %arg6[%c0_15, %c0_16, %c0_17, %c0_18] : memref<2x2x1x32xf32, #tpu.memory_space<vmem>>, vector<1x1x1x32xf32>
    %18 = vector.shape_cast %17 : vector<1x1x1x32xf32> to vector<1x32xf32>
    %c0_19 = arith.constant 0 : index
    %c0_20 = arith.constant 0 : index
    %c0_21 = arith.constant 0 : index
    %c0_22 = arith.constant 0 : index
    %19 = vector.load %arg7[%c0_19, %c0_20, %c0_21, %c0_22] : memref<2x2x32x128xbf16, #tpu.memory_space<vmem>>, vector<1x1x32x128xbf16>
    %20 = vector.shape_cast %19 : vector<1x1x32x128xbf16> to vector<32x128xbf16>
    %c0_23 = arith.constant 0 : index
    %c0_24 = arith.constant 0 : index
    %c0_25 = arith.constant 0 : index
    %c0_26 = arith.constant 0 : index
    %21 = vector.load %arg8[%c0_23, %c0_24, %c0_25, %c0_26] : memref<2x2x1x128xf32, #tpu.memory_space<vmem>>, vector<1x1x1x128xf32>
    %22 = vector.shape_cast %21 : vector<1x1x1x128xf32> to vector<1x128xf32>
    %c0_27 = arith.constant 0 : index
    %c0_28 = arith.constant 0 : index
    %c0_29 = arith.constant 0 : index
    %c0_30 = arith.constant 0 : index
    %23 = vector.load %arg9[%c0_27, %c0_28, %c0_29, %c0_30] : memref<2x2x128x32xbf16, #tpu.memory_space<vmem>>, vector<1x1x128x32xbf16>
    %24 = vector.shape_cast %23 : vector<1x1x128x32xbf16> to vector<128x32xbf16>
    %c0_31 = arith.constant 0 : index
    %c0_32 = arith.constant 0 : index
    %c0_33 = arith.constant 0 : index
    %c0_34 = arith.constant 0 : index
    %25 = vector.load %arg10[%c0_31, %c0_32, %c0_33, %c0_34] : memref<2x2x1x32xf32, #tpu.memory_space<vmem>>, vector<1x1x1x32xf32>
    %26 = vector.shape_cast %25 : vector<1x1x1x32xf32> to vector<1x32xf32>
    %cst_35 = arith.constant dense<0.000000e+00> : vector<8xf32>
    %27 = vector.multi_reduction <add>, %14, %cst_35 [1] : vector<8x32xf32> to vector<8xf32>
    %28 = vector.shape_cast %27 : vector<8xf32> to vector<8x1xf32>
    %cst_36 = arith.constant 3.200000e+01 : f32
    %29 = vector.broadcast %cst_36 : f32 to vector<8x1xf32>
    %30 = arith.divf %28, %29 : vector<8x1xf32>
    %31 = vector.broadcast %30 : vector<8x1xf32> to vector<8x32xf32>
    %32 = arith.subf %14, %31 : vector<8x32xf32>
    %33 = arith.mulf %32, %32 : vector<8x32xf32>
    %cst_37 = arith.constant dense<0.000000e+00> : vector<8xf32>
    %34 = vector.multi_reduction <add>, %33, %cst_37 [1] : vector<8x32xf32> to vector<8xf32>
    %35 = vector.shape_cast %34 : vector<8xf32> to vector<8x1xf32>
    %cst_38 = arith.constant 3.200000e+01 : f32
    %36 = vector.broadcast %cst_38 : f32 to vector<8x1xf32>
    %37 = arith.divf %35, %36 : vector<8x1xf32>
    %38 = vector.broadcast %30 : vector<8x1xf32> to vector<8x32xf32>
    %39 = arith.subf %14, %38 : vector<8x32xf32>
    %cst_39 = arith.constant 9.99999974E-6 : f32
    %40 = vector.broadcast %cst_39 : f32 to vector<8x1xf32>
    %41 = arith.addf %37, %40 : vector<8x1xf32>
    %42 = math.rsqrt %41 : vector<8x1xf32>
    %43 = vector.broadcast %42 : vector<8x1xf32> to vector<8x32xf32>
    %44 = arith.mulf %39, %43 : vector<8x32xf32>
    %45 = vector.broadcast %16 : vector<1x32xf32> to vector<8x32xf32>
    %46 = arith.mulf %44, %45 : vector<8x32xf32>
    %47 = vector.broadcast %18 : vector<1x32xf32> to vector<8x32xf32>
    %48 = arith.addf %46, %47 : vector<8x32xf32>
    %49 = arith.truncf %48 : vector<8x32xf32> to vector<8x32xbf16>
    %cst_40 = arith.constant dense<0.000000e+00> : vector<8x128xf32>
    %50 = tpu.matmul %49, %20, %cst_40 {dimension_numbers = #tpu.dot_dimension_numbers<[1], [0], [0], [1], [0, 0, 1, 1], [], []>} : vector<8x32xbf16>, vector<32x128xbf16>, vector<8x128xf32> -> vector<8x128xf32>
    %51 = vector.broadcast %22 : vector<1x128xf32> to vector<8x128xf32>
    %52 = arith.addf %50, %51 : vector<8x128xf32>
    %53 = arith.negf %52 : vector<8x128xf32>
    %54 = math.exp %53 : vector<8x128xf32>
    %cst_41 = arith.constant 1.000000e+00 : f32
    %55 = vector.broadcast %cst_41 : f32 to vector<8x128xf32>
    %56 = arith.addf %55, %54 : vector<8x128xf32>
    %57 = arith.divf %55, %56 : vector<8x128xf32>
    %58 = arith.mulf %52, %57 : vector<8x128xf32>
    %59 = arith.truncf %58 : vector<8x128xf32> to vector<8x128xbf16>
    %cst_42 = arith.constant dense<0.000000e+00> : vector<8x32xf32>
    %60 = tpu.matmul %59, %24, %cst_42 {dimension_numbers = #tpu.dot_dimension_numbers<[1], [0], [0], [1], [0, 0, 1, 1], [], []>} : vector<8x128xbf16>, vector<128x32xbf16>, vector<8x32xf32> -> vector<8x32xf32>
    %61 = vector.broadcast %26 : vector<1x32xf32> to vector<8x32xf32>
    %62 = arith.addf %60, %61 : vector<8x32xf32>
    %cst_43 = arith.constant 5.000000e-01 : f32
    %63 = vector.broadcast %cst_43 : f32 to vector<8x32xf32>
    %64 = arith.mulf %63, %62 : vector<8x32xf32>
    %65 = arith.addf %14, %64 : vector<8x32xf32>
    %c0_44 = arith.constant 0 : index
    %c0_45 = arith.constant 0 : index
    %c0_46 = arith.constant 0 : index
    %66 = vector.load %arg11[%c0_44, %c0_45, %c0_46] : memref<2x1x32xf32, #tpu.memory_space<vmem>>, vector<1x1x32xf32>
    %67 = vector.shape_cast %66 : vector<1x1x32xf32> to vector<1x32xf32>
    %c0_47 = arith.constant 0 : index
    %c0_48 = arith.constant 0 : index
    %c0_49 = arith.constant 0 : index
    %68 = vector.load %arg12[%c0_47, %c0_48, %c0_49] : memref<2x1x32xf32, #tpu.memory_space<vmem>>, vector<1x1x32xf32>
    %69 = vector.shape_cast %68 : vector<1x1x32xf32> to vector<1x32xf32>
    %cst_50 = arith.constant dense<0.000000e+00> : vector<8xf32>
    %70 = vector.multi_reduction <add>, %65, %cst_50 [1] : vector<8x32xf32> to vector<8xf32>
    %71 = vector.shape_cast %70 : vector<8xf32> to vector<8x1xf32>
    %cst_51 = arith.constant 3.200000e+01 : f32
    %72 = vector.broadcast %cst_51 : f32 to vector<8x1xf32>
    %73 = arith.divf %71, %72 : vector<8x1xf32>
    %74 = vector.broadcast %73 : vector<8x1xf32> to vector<8x32xf32>
    %75 = arith.subf %65, %74 : vector<8x32xf32>
    %76 = arith.mulf %75, %75 : vector<8x32xf32>
    %cst_52 = arith.constant dense<0.000000e+00> : vector<8xf32>
    %77 = vector.multi_reduction <add>, %76, %cst_52 [1] : vector<8x32xf32> to vector<8xf32>
    %78 = vector.shape_cast %77 : vector<8xf32> to vector<8x1xf32>
    %cst_53 = arith.constant 3.200000e+01 : f32
    %79 = vector.broadcast %cst_53 : f32 to vector<8x1xf32>
    %80 = arith.divf %78, %79 : vector<8x1xf32>
    %81 = vector.broadcast %73 : vector<8x1xf32> to vector<8x32xf32>
    %82 = arith.subf %65, %81 : vector<8x32xf32>
    %cst_54 = arith.constant 9.99999974E-6 : f32
    %83 = vector.broadcast %cst_54 : f32 to vector<8x1xf32>
    %84 = arith.addf %80, %83 : vector<8x1xf32>
    %85 = math.rsqrt %84 : vector<8x1xf32>
    %86 = vector.broadcast %85 : vector<8x1xf32> to vector<8x32xf32>
    %87 = arith.mulf %82, %86 : vector<8x32xf32>
    %88 = vector.broadcast %67 : vector<1x32xf32> to vector<8x32xf32>
    %89 = arith.mulf %87, %88 : vector<8x32xf32>
    %90 = vector.broadcast %69 : vector<1x32xf32> to vector<8x32xf32>
    %91 = arith.addf %89, %90 : vector<8x32xf32>
    %c0_55 = arith.constant 0 : index
    %c0_56 = arith.constant 0 : index
    %c0_57 = arith.constant 0 : index
    %92 = vector.load %arg13[%c0_55, %c0_56, %c0_57] : memref<2x32x96xbf16, #tpu.memory_space<vmem>>, vector<1x32x96xbf16>
    %93 = vector.shape_cast %92 : vector<1x32x96xbf16> to vector<32x96xbf16>
    %c0_58 = arith.constant 0 : index
    %c0_59 = arith.constant 0 : index
    %c0_60 = arith.constant 0 : index
    %94 = vector.load %arg14[%c0_58, %c0_59, %c0_60] : memref<2x1x96xf32, #tpu.memory_space<vmem>>, vector<1x1x96xf32>
    %95 = vector.shape_cast %94 : vector<1x1x96xf32> to vector<1x96xf32>
    %96 = arith.truncf %91 : vector<8x32xf32> to vector<8x32xbf16>
    %cst_61 = arith.constant dense<0.000000e+00> : vector<8x96xf32>
    %97 = tpu.matmul %96, %93, %cst_61 {dimension_numbers = #tpu.dot_dimension_numbers<[1], [0], [0], [1], [0, 0, 1, 1], [], []>} : vector<8x32xbf16>, vector<32x96xbf16>, vector<8x96xf32> -> vector<8x96xf32>
    %98 = vector.broadcast %95 : vector<1x96xf32> to vector<8x96xf32>
    %99 = arith.addf %97, %98 : vector<8x96xf32>
    %100 = vector.shape_cast %99 : vector<8x96xf32> to vector<2x4x96xf32>
    %101 = vector.extract_strided_slice %100 {offsets = [0, 0, 0], sizes = [2, 4, 32], strides = [1, 1, 1]} : vector<2x4x96xf32> to vector<2x4x32xf32>
    %102 = vector.extract_strided_slice %100 {offsets = [0, 0, 32], sizes = [2, 4, 32], strides = [1, 1, 1]} : vector<2x4x96xf32> to vector<2x4x32xf32>
    %103 = vector.extract_strided_slice %100 {offsets = [0, 0, 64], sizes = [2, 4, 32], strides = [1, 1, 1]} : vector<2x4x96xf32> to vector<2x4x32xf32>
    %c0_62 = arith.constant 0 : index
    %c0_63 = arith.constant 0 : index
    %c0_64 = arith.constant 0 : index
    %104 = vector.load %arg15[%c0_62, %c0_63, %c0_64] : memref<2x32x32xbf16, #tpu.memory_space<vmem>>, vector<1x32x32xbf16>
    %105 = vector.shape_cast %104 : vector<1x32x32xbf16> to vector<32x32xbf16>
    %cst_65 = arith.constant 0.000000e+00 : f32
    %106 = vector.broadcast %cst_65 : f32 to vector<8x32xf32>
    %107 = vector.extract_strided_slice %101 {offsets = [0, 0, 0], sizes = [2, 4, 8], strides = [1, 1, 1]} : vector<2x4x32xf32> to vector<2x4x8xf32>
    %108 = arith.truncf %107 : vector<2x4x8xf32> to vector<2x4x8xbf16>
    %109 = vector.extract_strided_slice %102 {offsets = [0, 0, 0], sizes = [2, 4, 8], strides = [1, 1, 1]} : vector<2x4x32xf32> to vector<2x4x8xf32>
    %110 = arith.truncf %109 : vector<2x4x8xf32> to vector<2x4x8xbf16>
    "tpu.trace_start"() <{level = 10 : i32, message = "btd,bsd->bts"}> : () -> ()
    %cst_66 = arith.constant dense<0.000000e+00> : vector<2x4x4xf32>
    %111 = tpu.matmul %108, %110, %cst_66 {dimension_numbers = #tpu.dot_dimension_numbers<[2], [2], [1], [1], [0, 0, 0, 1, 1, 1], [0], [0]>} : vector<2x4x8xbf16>, vector<2x4x8xbf16>, vector<2x4x4xf32> -> vector<2x4x4xf32>
    "tpu.trace_stop"() : () -> ()
    %cst_67 = arith.constant 0.353553385 : f32
    %112 = vector.broadcast %cst_67 : f32 to vector<2x4x4xf32>
    %113 = arith.mulf %111, %112 : vector<2x4x4xf32>
    %cst_68 = arith.constant dense<0xFF800000> : vector<2x4xf32>
    %114 = vector.multi_reduction <maximumf>, %113, %cst_68 [2] : vector<2x4x4xf32> to vector<2x4xf32>
    %115 = vector.shape_cast %114 : vector<2x4xf32> to vector<2x4x1xf32>
    %116 = vector.broadcast %115 : vector<2x4x1xf32> to vector<2x4x4xf32>
    %117 = arith.subf %113, %116 : vector<2x4x4xf32>
    %118 = math.exp %117 : vector<2x4x4xf32>
    %cst_69 = arith.constant dense<0.000000e+00> : vector<2x4xf32>
    %119 = vector.multi_reduction <add>, %118, %cst_69 [2] : vector<2x4x4xf32> to vector<2x4xf32>
    %120 = vector.shape_cast %119 : vector<2x4xf32> to vector<2x4x1xf32>
    %121 = tpu.reciprocal %120 {approx = true} : vector<2x4x1xf32> -> vector<2x4x1xf32>
    %122 = vector.broadcast %121 : vector<2x4x1xf32> to vector<2x4x4xf32>
    %123 = arith.mulf %118, %122 : vector<2x4x4xf32>
    %124 = arith.truncf %123 : vector<2x4x4xf32> to vector<2x4x4xbf16>
    %125 = vector.extract_strided_slice %103 {offsets = [0, 0, 0], sizes = [2, 4, 8], strides = [1, 1, 1]} : vector<2x4x32xf32> to vector<2x4x8xf32>
    %126 = arith.truncf %125 : vector<2x4x8xf32> to vector<2x4x8xbf16>
    "tpu.trace_start"() <{level = 10 : i32, message = "bts,bsd->btd"}> : () -> ()
    %cst_70 = arith.constant dense<0.000000e+00> : vector<2x4x8xf32>
    %127 = tpu.matmul %124, %126, %cst_70 {dimension_numbers = #tpu.dot_dimension_numbers<[2], [1], [1], [2], [0, 0, 0, 1, 1, 2], [0], [0]>} : vector<2x4x4xbf16>, vector<2x4x8xbf16>, vector<2x4x8xf32> -> vector<2x4x8xf32>
    "tpu.trace_stop"() : () -> ()
    %128 = vector.shape_cast %127 : vector<2x4x8xf32> to vector<8x8xf32>
    %129 = vector.extract_strided_slice %105 {offsets = [0, 0], sizes = [8, 32], strides = [1, 1]} : vector<32x32xbf16> to vector<8x32xbf16>
    %130 = arith.truncf %128 : vector<8x8xf32> to vector<8x8xbf16>
    %cst_71 = arith.constant dense<0.000000e+00> : vector<8x32xf32>
    %131 = tpu.matmul %130, %129, %cst_71 {dimension_numbers = #tpu.dot_dimension_numbers<[1], [0], [0], [1], [0, 0, 1, 1], [], []>} : vector<8x8xbf16>, vector<8x32xbf16>, vector<8x32xf32> -> vector<8x32xf32>
    %132 = arith.addf %106, %131 : vector<8x32xf32>
    %133 = vector.extract_strided_slice %101 {offsets = [0, 0, 8], sizes = [2, 4, 8], strides = [1, 1, 1]} : vector<2x4x32xf32> to vector<2x4x8xf32>
    %134 = arith.truncf %133 : vector<2x4x8xf32> to vector<2x4x8xbf16>
    %135 = vector.extract_strided_slice %102 {offsets = [0, 0, 8], sizes = [2, 4, 8], strides = [1, 1, 1]} : vector<2x4x32xf32> to vector<2x4x8xf32>
    %136 = arith.truncf %135 : vector<2x4x8xf32> to vector<2x4x8xbf16>
    "tpu.trace_start"() <{level = 10 : i32, message = "btd,bsd->bts"}> : () -> ()
    %cst_72 = arith.constant dense<0.000000e+00> : vector<2x4x4xf32>
    %137 = tpu.matmul %134, %136, %cst_72 {dimension_numbers = #tpu.dot_dimension_numbers<[2], [2], [1], [1], [0, 0, 0, 1, 1, 1], [0], [0]>} : vector<2x4x8xbf16>, vector<2x4x8xbf16>, vector<2x4x4xf32> -> vector<2x4x4xf32>
    "tpu.trace_stop"() : () -> ()
    %cst_73 = arith.constant 0.353553385 : f32
    %138 = vector.broadcast %cst_73 : f32 to vector<2x4x4xf32>
    %139 = arith.mulf %137, %138 : vector<2x4x4xf32>
    %cst_74 = arith.constant dense<0xFF800000> : vector<2x4xf32>
    %140 = vector.multi_reduction <maximumf>, %139, %cst_74 [2] : vector<2x4x4xf32> to vector<2x4xf32>
    %141 = vector.shape_cast %140 : vector<2x4xf32> to vector<2x4x1xf32>
    %142 = vector.broadcast %141 : vector<2x4x1xf32> to vector<2x4x4xf32>
    %143 = arith.subf %139, %142 : vector<2x4x4xf32>
    %144 = math.exp %143 : vector<2x4x4xf32>
    %cst_75 = arith.constant dense<0.000000e+00> : vector<2x4xf32>
    %145 = vector.multi_reduction <add>, %144, %cst_75 [2] : vector<2x4x4xf32> to vector<2x4xf32>
    %146 = vector.shape_cast %145 : vector<2x4xf32> to vector<2x4x1xf32>
    %147 = tpu.reciprocal %146 {approx = true} : vector<2x4x1xf32> -> vector<2x4x1xf32>
    %148 = vector.broadcast %147 : vector<2x4x1xf32> to vector<2x4x4xf32>
    %149 = arith.mulf %144, %148 : vector<2x4x4xf32>
    %150 = arith.truncf %149 : vector<2x4x4xf32> to vector<2x4x4xbf16>
    %151 = vector.extract_strided_slice %103 {offsets = [0, 0, 8], sizes = [2, 4, 8], strides = [1, 1, 1]} : vector<2x4x32xf32> to vector<2x4x8xf32>
    %152 = arith.truncf %151 : vector<2x4x8xf32> to vector<2x4x8xbf16>
    "tpu.trace_start"() <{level = 10 : i32, message = "bts,bsd->btd"}> : () -> ()
    %cst_76 = arith.constant dense<0.000000e+00> : vector<2x4x8xf32>
    %153 = tpu.matmul %150, %152, %cst_76 {dimension_numbers = #tpu.dot_dimension_numbers<[2], [1], [1], [2], [0, 0, 0, 1, 1, 2], [0], [0]>} : vector<2x4x4xbf16>, vector<2x4x8xbf16>, vector<2x4x8xf32> -> vector<2x4x8xf32>
    "tpu.trace_stop"() : () -> ()
    %154 = vector.shape_cast %153 : vector<2x4x8xf32> to vector<8x8xf32>
    %155 = vector.extract_strided_slice %105 {offsets = [8, 0], sizes = [8, 32], strides = [1, 1]} : vector<32x32xbf16> to vector<8x32xbf16>
    %156 = arith.truncf %154 : vector<8x8xf32> to vector<8x8xbf16>
    %cst_77 = arith.constant dense<0.000000e+00> : vector<8x32xf32>
    %157 = tpu.matmul %156, %155, %cst_77 {dimension_numbers = #tpu.dot_dimension_numbers<[1], [0], [0], [1], [0, 0, 1, 1], [], []>} : vector<8x8xbf16>, vector<8x32xbf16>, vector<8x32xf32> -> vector<8x32xf32>
    %158 = arith.addf %132, %157 : vector<8x32xf32>
    %159 = vector.extract_strided_slice %101 {offsets = [0, 0, 16], sizes = [2, 4, 8], strides = [1, 1, 1]} : vector<2x4x32xf32> to vector<2x4x8xf32>
    %160 = arith.truncf %159 : vector<2x4x8xf32> to vector<2x4x8xbf16>
    %161 = vector.extract_strided_slice %102 {offsets = [0, 0, 16], sizes = [2, 4, 8], strides = [1, 1, 1]} : vector<2x4x32xf32> to vector<2x4x8xf32>
    %162 = arith.truncf %161 : vector<2x4x8xf32> to vector<2x4x8xbf16>
    "tpu.trace_start"() <{level = 10 : i32, message = "btd,bsd->bts"}> : () -> ()
    %cst_78 = arith.constant dense<0.000000e+00> : vector<2x4x4xf32>
    %163 = tpu.matmul %160, %162, %cst_78 {dimension_numbers = #tpu.dot_dimension_numbers<[2], [2], [1], [1], [0, 0, 0, 1, 1, 1], [0], [0]>} : vector<2x4x8xbf16>, vector<2x4x8xbf16>, vector<2x4x4xf32> -> vector<2x4x4xf32>
    "tpu.trace_stop"() : () -> ()
    %cst_79 = arith.constant 0.353553385 : f32
    %164 = vector.broadcast %cst_79 : f32 to vector<2x4x4xf32>
    %165 = arith.mulf %163, %164 : vector<2x4x4xf32>
    %cst_80 = arith.constant dense<0xFF800000> : vector<2x4xf32>
    %166 = vector.multi_reduction <maximumf>, %165, %cst_80 [2] : vector<2x4x4xf32> to vector<2x4xf32>
    %167 = vector.shape_cast %166 : vector<2x4xf32> to vector<2x4x1xf32>
    %168 = vector.broadcast %167 : vector<2x4x1xf32> to vector<2x4x4xf32>
    %169 = arith.subf %165, %168 : vector<2x4x4xf32>
    %170 = math.exp %169 : vector<2x4x4xf32>
    %cst_81 = arith.constant dense<0.000000e+00> : vector<2x4xf32>
    %171 = vector.multi_reduction <add>, %170, %cst_81 [2] : vector<2x4x4xf32> to vector<2x4xf32>
    %172 = vector.shape_cast %171 : vector<2x4xf32> to vector<2x4x1xf32>
    %173 = tpu.reciprocal %172 {approx = true} : vector<2x4x1xf32> -> vector<2x4x1xf32>
    %174 = vector.broadcast %173 : vector<2x4x1xf32> to vector<2x4x4xf32>
    %175 = arith.mulf %170, %174 : vector<2x4x4xf32>
    %176 = arith.truncf %175 : vector<2x4x4xf32> to vector<2x4x4xbf16>
    %177 = vector.extract_strided_slice %103 {offsets = [0, 0, 16], sizes = [2, 4, 8], strides = [1, 1, 1]} : vector<2x4x32xf32> to vector<2x4x8xf32>
    %178 = arith.truncf %177 : vector<2x4x8xf32> to vector<2x4x8xbf16>
    "tpu.trace_start"() <{level = 10 : i32, message = "bts,bsd->btd"}> : () -> ()
    %cst_82 = arith.constant dense<0.000000e+00> : vector<2x4x8xf32>
    %179 = tpu.matmul %176, %178, %cst_82 {dimension_numbers = #tpu.dot_dimension_numbers<[2], [1], [1], [2], [0, 0, 0, 1, 1, 2], [0], [0]>} : vector<2x4x4xbf16>, vector<2x4x8xbf16>, vector<2x4x8xf32> -> vector<2x4x8xf32>
    "tpu.trace_stop"() : () -> ()
    %180 = vector.shape_cast %179 : vector<2x4x8xf32> to vector<8x8xf32>
    %181 = vector.extract_strided_slice %105 {offsets = [16, 0], sizes = [8, 32], strides = [1, 1]} : vector<32x32xbf16> to vector<8x32xbf16>
    %182 = arith.truncf %180 : vector<8x8xf32> to vector<8x8xbf16>
    %cst_83 = arith.constant dense<0.000000e+00> : vector<8x32xf32>
    %183 = tpu.matmul %182, %181, %cst_83 {dimension_numbers = #tpu.dot_dimension_numbers<[1], [0], [0], [1], [0, 0, 1, 1], [], []>} : vector<8x8xbf16>, vector<8x32xbf16>, vector<8x32xf32> -> vector<8x32xf32>
    %184 = arith.addf %158, %183 : vector<8x32xf32>
    %185 = vector.extract_strided_slice %101 {offsets = [0, 0, 24], sizes = [2, 4, 8], strides = [1, 1, 1]} : vector<2x4x32xf32> to vector<2x4x8xf32>
    %186 = arith.truncf %185 : vector<2x4x8xf32> to vector<2x4x8xbf16>
    %187 = vector.extract_strided_slice %102 {offsets = [0, 0, 24], sizes = [2, 4, 8], strides = [1, 1, 1]} : vector<2x4x32xf32> to vector<2x4x8xf32>
    %188 = arith.truncf %187 : vector<2x4x8xf32> to vector<2x4x8xbf16>
    "tpu.trace_start"() <{level = 10 : i32, message = "btd,bsd->bts"}> : () -> ()
    %cst_84 = arith.constant dense<0.000000e+00> : vector<2x4x4xf32>
    %189 = tpu.matmul %186, %188, %cst_84 {dimension_numbers = #tpu.dot_dimension_numbers<[2], [2], [1], [1], [0, 0, 0, 1, 1, 1], [0], [0]>} : vector<2x4x8xbf16>, vector<2x4x8xbf16>, vector<2x4x4xf32> -> vector<2x4x4xf32>
    "tpu.trace_stop"() : () -> ()
    %cst_85 = arith.constant 0.353553385 : f32
    %190 = vector.broadcast %cst_85 : f32 to vector<2x4x4xf32>
    %191 = arith.mulf %189, %190 : vector<2x4x4xf32>
    %cst_86 = arith.constant dense<0xFF800000> : vector<2x4xf32>
    %192 = vector.multi_reduction <maximumf>, %191, %cst_86 [2] : vector<2x4x4xf32> to vector<2x4xf32>
    %193 = vector.shape_cast %192 : vector<2x4xf32> to vector<2x4x1xf32>
    %194 = vector.broadcast %193 : vector<2x4x1xf32> to vector<2x4x4xf32>
    %195 = arith.subf %191, %194 : vector<2x4x4xf32>
    %196 = math.exp %195 : vector<2x4x4xf32>
    %cst_87 = arith.constant dense<0.000000e+00> : vector<2x4xf32>
    %197 = vector.multi_reduction <add>, %196, %cst_87 [2] : vector<2x4x4xf32> to vector<2x4xf32>
    %198 = vector.shape_cast %197 : vector<2x4xf32> to vector<2x4x1xf32>
    %199 = tpu.reciprocal %198 {approx = true} : vector<2x4x1xf32> -> vector<2x4x1xf32>
    %200 = vector.broadcast %199 : vector<2x4x1xf32> to vector<2x4x4xf32>
    %201 = arith.mulf %196, %200 : vector<2x4x4xf32>
    %202 = arith.truncf %201 : vector<2x4x4xf32> to vector<2x4x4xbf16>
    %203 = vector.extract_strided_slice %103 {offsets = [0, 0, 24], sizes = [2, 4, 8], strides = [1, 1, 1]} : vector<2x4x32xf32> to vector<2x4x8xf32>
    %204 = arith.truncf %203 : vector<2x4x8xf32> to vector<2x4x8xbf16>
    "tpu.trace_start"() <{level = 10 : i32, message = "bts,bsd->btd"}> : () -> ()
    %cst_88 = arith.constant dense<0.000000e+00> : vector<2x4x8xf32>
    %205 = tpu.matmul %202, %204, %cst_88 {dimension_numbers = #tpu.dot_dimension_numbers<[2], [1], [1], [2], [0, 0, 0, 1, 1, 2], [0], [0]>} : vector<2x4x4xbf16>, vector<2x4x8xbf16>, vector<2x4x8xf32> -> vector<2x4x8xf32>
    "tpu.trace_stop"() : () -> ()
    %206 = vector.shape_cast %205 : vector<2x4x8xf32> to vector<8x8xf32>
    %207 = vector.extract_strided_slice %105 {offsets = [24, 0], sizes = [8, 32], strides = [1, 1]} : vector<32x32xbf16> to vector<8x32xbf16>
    %208 = arith.truncf %206 : vector<8x8xf32> to vector<8x8xbf16>
    %cst_89 = arith.constant dense<0.000000e+00> : vector<8x32xf32>
    %209 = tpu.matmul %208, %207, %cst_89 {dimension_numbers = #tpu.dot_dimension_numbers<[1], [0], [0], [1], [0, 0, 1, 1], [], []>} : vector<8x8xbf16>, vector<8x32xbf16>, vector<8x32xf32> -> vector<8x32xf32>
    %210 = arith.addf %184, %209 : vector<8x32xf32>
    %211 = arith.addf %65, %210 : vector<8x32xf32>
    %c0_90 = arith.constant 0 : index
    %c0_91 = arith.constant 0 : index
    %c0_92 = arith.constant 0 : index
    %212 = vector.load %arg16[%c0_90, %c0_91, %c0_92] : memref<2x1x32xf32, #tpu.memory_space<vmem>>, vector<1x1x32xf32>
    %213 = vector.shape_cast %212 : vector<1x1x32xf32> to vector<1x32xf32>
    %214 = vector.broadcast %213 : vector<1x32xf32> to vector<8x32xf32>
    %215 = arith.addf %211, %214 : vector<8x32xf32>
    %c0_93 = arith.constant 0 : index
    %c0_94 = arith.constant 0 : index
    %c0_95 = arith.constant 0 : index
    %216 = vector.load %arg17[%c0_93, %c0_94, %c0_95] : memref<2x1x32xf32, #tpu.memory_space<vmem>>, vector<1x1x32xf32>
    %217 = vector.shape_cast %216 : vector<1x1x32xf32> to vector<1x32xf32>
    %c0_96 = arith.constant 0 : index
    %c0_97 = arith.constant 0 : index
    %c0_98 = arith.constant 0 : index
    %218 = vector.load %arg18[%c0_96, %c0_97, %c0_98] : memref<2x1x32xf32, #tpu.memory_space<vmem>>, vector<1x1x32xf32>
    %219 = vector.shape_cast %218 : vector<1x1x32xf32> to vector<1x32xf32>
    %cst_99 = arith.constant dense<0.000000e+00> : vector<8xf32>
    %220 = vector.multi_reduction <add>, %215, %cst_99 [1] : vector<8x32xf32> to vector<8xf32>
    %221 = vector.shape_cast %220 : vector<8xf32> to vector<8x1xf32>
    %cst_100 = arith.constant 3.200000e+01 : f32
    %222 = vector.broadcast %cst_100 : f32 to vector<8x1xf32>
    %223 = arith.divf %221, %222 : vector<8x1xf32>
    %224 = vector.broadcast %223 : vector<8x1xf32> to vector<8x32xf32>
    %225 = arith.subf %215, %224 : vector<8x32xf32>
    %226 = arith.mulf %225, %225 : vector<8x32xf32>
    %cst_101 = arith.constant dense<0.000000e+00> : vector<8xf32>
    %227 = vector.multi_reduction <add>, %226, %cst_101 [1] : vector<8x32xf32> to vector<8xf32>
    %228 = vector.shape_cast %227 : vector<8xf32> to vector<8x1xf32>
    %cst_102 = arith.constant 3.200000e+01 : f32
    %229 = vector.broadcast %cst_102 : f32 to vector<8x1xf32>
    %230 = arith.divf %228, %229 : vector<8x1xf32>
    %231 = vector.broadcast %223 : vector<8x1xf32> to vector<8x32xf32>
    %232 = arith.subf %215, %231 : vector<8x32xf32>
    %cst_103 = arith.constant 9.99999974E-6 : f32
    %233 = vector.broadcast %cst_103 : f32 to vector<8x1xf32>
    %234 = arith.addf %230, %233 : vector<8x1xf32>
    %235 = math.rsqrt %234 : vector<8x1xf32>
    %236 = vector.broadcast %235 : vector<8x1xf32> to vector<8x32xf32>
    %237 = arith.mulf %232, %236 : vector<8x32xf32>
    %238 = vector.broadcast %217 : vector<1x32xf32> to vector<8x32xf32>
    %239 = arith.mulf %237, %238 : vector<8x32xf32>
    %240 = vector.broadcast %219 : vector<1x32xf32> to vector<8x32xf32>
    %241 = arith.addf %239, %240 : vector<8x32xf32>
    %c0_104 = arith.constant 0 : index
    %c0_105 = arith.constant 0 : index
    %c0_106 = arith.constant 0 : index
    %242 = vector.load %arg19[%c0_104, %c0_105, %c0_106] : memref<2x32x64xbf16, #tpu.memory_space<vmem>>, vector<1x32x64xbf16>
    %243 = vector.shape_cast %242 : vector<1x32x64xbf16> to vector<32x64xbf16>
    %c0_107 = arith.constant 0 : index
    %c0_108 = arith.constant 0 : index
    %c0_109 = arith.constant 0 : index
    %244 = vector.load %arg20[%c0_107, %c0_108, %c0_109] : memref<2x1x64xf32, #tpu.memory_space<vmem>>, vector<1x1x64xf32>
    %245 = vector.shape_cast %244 : vector<1x1x64xf32> to vector<1x64xf32>
    %246 = arith.truncf %241 : vector<8x32xf32> to vector<8x32xbf16>
    %cst_110 = arith.constant dense<0.000000e+00> : vector<8x64xf32>
    %247 = tpu.matmul %246, %243, %cst_110 {dimension_numbers = #tpu.dot_dimension_numbers<[1], [0], [0], [1], [0, 0, 1, 1], [], []>} : vector<8x32xbf16>, vector<32x64xbf16>, vector<8x64xf32> -> vector<8x64xf32>
    %248 = vector.broadcast %245 : vector<1x64xf32> to vector<8x64xf32>
    %249 = arith.addf %247, %248 : vector<8x64xf32>
    %250 = vector.extract_strided_slice %249 {offsets = [0, 0], sizes = [8, 32], strides = [1, 1]} : vector<8x64xf32> to vector<8x32xf32>
    %251 = vector.extract_strided_slice %249 {offsets = [0, 32], sizes = [8, 32], strides = [1, 1]} : vector<8x64xf32> to vector<8x32xf32>
    %252 = arith.negf %251 : vector<8x32xf32>
    %253 = math.exp %252 : vector<8x32xf32>
    %cst_111 = arith.constant 1.000000e+00 : f32
    %254 = vector.broadcast %cst_111 : f32 to vector<8x32xf32>
    %255 = arith.addf %254, %253 : vector<8x32xf32>
    %256 = arith.divf %254, %255 : vector<8x32xf32>
    %257 = arith.mulf %250, %256 : vector<8x32xf32>
    %258 = vector.shape_cast %257 : vector<8x32xf32> to vector<2x4x32xf32>
    %c0_112 = arith.constant 0 : index
    %c0_113 = arith.constant 0 : index
    %c0_114 = arith.constant 0 : index
    %259 = vector.load %arg21[%c0_112, %c0_113, %c0_114] : memref<2x31x32xf32, #tpu.memory_space<vmem>>, vector<1x31x32xf32>
    %260 = vector.shape_cast %259 : vector<1x31x32xf32> to vector<31x32xf32>
    %261 = vector.extract_strided_slice %258 {offsets = [0, 0, 0], sizes = [2, 1, 32], strides = [1, 1, 1]} : vector<2x4x32xf32> to vector<2x1x32xf32>
    %262 = vector.shape_cast %261 : vector<2x1x32xf32> to vector<2x32xf32>
    %263 = vector.extract_strided_slice %260 {offsets = [15, 0], sizes = [1, 32], strides = [1, 1]} : vector<31x32xf32> to vector<1x32xf32>
    %264 = vector.broadcast %263 : vector<1x32xf32> to vector<2x32xf32>
    %265 = arith.mulf %262, %264 : vector<2x32xf32>
    %266 = vector.extract_strided_slice %258 {offsets = [0, 1, 0], sizes = [2, 1, 32], strides = [1, 1, 1]} : vector<2x4x32xf32> to vector<2x1x32xf32>
    %267 = vector.shape_cast %266 : vector<2x1x32xf32> to vector<2x32xf32>
    %268 = vector.extract_strided_slice %260 {offsets = [16, 0], sizes = [1, 32], strides = [1, 1]} : vector<31x32xf32> to vector<1x32xf32>
    %269 = vector.broadcast %268 : vector<1x32xf32> to vector<2x32xf32>
    %270 = arith.mulf %267, %269 : vector<2x32xf32>
    %271 = arith.addf %265, %270 : vector<2x32xf32>
    %272 = vector.extract_strided_slice %258 {offsets = [0, 2, 0], sizes = [2, 1, 32], strides = [1, 1, 1]} : vector<2x4x32xf32> to vector<2x1x32xf32>
    %273 = vector.shape_cast %272 : vector<2x1x32xf32> to vector<2x32xf32>
    %274 = vector.extract_strided_slice %260 {offsets = [17, 0], sizes = [1, 32], strides = [1, 1]} : vector<31x32xf32> to vector<1x32xf32>
    %275 = vector.broadcast %274 : vector<1x32xf32> to vector<2x32xf32>
    %276 = arith.mulf %273, %275 : vector<2x32xf32>
    %277 = arith.addf %271, %276 : vector<2x32xf32>
    %278 = vector.extract_strided_slice %258 {offsets = [0, 3, 0], sizes = [2, 1, 32], strides = [1, 1, 1]} : vector<2x4x32xf32> to vector<2x1x32xf32>
    %279 = vector.shape_cast %278 : vector<2x1x32xf32> to vector<2x32xf32>
    %280 = vector.extract_strided_slice %260 {offsets = [18, 0], sizes = [1, 32], strides = [1, 1]} : vector<31x32xf32> to vector<1x32xf32>
    %281 = vector.broadcast %280 : vector<1x32xf32> to vector<2x32xf32>
    %282 = arith.mulf %279, %281 : vector<2x32xf32>
    %283 = arith.addf %277, %282 : vector<2x32xf32>
    %284 = vector.extract_strided_slice %258 {offsets = [0, 0, 0], sizes = [2, 1, 32], strides = [1, 1, 1]} : vector<2x4x32xf32> to vector<2x1x32xf32>
    %285 = vector.shape_cast %284 : vector<2x1x32xf32> to vector<2x32xf32>
    %286 = vector.extract_strided_slice %260 {offsets = [14, 0], sizes = [1, 32], strides = [1, 1]} : vector<31x32xf32> to vector<1x32xf32>
    %287 = vector.broadcast %286 : vector<1x32xf32> to vector<2x32xf32>
    %288 = arith.mulf %285, %287 : vector<2x32xf32>
    %289 = vector.extract_strided_slice %258 {offsets = [0, 1, 0], sizes = [2, 1, 32], strides = [1, 1, 1]} : vector<2x4x32xf32> to vector<2x1x32xf32>
    %290 = vector.shape_cast %289 : vector<2x1x32xf32> to vector<2x32xf32>
    %291 = vector.extract_strided_slice %260 {offsets = [15, 0], sizes = [1, 32], strides = [1, 1]} : vector<31x32xf32> to vector<1x32xf32>
    %292 = vector.broadcast %291 : vector<1x32xf32> to vector<2x32xf32>
    %293 = arith.mulf %290, %292 : vector<2x32xf32>
    %294 = arith.addf %288, %293 : vector<2x32xf32>
    %295 = vector.extract_strided_slice %258 {offsets = [0, 2, 0], sizes = [2, 1, 32], strides = [1, 1, 1]} : vector<2x4x32xf32> to vector<2x1x32xf32>
    %296 = vector.shape_cast %295 : vector<2x1x32xf32> to vector<2x32xf32>
    %297 = vector.extract_strided_slice %260 {offsets = [16, 0], sizes = [1, 32], strides = [1, 1]} : vector<31x32xf32> to vector<1x32xf32>
    %298 = vector.broadcast %297 : vector<1x32xf32> to vector<2x32xf32>
    %299 = arith.mulf %296, %298 : vector<2x32xf32>
    %300 = arith.addf %294, %299 : vector<2x32xf32>
    %301 = vector.extract_strided_slice %258 {offsets = [0, 3, 0], sizes = [2, 1, 32], strides = [1, 1, 1]} : vector<2x4x32xf32> to vector<2x1x32xf32>
    %302 = vector.shape_cast %301 : vector<2x1x32xf32> to vector<2x32xf32>
    %303 = vector.extract_strided_slice %260 {offsets = [17, 0], sizes = [1, 32], strides = [1, 1]} : vector<31x32xf32> to vector<1x32xf32>
    %304 = vector.broadcast %303 : vector<1x32xf32> to vector<2x32xf32>
    %305 = arith.mulf %302, %304 : vector<2x32xf32>
    %306 = arith.addf %300, %305 : vector<2x32xf32>
    %307 = vector.extract_strided_slice %258 {offsets = [0, 0, 0], sizes = [2, 1, 32], strides = [1, 1, 1]} : vector<2x4x32xf32> to vector<2x1x32xf32>
    %308 = vector.shape_cast %307 : vector<2x1x32xf32> to vector<2x32xf32>
    %309 = vector.extract_strided_slice %260 {offsets = [13, 0], sizes = [1, 32], strides = [1, 1]} : vector<31x32xf32> to vector<1x32xf32>
    %310 = vector.broadcast %309 : vector<1x32xf32> to vector<2x32xf32>
    %311 = arith.mulf %308, %310 : vector<2x32xf32>
    %312 = vector.extract_strided_slice %258 {offsets = [0, 1, 0], sizes = [2, 1, 32], strides = [1, 1, 1]} : vector<2x4x32xf32> to vector<2x1x32xf32>
    %313 = vector.shape_cast %312 : vector<2x1x32xf32> to vector<2x32xf32>
    %314 = vector.extract_strided_slice %260 {offsets = [14, 0], sizes = [1, 32], strides = [1, 1]} : vector<31x32xf32> to vector<1x32xf32>
    %315 = vector.broadcast %314 : vector<1x32xf32> to vector<2x32xf32>
    %316 = arith.mulf %313, %315 : vector<2x32xf32>
    %317 = arith.addf %311, %316 : vector<2x32xf32>
    %318 = vector.extract_strided_slice %258 {offsets = [0, 2, 0], sizes = [2, 1, 32], strides = [1, 1, 1]} : vector<2x4x32xf32> to vector<2x1x32xf32>
    %319 = vector.shape_cast %318 : vector<2x1x32xf32> to vector<2x32xf32>
    %320 = vector.extract_strided_slice %260 {offsets = [15, 0], sizes = [1, 32], strides = [1, 1]} : vector<31x32xf32> to vector<1x32xf32>
    %321 = vector.broadcast %320 : vector<1x32xf32> to vector<2x32xf32>
    %322 = arith.mulf %319, %321 : vector<2x32xf32>
    %323 = arith.addf %317, %322 : vector<2x32xf32>
    %324 = vector.extract_strided_slice %258 {offsets = [0, 3, 0], sizes = [2, 1, 32], strides = [1, 1, 1]} : vector<2x4x32xf32> to vector<2x1x32xf32>
    %325 = vector.shape_cast %324 : vector<2x1x32xf32> to vector<2x32xf32>
    %326 = vector.extract_strided_slice %260 {offsets = [16, 0], sizes = [1, 32], strides = [1, 1]} : vector<31x32xf32> to vector<1x32xf32>
    %327 = vector.broadcast %326 : vector<1x32xf32> to vector<2x32xf32>
    %328 = arith.mulf %325, %327 : vector<2x32xf32>
    %329 = arith.addf %323, %328 : vector<2x32xf32>
    %330 = vector.extract_strided_slice %258 {offsets = [0, 0, 0], sizes = [2, 1, 32], strides = [1, 1, 1]} : vector<2x4x32xf32> to vector<2x1x32xf32>
    %331 = vector.shape_cast %330 : vector<2x1x32xf32> to vector<2x32xf32>
    %332 = vector.extract_strided_slice %260 {offsets = [12, 0], sizes = [1, 32], strides = [1, 1]} : vector<31x32xf32> to vector<1x32xf32>
    %333 = vector.broadcast %332 : vector<1x32xf32> to vector<2x32xf32>
    %334 = arith.mulf %331, %333 : vector<2x32xf32>
    %335 = vector.extract_strided_slice %258 {offsets = [0, 1, 0], sizes = [2, 1, 32], strides = [1, 1, 1]} : vector<2x4x32xf32> to vector<2x1x32xf32>
    %336 = vector.shape_cast %335 : vector<2x1x32xf32> to vector<2x32xf32>
    %337 = vector.extract_strided_slice %260 {offsets = [13, 0], sizes = [1, 32], strides = [1, 1]} : vector<31x32xf32> to vector<1x32xf32>
    %338 = vector.broadcast %337 : vector<1x32xf32> to vector<2x32xf32>
    %339 = arith.mulf %336, %338 : vector<2x32xf32>
    %340 = arith.addf %334, %339 : vector<2x32xf32>
    %341 = vector.extract_strided_slice %258 {offsets = [0, 2, 0], sizes = [2, 1, 32], strides = [1, 1, 1]} : vector<2x4x32xf32> to vector<2x1x32xf32>
    %342 = vector.shape_cast %341 : vector<2x1x32xf32> to vector<2x32xf32>
    %343 = vector.extract_strided_slice %260 {offsets = [14, 0], sizes = [1, 32], strides = [1, 1]} : vector<31x32xf32> to vector<1x32xf32>
    %344 = vector.broadcast %343 : vector<1x32xf32> to vector<2x32xf32>
    %345 = arith.mulf %342, %344 : vector<2x32xf32>
    %346 = arith.addf %340, %345 : vector<2x32xf32>
    %347 = vector.extract_strided_slice %258 {offsets = [0, 3, 0], sizes = [2, 1, 32], strides = [1, 1, 1]} : vector<2x4x32xf32> to vector<2x1x32xf32>
    %348 = vector.shape_cast %347 : vector<2x1x32xf32> to vector<2x32xf32>
    %349 = vector.extract_strided_slice %260 {offsets = [15, 0], sizes = [1, 32], strides = [1, 1]} : vector<31x32xf32> to vector<1x32xf32>
    %350 = vector.broadcast %349 : vector<1x32xf32> to vector<2x32xf32>
    %351 = arith.mulf %348, %350 : vector<2x32xf32>
    %352 = arith.addf %346, %351 : vector<2x32xf32>
    %353 = vector.shape_cast %283 : vector<2x32xf32> to vector<2x1x32xf32>
    %354 = vector.shape_cast %306 : vector<2x32xf32> to vector<2x1x32xf32>
    %355 = vector.shape_cast %329 : vector<2x32xf32> to vector<2x1x32xf32>
    %356 = vector.shape_cast %352 : vector<2x32xf32> to vector<2x1x32xf32>
    %357 = tpu.concatenate %353, %354, %355, %356 in 1 : vector<2x1x32xf32>, vector<2x1x32xf32>, vector<2x1x32xf32>, vector<2x1x32xf32> -> vector<2x4x32xf32>
    %358 = vector.shape_cast %357 : vector<2x4x32xf32> to vector<8x32xf32>
    %c0_115 = arith.constant 0 : index
    %c0_116 = arith.constant 0 : index
    %c0_117 = arith.constant 0 : index
    %359 = vector.load %arg22[%c0_115, %c0_116, %c0_117] : memref<2x1x32xf32, #tpu.memory_space<vmem>>, vector<1x1x32xf32>
    %360 = vector.shape_cast %359 : vector<1x1x32xf32> to vector<1x32xf32>
    %cst_118 = arith.constant 0.999994993 : f32
    %361 = vector.broadcast %cst_118 : f32 to vector<1x32xf32>
    %362 = arith.mulf %360, %361 : vector<1x32xf32>
    %363 = vector.broadcast %362 : vector<1x32xf32> to vector<8x32xf32>
    %364 = arith.mulf %358, %363 : vector<8x32xf32>
    %c0_119 = arith.constant 0 : index
    %c0_120 = arith.constant 0 : index
    %c0_121 = arith.constant 0 : index
    %365 = vector.load %arg23[%c0_119, %c0_120, %c0_121] : memref<2x1x32xf32, #tpu.memory_space<vmem>>, vector<1x1x32xf32>
    %366 = vector.shape_cast %365 : vector<1x1x32xf32> to vector<1x32xf32>
    %367 = vector.broadcast %366 : vector<1x32xf32> to vector<8x32xf32>
    %368 = arith.addf %364, %367 : vector<8x32xf32>
    %369 = arith.negf %368 : vector<8x32xf32>
    %370 = math.exp %369 : vector<8x32xf32>
    %cst_122 = arith.constant 1.000000e+00 : f32
    %371 = vector.broadcast %cst_122 : f32 to vector<8x32xf32>
    %372 = arith.addf %371, %370 : vector<8x32xf32>
    %373 = arith.divf %371, %372 : vector<8x32xf32>
    %374 = arith.mulf %368, %373 : vector<8x32xf32>
    %c0_123 = arith.constant 0 : index
    %c0_124 = arith.constant 0 : index
    %c0_125 = arith.constant 0 : index
    %375 = vector.load %arg24[%c0_123, %c0_124, %c0_125] : memref<2x32x32xbf16, #tpu.memory_space<vmem>>, vector<1x32x32xbf16>
    %376 = vector.shape_cast %375 : vector<1x32x32xbf16> to vector<32x32xbf16>
    %c0_126 = arith.constant 0 : index
    %c0_127 = arith.constant 0 : index
    %c0_128 = arith.constant 0 : index
    %377 = vector.load %arg25[%c0_126, %c0_127, %c0_128] : memref<2x1x32xf32, #tpu.memory_space<vmem>>, vector<1x1x32xf32>
    %378 = vector.shape_cast %377 : vector<1x1x32xf32> to vector<1x32xf32>
    %379 = arith.truncf %374 : vector<8x32xf32> to vector<8x32xbf16>
    %cst_129 = arith.constant dense<0.000000e+00> : vector<8x32xf32>
    %380 = tpu.matmul %379, %376, %cst_129 {dimension_numbers = #tpu.dot_dimension_numbers<[1], [0], [0], [1], [0, 0, 1, 1], [], []>} : vector<8x32xbf16>, vector<32x32xbf16>, vector<8x32xf32> -> vector<8x32xf32>
    %381 = vector.broadcast %378 : vector<1x32xf32> to vector<8x32xf32>
    %382 = arith.addf %380, %381 : vector<8x32xf32>
    %383 = arith.addf %215, %382 : vector<8x32xf32>
    %c0_130 = arith.constant 0 : index
    %c1 = arith.constant 1 : index
    %c0_131 = arith.constant 0 : index
    %c0_132 = arith.constant 0 : index
    %384 = vector.load %arg5[%c0_130, %c1, %c0_131, %c0_132] : memref<2x2x1x32xf32, #tpu.memory_space<vmem>>, vector<1x1x1x32xf32>
    %385 = vector.shape_cast %384 : vector<1x1x1x32xf32> to vector<1x32xf32>
    %c0_133 = arith.constant 0 : index
    %c1_134 = arith.constant 1 : index
    %c0_135 = arith.constant 0 : index
    %c0_136 = arith.constant 0 : index
    %386 = vector.load %arg6[%c0_133, %c1_134, %c0_135, %c0_136] : memref<2x2x1x32xf32, #tpu.memory_space<vmem>>, vector<1x1x1x32xf32>
    %387 = vector.shape_cast %386 : vector<1x1x1x32xf32> to vector<1x32xf32>
    %c0_137 = arith.constant 0 : index
    %c1_138 = arith.constant 1 : index
    %c0_139 = arith.constant 0 : index
    %c0_140 = arith.constant 0 : index
    %388 = vector.load %arg7[%c0_137, %c1_138, %c0_139, %c0_140] : memref<2x2x32x128xbf16, #tpu.memory_space<vmem>>, vector<1x1x32x128xbf16>
    %389 = vector.shape_cast %388 : vector<1x1x32x128xbf16> to vector<32x128xbf16>
    %c0_141 = arith.constant 0 : index
    %c1_142 = arith.constant 1 : index
    %c0_143 = arith.constant 0 : index
    %c0_144 = arith.constant 0 : index
    %390 = vector.load %arg8[%c0_141, %c1_142, %c0_143, %c0_144] : memref<2x2x1x128xf32, #tpu.memory_space<vmem>>, vector<1x1x1x128xf32>
    %391 = vector.shape_cast %390 : vector<1x1x1x128xf32> to vector<1x128xf32>
    %c0_145 = arith.constant 0 : index
    %c1_146 = arith.constant 1 : index
    %c0_147 = arith.constant 0 : index
    %c0_148 = arith.constant 0 : index
    %392 = vector.load %arg9[%c0_145, %c1_146, %c0_147, %c0_148] : memref<2x2x128x32xbf16, #tpu.memory_space<vmem>>, vector<1x1x128x32xbf16>
    %393 = vector.shape_cast %392 : vector<1x1x128x32xbf16> to vector<128x32xbf16>
    %c0_149 = arith.constant 0 : index
    %c1_150 = arith.constant 1 : index
    %c0_151 = arith.constant 0 : index
    %c0_152 = arith.constant 0 : index
    %394 = vector.load %arg10[%c0_149, %c1_150, %c0_151, %c0_152] : memref<2x2x1x32xf32, #tpu.memory_space<vmem>>, vector<1x1x1x32xf32>
    %395 = vector.shape_cast %394 : vector<1x1x1x32xf32> to vector<1x32xf32>
    %cst_153 = arith.constant dense<0.000000e+00> : vector<8xf32>
    %396 = vector.multi_reduction <add>, %383, %cst_153 [1] : vector<8x32xf32> to vector<8xf32>
    %397 = vector.shape_cast %396 : vector<8xf32> to vector<8x1xf32>
    %cst_154 = arith.constant 3.200000e+01 : f32
    %398 = vector.broadcast %cst_154 : f32 to vector<8x1xf32>
    %399 = arith.divf %397, %398 : vector<8x1xf32>
    %400 = vector.broadcast %399 : vector<8x1xf32> to vector<8x32xf32>
    %401 = arith.subf %383, %400 : vector<8x32xf32>
    %402 = arith.mulf %401, %401 : vector<8x32xf32>
    %cst_155 = arith.constant dense<0.000000e+00> : vector<8xf32>
    %403 = vector.multi_reduction <add>, %402, %cst_155 [1] : vector<8x32xf32> to vector<8xf32>
    %404 = vector.shape_cast %403 : vector<8xf32> to vector<8x1xf32>
    %cst_156 = arith.constant 3.200000e+01 : f32
    %405 = vector.broadcast %cst_156 : f32 to vector<8x1xf32>
    %406 = arith.divf %404, %405 : vector<8x1xf32>
    %407 = vector.broadcast %399 : vector<8x1xf32> to vector<8x32xf32>
    %408 = arith.subf %383, %407 : vector<8x32xf32>
    %cst_157 = arith.constant 9.99999974E-6 : f32
    %409 = vector.broadcast %cst_157 : f32 to vector<8x1xf32>
    %410 = arith.addf %406, %409 : vector<8x1xf32>
    %411 = math.rsqrt %410 : vector<8x1xf32>
    %412 = vector.broadcast %411 : vector<8x1xf32> to vector<8x32xf32>
    %413 = arith.mulf %408, %412 : vector<8x32xf32>
    %414 = vector.broadcast %385 : vector<1x32xf32> to vector<8x32xf32>
    %415 = arith.mulf %413, %414 : vector<8x32xf32>
    %416 = vector.broadcast %387 : vector<1x32xf32> to vector<8x32xf32>
    %417 = arith.addf %415, %416 : vector<8x32xf32>
    %418 = arith.truncf %417 : vector<8x32xf32> to vector<8x32xbf16>
    %cst_158 = arith.constant dense<0.000000e+00> : vector<8x128xf32>
    %419 = tpu.matmul %418, %389, %cst_158 {dimension_numbers = #tpu.dot_dimension_numbers<[1], [0], [0], [1], [0, 0, 1, 1], [], []>} : vector<8x32xbf16>, vector<32x128xbf16>, vector<8x128xf32> -> vector<8x128xf32>
    %420 = vector.broadcast %391 : vector<1x128xf32> to vector<8x128xf32>
    %421 = arith.addf %419, %420 : vector<8x128xf32>
    %422 = arith.negf %421 : vector<8x128xf32>
    %423 = math.exp %422 : vector<8x128xf32>
    %cst_159 = arith.constant 1.000000e+00 : f32
    %424 = vector.broadcast %cst_159 : f32 to vector<8x128xf32>
    %425 = arith.addf %424, %423 : vector<8x128xf32>
    %426 = arith.divf %424, %425 : vector<8x128xf32>
    %427 = arith.mulf %421, %426 : vector<8x128xf32>
    %428 = arith.truncf %427 : vector<8x128xf32> to vector<8x128xbf16>
    %cst_160 = arith.constant dense<0.000000e+00> : vector<8x32xf32>
    %429 = tpu.matmul %428, %393, %cst_160 {dimension_numbers = #tpu.dot_dimension_numbers<[1], [0], [0], [1], [0, 0, 1, 1], [], []>} : vector<8x128xbf16>, vector<128x32xbf16>, vector<8x32xf32> -> vector<8x32xf32>
    %430 = vector.broadcast %395 : vector<1x32xf32> to vector<8x32xf32>
    %431 = arith.addf %429, %430 : vector<8x32xf32>
    %cst_161 = arith.constant 5.000000e-01 : f32
    %432 = vector.broadcast %cst_161 : f32 to vector<8x32xf32>
    %433 = arith.mulf %432, %431 : vector<8x32xf32>
    %434 = arith.addf %383, %433 : vector<8x32xf32>
    %c0_162 = arith.constant 0 : index
    %c0_163 = arith.constant 0 : index
    %c0_164 = arith.constant 0 : index
    %435 = vector.load %arg26[%c0_162, %c0_163, %c0_164] : memref<2x1x32xf32, #tpu.memory_space<vmem>>, vector<1x1x32xf32>
    %436 = vector.shape_cast %435 : vector<1x1x32xf32> to vector<1x32xf32>
    %c0_165 = arith.constant 0 : index
    %c0_166 = arith.constant 0 : index
    %c0_167 = arith.constant 0 : index
    %437 = vector.load %arg27[%c0_165, %c0_166, %c0_167] : memref<2x1x32xf32, #tpu.memory_space<vmem>>, vector<1x1x32xf32>
    %438 = vector.shape_cast %437 : vector<1x1x32xf32> to vector<1x32xf32>
    %cst_168 = arith.constant dense<0.000000e+00> : vector<8xf32>
    %439 = vector.multi_reduction <add>, %434, %cst_168 [1] : vector<8x32xf32> to vector<8xf32>
    %440 = vector.shape_cast %439 : vector<8xf32> to vector<8x1xf32>
    %cst_169 = arith.constant 3.200000e+01 : f32
    %441 = vector.broadcast %cst_169 : f32 to vector<8x1xf32>
    %442 = arith.divf %440, %441 : vector<8x1xf32>
    %443 = vector.broadcast %442 : vector<8x1xf32> to vector<8x32xf32>
    %444 = arith.subf %434, %443 : vector<8x32xf32>
    %445 = arith.mulf %444, %444 : vector<8x32xf32>
    %cst_170 = arith.constant dense<0.000000e+00> : vector<8xf32>
    %446 = vector.multi_reduction <add>, %445, %cst_170 [1] : vector<8x32xf32> to vector<8xf32>
    %447 = vector.shape_cast %446 : vector<8xf32> to vector<8x1xf32>
    %cst_171 = arith.constant 3.200000e+01 : f32
    %448 = vector.broadcast %cst_171 : f32 to vector<8x1xf32>
    %449 = arith.divf %447, %448 : vector<8x1xf32>
    %450 = vector.broadcast %442 : vector<8x1xf32> to vector<8x32xf32>
    %451 = arith.subf %434, %450 : vector<8x32xf32>
    %cst_172 = arith.constant 9.99999974E-6 : f32
    %452 = vector.broadcast %cst_172 : f32 to vector<8x1xf32>
    %453 = arith.addf %449, %452 : vector<8x1xf32>
    %454 = math.rsqrt %453 : vector<8x1xf32>
    %455 = vector.broadcast %454 : vector<8x1xf32> to vector<8x32xf32>
    %456 = arith.mulf %451, %455 : vector<8x32xf32>
    %457 = vector.broadcast %436 : vector<1x32xf32> to vector<8x32xf32>
    %458 = arith.mulf %456, %457 : vector<8x32xf32>
    %459 = vector.broadcast %438 : vector<1x32xf32> to vector<8x32xf32>
    %460 = arith.addf %458, %459 : vector<8x32xf32>
    %c1_173 = arith.constant 1 : index
    %c0_174 = arith.constant 0 : index
    %c0_175 = arith.constant 0 : index
    %c0_176 = arith.constant 0 : index
    %461 = vector.load %arg5[%c1_173, %c0_174, %c0_175, %c0_176] : memref<2x2x1x32xf32, #tpu.memory_space<vmem>>, vector<1x1x1x32xf32>
    %462 = vector.shape_cast %461 : vector<1x1x1x32xf32> to vector<1x32xf32>
    %c1_177 = arith.constant 1 : index
    %c0_178 = arith.constant 0 : index
    %c0_179 = arith.constant 0 : index
    %c0_180 = arith.constant 0 : index
    %463 = vector.load %arg6[%c1_177, %c0_178, %c0_179, %c0_180] : memref<2x2x1x32xf32, #tpu.memory_space<vmem>>, vector<1x1x1x32xf32>
    %464 = vector.shape_cast %463 : vector<1x1x1x32xf32> to vector<1x32xf32>
    %c1_181 = arith.constant 1 : index
    %c0_182 = arith.constant 0 : index
    %c0_183 = arith.constant 0 : index
    %c0_184 = arith.constant 0 : index
    %465 = vector.load %arg7[%c1_181, %c0_182, %c0_183, %c0_184] : memref<2x2x32x128xbf16, #tpu.memory_space<vmem>>, vector<1x1x32x128xbf16>
    %466 = vector.shape_cast %465 : vector<1x1x32x128xbf16> to vector<32x128xbf16>
    %c1_185 = arith.constant 1 : index
    %c0_186 = arith.constant 0 : index
    %c0_187 = arith.constant 0 : index
    %c0_188 = arith.constant 0 : index
    %467 = vector.load %arg8[%c1_185, %c0_186, %c0_187, %c0_188] : memref<2x2x1x128xf32, #tpu.memory_space<vmem>>, vector<1x1x1x128xf32>
    %468 = vector.shape_cast %467 : vector<1x1x1x128xf32> to vector<1x128xf32>
    %c1_189 = arith.constant 1 : index
    %c0_190 = arith.constant 0 : index
    %c0_191 = arith.constant 0 : index
    %c0_192 = arith.constant 0 : index
    %469 = vector.load %arg9[%c1_189, %c0_190, %c0_191, %c0_192] : memref<2x2x128x32xbf16, #tpu.memory_space<vmem>>, vector<1x1x128x32xbf16>
    %470 = vector.shape_cast %469 : vector<1x1x128x32xbf16> to vector<128x32xbf16>
    %c1_193 = arith.constant 1 : index
    %c0_194 = arith.constant 0 : index
    %c0_195 = arith.constant 0 : index
    %c0_196 = arith.constant 0 : index
    %471 = vector.load %arg10[%c1_193, %c0_194, %c0_195, %c0_196] : memref<2x2x1x32xf32, #tpu.memory_space<vmem>>, vector<1x1x1x32xf32>
    %472 = vector.shape_cast %471 : vector<1x1x1x32xf32> to vector<1x32xf32>
    %cst_197 = arith.constant dense<0.000000e+00> : vector<8xf32>
    %473 = vector.multi_reduction <add>, %460, %cst_197 [1] : vector<8x32xf32> to vector<8xf32>
    %474 = vector.shape_cast %473 : vector<8xf32> to vector<8x1xf32>
    %cst_198 = arith.constant 3.200000e+01 : f32
    %475 = vector.broadcast %cst_198 : f32 to vector<8x1xf32>
    %476 = arith.divf %474, %475 : vector<8x1xf32>
    %477 = vector.broadcast %476 : vector<8x1xf32> to vector<8x32xf32>
    %478 = arith.subf %460, %477 : vector<8x32xf32>
    %479 = arith.mulf %478, %478 : vector<8x32xf32>
    %cst_199 = arith.constant dense<0.000000e+00> : vector<8xf32>
    %480 = vector.multi_reduction <add>, %479, %cst_199 [1] : vector<8x32xf32> to vector<8xf32>
    %481 = vector.shape_cast %480 : vector<8xf32> to vector<8x1xf32>
    %cst_200 = arith.constant 3.200000e+01 : f32
    %482 = vector.broadcast %cst_200 : f32 to vector<8x1xf32>
    %483 = arith.divf %481, %482 : vector<8x1xf32>
    %484 = vector.broadcast %476 : vector<8x1xf32> to vector<8x32xf32>
    %485 = arith.subf %460, %484 : vector<8x32xf32>
    %cst_201 = arith.constant 9.99999974E-6 : f32
    %486 = vector.broadcast %cst_201 : f32 to vector<8x1xf32>
    %487 = arith.addf %483, %486 : vector<8x1xf32>
    %488 = math.rsqrt %487 : vector<8x1xf32>
    %489 = vector.broadcast %488 : vector<8x1xf32> to vector<8x32xf32>
    %490 = arith.mulf %485, %489 : vector<8x32xf32>
    %491 = vector.broadcast %462 : vector<1x32xf32> to vector<8x32xf32>
    %492 = arith.mulf %490, %491 : vector<8x32xf32>
    %493 = vector.broadcast %464 : vector<1x32xf32> to vector<8x32xf32>
    %494 = arith.addf %492, %493 : vector<8x32xf32>
    %495 = arith.truncf %494 : vector<8x32xf32> to vector<8x32xbf16>
    %cst_202 = arith.constant dense<0.000000e+00> : vector<8x128xf32>
    %496 = tpu.matmul %495, %466, %cst_202 {dimension_numbers = #tpu.dot_dimension_numbers<[1], [0], [0], [1], [0, 0, 1, 1], [], []>} : vector<8x32xbf16>, vector<32x128xbf16>, vector<8x128xf32> -> vector<8x128xf32>
    %497 = vector.broadcast %468 : vector<1x128xf32> to vector<8x128xf32>
    %498 = arith.addf %496, %497 : vector<8x128xf32>
    %499 = arith.negf %498 : vector<8x128xf32>
    %500 = math.exp %499 : vector<8x128xf32>
    %cst_203 = arith.constant 1.000000e+00 : f32
    %501 = vector.broadcast %cst_203 : f32 to vector<8x128xf32>
    %502 = arith.addf %501, %500 : vector<8x128xf32>
    %503 = arith.divf %501, %502 : vector<8x128xf32>
    %504 = arith.mulf %498, %503 : vector<8x128xf32>
    %505 = arith.truncf %504 : vector<8x128xf32> to vector<8x128xbf16>
    %cst_204 = arith.constant dense<0.000000e+00> : vector<8x32xf32>
    %506 = tpu.matmul %505, %470, %cst_204 {dimension_numbers = #tpu.dot_dimension_numbers<[1], [0], [0], [1], [0, 0, 1, 1], [], []>} : vector<8x128xbf16>, vector<128x32xbf16>, vector<8x32xf32> -> vector<8x32xf32>
    %507 = vector.broadcast %472 : vector<1x32xf32> to vector<8x32xf32>
    %508 = arith.addf %506, %507 : vector<8x32xf32>
    %cst_205 = arith.constant 5.000000e-01 : f32
    %509 = vector.broadcast %cst_205 : f32 to vector<8x32xf32>
    %510 = arith.mulf %509, %508 : vector<8x32xf32>
    %511 = arith.addf %460, %510 : vector<8x32xf32>
    %c1_206 = arith.constant 1 : index
    %c0_207 = arith.constant 0 : index
    %c0_208 = arith.constant 0 : index
    %512 = vector.load %arg11[%c1_206, %c0_207, %c0_208] : memref<2x1x32xf32, #tpu.memory_space<vmem>>, vector<1x1x32xf32>
    %513 = vector.shape_cast %512 : vector<1x1x32xf32> to vector<1x32xf32>
    %c1_209 = arith.constant 1 : index
    %c0_210 = arith.constant 0 : index
    %c0_211 = arith.constant 0 : index
    %514 = vector.load %arg12[%c1_209, %c0_210, %c0_211] : memref<2x1x32xf32, #tpu.memory_space<vmem>>, vector<1x1x32xf32>
    %515 = vector.shape_cast %514 : vector<1x1x32xf32> to vector<1x32xf32>
    %cst_212 = arith.constant dense<0.000000e+00> : vector<8xf32>
    %516 = vector.multi_reduction <add>, %511, %cst_212 [1] : vector<8x32xf32> to vector<8xf32>
    %517 = vector.shape_cast %516 : vector<8xf32> to vector<8x1xf32>
    %cst_213 = arith.constant 3.200000e+01 : f32
    %518 = vector.broadcast %cst_213 : f32 to vector<8x1xf32>
    %519 = arith.divf %517, %518 : vector<8x1xf32>
    %520 = vector.broadcast %519 : vector<8x1xf32> to vector<8x32xf32>
    %521 = arith.subf %511, %520 : vector<8x32xf32>
    %522 = arith.mulf %521, %521 : vector<8x32xf32>
    %cst_214 = arith.constant dense<0.000000e+00> : vector<8xf32>
    %523 = vector.multi_reduction <add>, %522, %cst_214 [1] : vector<8x32xf32> to vector<8xf32>
    %524 = vector.shape_cast %523 : vector<8xf32> to vector<8x1xf32>
    %cst_215 = arith.constant 3.200000e+01 : f32
    %525 = vector.broadcast %cst_215 : f32 to vector<8x1xf32>
    %526 = arith.divf %524, %525 : vector<8x1xf32>
    %527 = vector.broadcast %519 : vector<8x1xf32> to vector<8x32xf32>
    %528 = arith.subf %511, %527 : vector<8x32xf32>
    %cst_216 = arith.constant 9.99999974E-6 : f32
    %529 = vector.broadcast %cst_216 : f32 to vector<8x1xf32>
    %530 = arith.addf %526, %529 : vector<8x1xf32>
    %531 = math.rsqrt %530 : vector<8x1xf32>
    %532 = vector.broadcast %531 : vector<8x1xf32> to vector<8x32xf32>
    %533 = arith.mulf %528, %532 : vector<8x32xf32>
    %534 = vector.broadcast %513 : vector<1x32xf32> to vector<8x32xf32>
    %535 = arith.mulf %533, %534 : vector<8x32xf32>
    %536 = vector.broadcast %515 : vector<1x32xf32> to vector<8x32xf32>
    %537 = arith.addf %535, %536 : vector<8x32xf32>
    %c1_217 = arith.constant 1 : index
    %c0_218 = arith.constant 0 : index
    %c0_219 = arith.constant 0 : index
    %538 = vector.load %arg13[%c1_217, %c0_218, %c0_219] : memref<2x32x96xbf16, #tpu.memory_space<vmem>>, vector<1x32x96xbf16>
    %539 = vector.shape_cast %538 : vector<1x32x96xbf16> to vector<32x96xbf16>
    %c1_220 = arith.constant 1 : index
    %c0_221 = arith.constant 0 : index
    %c0_222 = arith.constant 0 : index
    %540 = vector.load %arg14[%c1_220, %c0_221, %c0_222] : memref<2x1x96xf32, #tpu.memory_space<vmem>>, vector<1x1x96xf32>
    %541 = vector.shape_cast %540 : vector<1x1x96xf32> to vector<1x96xf32>
    %542 = arith.truncf %537 : vector<8x32xf32> to vector<8x32xbf16>
    %cst_223 = arith.constant dense<0.000000e+00> : vector<8x96xf32>
    %543 = tpu.matmul %542, %539, %cst_223 {dimension_numbers = #tpu.dot_dimension_numbers<[1], [0], [0], [1], [0, 0, 1, 1], [], []>} : vector<8x32xbf16>, vector<32x96xbf16>, vector<8x96xf32> -> vector<8x96xf32>
    %544 = vector.broadcast %541 : vector<1x96xf32> to vector<8x96xf32>
    %545 = arith.addf %543, %544 : vector<8x96xf32>
    %546 = vector.shape_cast %545 : vector<8x96xf32> to vector<2x4x96xf32>
    %547 = vector.extract_strided_slice %546 {offsets = [0, 0, 0], sizes = [2, 4, 32], strides = [1, 1, 1]} : vector<2x4x96xf32> to vector<2x4x32xf32>
    %548 = vector.extract_strided_slice %546 {offsets = [0, 0, 32], sizes = [2, 4, 32], strides = [1, 1, 1]} : vector<2x4x96xf32> to vector<2x4x32xf32>
    %549 = vector.extract_strided_slice %546 {offsets = [0, 0, 64], sizes = [2, 4, 32], strides = [1, 1, 1]} : vector<2x4x96xf32> to vector<2x4x32xf32>
    %c1_224 = arith.constant 1 : index
    %c0_225 = arith.constant 0 : index
    %c0_226 = arith.constant 0 : index
    %550 = vector.load %arg15[%c1_224, %c0_225, %c0_226] : memref<2x32x32xbf16, #tpu.memory_space<vmem>>, vector<1x32x32xbf16>
    %551 = vector.shape_cast %550 : vector<1x32x32xbf16> to vector<32x32xbf16>
    %cst_227 = arith.constant 0.000000e+00 : f32
    %552 = vector.broadcast %cst_227 : f32 to vector<8x32xf32>
    %553 = vector.extract_strided_slice %547 {offsets = [0, 0, 0], sizes = [2, 4, 8], strides = [1, 1, 1]} : vector<2x4x32xf32> to vector<2x4x8xf32>
    %554 = arith.truncf %553 : vector<2x4x8xf32> to vector<2x4x8xbf16>
    %555 = vector.extract_strided_slice %548 {offsets = [0, 0, 0], sizes = [2, 4, 8], strides = [1, 1, 1]} : vector<2x4x32xf32> to vector<2x4x8xf32>
    %556 = arith.truncf %555 : vector<2x4x8xf32> to vector<2x4x8xbf16>
    "tpu.trace_start"() <{level = 10 : i32, message = "btd,bsd->bts"}> : () -> ()
    %cst_228 = arith.constant dense<0.000000e+00> : vector<2x4x4xf32>
    %557 = tpu.matmul %554, %556, %cst_228 {dimension_numbers = #tpu.dot_dimension_numbers<[2], [2], [1], [1], [0, 0, 0, 1, 1, 1], [0], [0]>} : vector<2x4x8xbf16>, vector<2x4x8xbf16>, vector<2x4x4xf32> -> vector<2x4x4xf32>
    "tpu.trace_stop"() : () -> ()
    %cst_229 = arith.constant 0.353553385 : f32
    %558 = vector.broadcast %cst_229 : f32 to vector<2x4x4xf32>
    %559 = arith.mulf %557, %558 : vector<2x4x4xf32>
    %cst_230 = arith.constant dense<0xFF800000> : vector<2x4xf32>
    %560 = vector.multi_reduction <maximumf>, %559, %cst_230 [2] : vector<2x4x4xf32> to vector<2x4xf32>
    %561 = vector.shape_cast %560 : vector<2x4xf32> to vector<2x4x1xf32>
    %562 = vector.broadcast %561 : vector<2x4x1xf32> to vector<2x4x4xf32>
    %563 = arith.subf %559, %562 : vector<2x4x4xf32>
    %564 = math.exp %563 : vector<2x4x4xf32>
    %cst_231 = arith.constant dense<0.000000e+00> : vector<2x4xf32>
    %565 = vector.multi_reduction <add>, %564, %cst_231 [2] : vector<2x4x4xf32> to vector<2x4xf32>
    %566 = vector.shape_cast %565 : vector<2x4xf32> to vector<2x4x1xf32>
    %567 = tpu.reciprocal %566 {approx = true} : vector<2x4x1xf32> -> vector<2x4x1xf32>
    %568 = vector.broadcast %567 : vector<2x4x1xf32> to vector<2x4x4xf32>
    %569 = arith.mulf %564, %568 : vector<2x4x4xf32>
    %570 = arith.truncf %569 : vector<2x4x4xf32> to vector<2x4x4xbf16>
    %571 = vector.extract_strided_slice %549 {offsets = [0, 0, 0], sizes = [2, 4, 8], strides = [1, 1, 1]} : vector<2x4x32xf32> to vector<2x4x8xf32>
    %572 = arith.truncf %571 : vector<2x4x8xf32> to vector<2x4x8xbf16>
    "tpu.trace_start"() <{level = 10 : i32, message = "bts,bsd->btd"}> : () -> ()
    %cst_232 = arith.constant dense<0.000000e+00> : vector<2x4x8xf32>
    %573 = tpu.matmul %570, %572, %cst_232 {dimension_numbers = #tpu.dot_dimension_numbers<[2], [1], [1], [2], [0, 0, 0, 1, 1, 2], [0], [0]>} : vector<2x4x4xbf16>, vector<2x4x8xbf16>, vector<2x4x8xf32> -> vector<2x4x8xf32>
    "tpu.trace_stop"() : () -> ()
    %574 = vector.shape_cast %573 : vector<2x4x8xf32> to vector<8x8xf32>
    %575 = vector.extract_strided_slice %551 {offsets = [0, 0], sizes = [8, 32], strides = [1, 1]} : vector<32x32xbf16> to vector<8x32xbf16>
    %576 = arith.truncf %574 : vector<8x8xf32> to vector<8x8xbf16>
    %cst_233 = arith.constant dense<0.000000e+00> : vector<8x32xf32>
    %577 = tpu.matmul %576, %575, %cst_233 {dimension_numbers = #tpu.dot_dimension_numbers<[1], [0], [0], [1], [0, 0, 1, 1], [], []>} : vector<8x8xbf16>, vector<8x32xbf16>, vector<8x32xf32> -> vector<8x32xf32>
    %578 = arith.addf %552, %577 : vector<8x32xf32>
    %579 = vector.extract_strided_slice %547 {offsets = [0, 0, 8], sizes = [2, 4, 8], strides = [1, 1, 1]} : vector<2x4x32xf32> to vector<2x4x8xf32>
    %580 = arith.truncf %579 : vector<2x4x8xf32> to vector<2x4x8xbf16>
    %581 = vector.extract_strided_slice %548 {offsets = [0, 0, 8], sizes = [2, 4, 8], strides = [1, 1, 1]} : vector<2x4x32xf32> to vector<2x4x8xf32>
    %582 = arith.truncf %581 : vector<2x4x8xf32> to vector<2x4x8xbf16>
    "tpu.trace_start"() <{level = 10 : i32, message = "btd,bsd->bts"}> : () -> ()
    %cst_234 = arith.constant dense<0.000000e+00> : vector<2x4x4xf32>
    %583 = tpu.matmul %580, %582, %cst_234 {dimension_numbers = #tpu.dot_dimension_numbers<[2], [2], [1], [1], [0, 0, 0, 1, 1, 1], [0], [0]>} : vector<2x4x8xbf16>, vector<2x4x8xbf16>, vector<2x4x4xf32> -> vector<2x4x4xf32>
    "tpu.trace_stop"() : () -> ()
    %cst_235 = arith.constant 0.353553385 : f32
    %584 = vector.broadcast %cst_235 : f32 to vector<2x4x4xf32>
    %585 = arith.mulf %583, %584 : vector<2x4x4xf32>
    %cst_236 = arith.constant dense<0xFF800000> : vector<2x4xf32>
    %586 = vector.multi_reduction <maximumf>, %585, %cst_236 [2] : vector<2x4x4xf32> to vector<2x4xf32>
    %587 = vector.shape_cast %586 : vector<2x4xf32> to vector<2x4x1xf32>
    %588 = vector.broadcast %587 : vector<2x4x1xf32> to vector<2x4x4xf32>
    %589 = arith.subf %585, %588 : vector<2x4x4xf32>
    %590 = math.exp %589 : vector<2x4x4xf32>
    %cst_237 = arith.constant dense<0.000000e+00> : vector<2x4xf32>
    %591 = vector.multi_reduction <add>, %590, %cst_237 [2] : vector<2x4x4xf32> to vector<2x4xf32>
    %592 = vector.shape_cast %591 : vector<2x4xf32> to vector<2x4x1xf32>
    %593 = tpu.reciprocal %592 {approx = true} : vector<2x4x1xf32> -> vector<2x4x1xf32>
    %594 = vector.broadcast %593 : vector<2x4x1xf32> to vector<2x4x4xf32>
    %595 = arith.mulf %590, %594 : vector<2x4x4xf32>
    %596 = arith.truncf %595 : vector<2x4x4xf32> to vector<2x4x4xbf16>
    %597 = vector.extract_strided_slice %549 {offsets = [0, 0, 8], sizes = [2, 4, 8], strides = [1, 1, 1]} : vector<2x4x32xf32> to vector<2x4x8xf32>
    %598 = arith.truncf %597 : vector<2x4x8xf32> to vector<2x4x8xbf16>
    "tpu.trace_start"() <{level = 10 : i32, message = "bts,bsd->btd"}> : () -> ()
    %cst_238 = arith.constant dense<0.000000e+00> : vector<2x4x8xf32>
    %599 = tpu.matmul %596, %598, %cst_238 {dimension_numbers = #tpu.dot_dimension_numbers<[2], [1], [1], [2], [0, 0, 0, 1, 1, 2], [0], [0]>} : vector<2x4x4xbf16>, vector<2x4x8xbf16>, vector<2x4x8xf32> -> vector<2x4x8xf32>
    "tpu.trace_stop"() : () -> ()
    %600 = vector.shape_cast %599 : vector<2x4x8xf32> to vector<8x8xf32>
    %601 = vector.extract_strided_slice %551 {offsets = [8, 0], sizes = [8, 32], strides = [1, 1]} : vector<32x32xbf16> to vector<8x32xbf16>
    %602 = arith.truncf %600 : vector<8x8xf32> to vector<8x8xbf16>
    %cst_239 = arith.constant dense<0.000000e+00> : vector<8x32xf32>
    %603 = tpu.matmul %602, %601, %cst_239 {dimension_numbers = #tpu.dot_dimension_numbers<[1], [0], [0], [1], [0, 0, 1, 1], [], []>} : vector<8x8xbf16>, vector<8x32xbf16>, vector<8x32xf32> -> vector<8x32xf32>
    %604 = arith.addf %578, %603 : vector<8x32xf32>
    %605 = vector.extract_strided_slice %547 {offsets = [0, 0, 16], sizes = [2, 4, 8], strides = [1, 1, 1]} : vector<2x4x32xf32> to vector<2x4x8xf32>
    %606 = arith.truncf %605 : vector<2x4x8xf32> to vector<2x4x8xbf16>
    %607 = vector.extract_strided_slice %548 {offsets = [0, 0, 16], sizes = [2, 4, 8], strides = [1, 1, 1]} : vector<2x4x32xf32> to vector<2x4x8xf32>
    %608 = arith.truncf %607 : vector<2x4x8xf32> to vector<2x4x8xbf16>
    "tpu.trace_start"() <{level = 10 : i32, message = "btd,bsd->bts"}> : () -> ()
    %cst_240 = arith.constant dense<0.000000e+00> : vector<2x4x4xf32>
    %609 = tpu.matmul %606, %608, %cst_240 {dimension_numbers = #tpu.dot_dimension_numbers<[2], [2], [1], [1], [0, 0, 0, 1, 1, 1], [0], [0]>} : vector<2x4x8xbf16>, vector<2x4x8xbf16>, vector<2x4x4xf32> -> vector<2x4x4xf32>
    "tpu.trace_stop"() : () -> ()
    %cst_241 = arith.constant 0.353553385 : f32
    %610 = vector.broadcast %cst_241 : f32 to vector<2x4x4xf32>
    %611 = arith.mulf %609, %610 : vector<2x4x4xf32>
    %cst_242 = arith.constant dense<0xFF800000> : vector<2x4xf32>
    %612 = vector.multi_reduction <maximumf>, %611, %cst_242 [2] : vector<2x4x4xf32> to vector<2x4xf32>
    %613 = vector.shape_cast %612 : vector<2x4xf32> to vector<2x4x1xf32>
    %614 = vector.broadcast %613 : vector<2x4x1xf32> to vector<2x4x4xf32>
    %615 = arith.subf %611, %614 : vector<2x4x4xf32>
    %616 = math.exp %615 : vector<2x4x4xf32>
    %cst_243 = arith.constant dense<0.000000e+00> : vector<2x4xf32>
    %617 = vector.multi_reduction <add>, %616, %cst_243 [2] : vector<2x4x4xf32> to vector<2x4xf32>
    %618 = vector.shape_cast %617 : vector<2x4xf32> to vector<2x4x1xf32>
    %619 = tpu.reciprocal %618 {approx = true} : vector<2x4x1xf32> -> vector<2x4x1xf32>
    %620 = vector.broadcast %619 : vector<2x4x1xf32> to vector<2x4x4xf32>
    %621 = arith.mulf %616, %620 : vector<2x4x4xf32>
    %622 = arith.truncf %621 : vector<2x4x4xf32> to vector<2x4x4xbf16>
    %623 = vector.extract_strided_slice %549 {offsets = [0, 0, 16], sizes = [2, 4, 8], strides = [1, 1, 1]} : vector<2x4x32xf32> to vector<2x4x8xf32>
    %624 = arith.truncf %623 : vector<2x4x8xf32> to vector<2x4x8xbf16>
    "tpu.trace_start"() <{level = 10 : i32, message = "bts,bsd->btd"}> : () -> ()
    %cst_244 = arith.constant dense<0.000000e+00> : vector<2x4x8xf32>
    %625 = tpu.matmul %622, %624, %cst_244 {dimension_numbers = #tpu.dot_dimension_numbers<[2], [1], [1], [2], [0, 0, 0, 1, 1, 2], [0], [0]>} : vector<2x4x4xbf16>, vector<2x4x8xbf16>, vector<2x4x8xf32> -> vector<2x4x8xf32>
    "tpu.trace_stop"() : () -> ()
    %626 = vector.shape_cast %625 : vector<2x4x8xf32> to vector<8x8xf32>
    %627 = vector.extract_strided_slice %551 {offsets = [16, 0], sizes = [8, 32], strides = [1, 1]} : vector<32x32xbf16> to vector<8x32xbf16>
    %628 = arith.truncf %626 : vector<8x8xf32> to vector<8x8xbf16>
    %cst_245 = arith.constant dense<0.000000e+00> : vector<8x32xf32>
    %629 = tpu.matmul %628, %627, %cst_245 {dimension_numbers = #tpu.dot_dimension_numbers<[1], [0], [0], [1], [0, 0, 1, 1], [], []>} : vector<8x8xbf16>, vector<8x32xbf16>, vector<8x32xf32> -> vector<8x32xf32>
    %630 = arith.addf %604, %629 : vector<8x32xf32>
    %631 = vector.extract_strided_slice %547 {offsets = [0, 0, 24], sizes = [2, 4, 8], strides = [1, 1, 1]} : vector<2x4x32xf32> to vector<2x4x8xf32>
    %632 = arith.truncf %631 : vector<2x4x8xf32> to vector<2x4x8xbf16>
    %633 = vector.extract_strided_slice %548 {offsets = [0, 0, 24], sizes = [2, 4, 8], strides = [1, 1, 1]} : vector<2x4x32xf32> to vector<2x4x8xf32>
    %634 = arith.truncf %633 : vector<2x4x8xf32> to vector<2x4x8xbf16>
    "tpu.trace_start"() <{level = 10 : i32, message = "btd,bsd->bts"}> : () -> ()
    %cst_246 = arith.constant dense<0.000000e+00> : vector<2x4x4xf32>
    %635 = tpu.matmul %632, %634, %cst_246 {dimension_numbers = #tpu.dot_dimension_numbers<[2], [2], [1], [1], [0, 0, 0, 1, 1, 1], [0], [0]>} : vector<2x4x8xbf16>, vector<2x4x8xbf16>, vector<2x4x4xf32> -> vector<2x4x4xf32>
    "tpu.trace_stop"() : () -> ()
    %cst_247 = arith.constant 0.353553385 : f32
    %636 = vector.broadcast %cst_247 : f32 to vector<2x4x4xf32>
    %637 = arith.mulf %635, %636 : vector<2x4x4xf32>
    %cst_248 = arith.constant dense<0xFF800000> : vector<2x4xf32>
    %638 = vector.multi_reduction <maximumf>, %637, %cst_248 [2] : vector<2x4x4xf32> to vector<2x4xf32>
    %639 = vector.shape_cast %638 : vector<2x4xf32> to vector<2x4x1xf32>
    %640 = vector.broadcast %639 : vector<2x4x1xf32> to vector<2x4x4xf32>
    %641 = arith.subf %637, %640 : vector<2x4x4xf32>
    %642 = math.exp %641 : vector<2x4x4xf32>
    %cst_249 = arith.constant dense<0.000000e+00> : vector<2x4xf32>
    %643 = vector.multi_reduction <add>, %642, %cst_249 [2] : vector<2x4x4xf32> to vector<2x4xf32>
    %644 = vector.shape_cast %643 : vector<2x4xf32> to vector<2x4x1xf32>
    %645 = tpu.reciprocal %644 {approx = true} : vector<2x4x1xf32> -> vector<2x4x1xf32>
    %646 = vector.broadcast %645 : vector<2x4x1xf32> to vector<2x4x4xf32>
    %647 = arith.mulf %642, %646 : vector<2x4x4xf32>
    %648 = arith.truncf %647 : vector<2x4x4xf32> to vector<2x4x4xbf16>
    %649 = vector.extract_strided_slice %549 {offsets = [0, 0, 24], sizes = [2, 4, 8], strides = [1, 1, 1]} : vector<2x4x32xf32> to vector<2x4x8xf32>
    %650 = arith.truncf %649 : vector<2x4x8xf32> to vector<2x4x8xbf16>
    "tpu.trace_start"() <{level = 10 : i32, message = "bts,bsd->btd"}> : () -> ()
    %cst_250 = arith.constant dense<0.000000e+00> : vector<2x4x8xf32>
    %651 = tpu.matmul %648, %650, %cst_250 {dimension_numbers = #tpu.dot_dimension_numbers<[2], [1], [1], [2], [0, 0, 0, 1, 1, 2], [0], [0]>} : vector<2x4x4xbf16>, vector<2x4x8xbf16>, vector<2x4x8xf32> -> vector<2x4x8xf32>
    "tpu.trace_stop"() : () -> ()
    %652 = vector.shape_cast %651 : vector<2x4x8xf32> to vector<8x8xf32>
    %653 = vector.extract_strided_slice %551 {offsets = [24, 0], sizes = [8, 32], strides = [1, 1]} : vector<32x32xbf16> to vector<8x32xbf16>
    %654 = arith.truncf %652 : vector<8x8xf32> to vector<8x8xbf16>
    %cst_251 = arith.constant dense<0.000000e+00> : vector<8x32xf32>
    %655 = tpu.matmul %654, %653, %cst_251 {dimension_numbers = #tpu.dot_dimension_numbers<[1], [0], [0], [1], [0, 0, 1, 1], [], []>} : vector<8x8xbf16>, vector<8x32xbf16>, vector<8x32xf32> -> vector<8x32xf32>
    %656 = arith.addf %630, %655 : vector<8x32xf32>
    %657 = arith.addf %511, %656 : vector<8x32xf32>
    %c1_252 = arith.constant 1 : index
    %c0_253 = arith.constant 0 : index
    %c0_254 = arith.constant 0 : index
    %658 = vector.load %arg16[%c1_252, %c0_253, %c0_254] : memref<2x1x32xf32, #tpu.memory_space<vmem>>, vector<1x1x32xf32>
    %659 = vector.shape_cast %658 : vector<1x1x32xf32> to vector<1x32xf32>
    %660 = vector.broadcast %659 : vector<1x32xf32> to vector<8x32xf32>
    %661 = arith.addf %657, %660 : vector<8x32xf32>
    %c1_255 = arith.constant 1 : index
    %c0_256 = arith.constant 0 : index
    %c0_257 = arith.constant 0 : index
    %662 = vector.load %arg17[%c1_255, %c0_256, %c0_257] : memref<2x1x32xf32, #tpu.memory_space<vmem>>, vector<1x1x32xf32>
    %663 = vector.shape_cast %662 : vector<1x1x32xf32> to vector<1x32xf32>
    %c1_258 = arith.constant 1 : index
    %c0_259 = arith.constant 0 : index
    %c0_260 = arith.constant 0 : index
    %664 = vector.load %arg18[%c1_258, %c0_259, %c0_260] : memref<2x1x32xf32, #tpu.memory_space<vmem>>, vector<1x1x32xf32>
    %665 = vector.shape_cast %664 : vector<1x1x32xf32> to vector<1x32xf32>
    %cst_261 = arith.constant dense<0.000000e+00> : vector<8xf32>
    %666 = vector.multi_reduction <add>, %661, %cst_261 [1] : vector<8x32xf32> to vector<8xf32>
    %667 = vector.shape_cast %666 : vector<8xf32> to vector<8x1xf32>
    %cst_262 = arith.constant 3.200000e+01 : f32
    %668 = vector.broadcast %cst_262 : f32 to vector<8x1xf32>
    %669 = arith.divf %667, %668 : vector<8x1xf32>
    %670 = vector.broadcast %669 : vector<8x1xf32> to vector<8x32xf32>
    %671 = arith.subf %661, %670 : vector<8x32xf32>
    %672 = arith.mulf %671, %671 : vector<8x32xf32>
    %cst_263 = arith.constant dense<0.000000e+00> : vector<8xf32>
    %673 = vector.multi_reduction <add>, %672, %cst_263 [1] : vector<8x32xf32> to vector<8xf32>
    %674 = vector.shape_cast %673 : vector<8xf32> to vector<8x1xf32>
    %cst_264 = arith.constant 3.200000e+01 : f32
    %675 = vector.broadcast %cst_264 : f32 to vector<8x1xf32>
    %676 = arith.divf %674, %675 : vector<8x1xf32>
    %677 = vector.broadcast %669 : vector<8x1xf32> to vector<8x32xf32>
    %678 = arith.subf %661, %677 : vector<8x32xf32>
    %cst_265 = arith.constant 9.99999974E-6 : f32
    %679 = vector.broadcast %cst_265 : f32 to vector<8x1xf32>
    %680 = arith.addf %676, %679 : vector<8x1xf32>
    %681 = math.rsqrt %680 : vector<8x1xf32>
    %682 = vector.broadcast %681 : vector<8x1xf32> to vector<8x32xf32>
    %683 = arith.mulf %678, %682 : vector<8x32xf32>
    %684 = vector.broadcast %663 : vector<1x32xf32> to vector<8x32xf32>
    %685 = arith.mulf %683, %684 : vector<8x32xf32>
    %686 = vector.broadcast %665 : vector<1x32xf32> to vector<8x32xf32>
    %687 = arith.addf %685, %686 : vector<8x32xf32>
    %c1_266 = arith.constant 1 : index
    %c0_267 = arith.constant 0 : index
    %c0_268 = arith.constant 0 : index
    %688 = vector.load %arg19[%c1_266, %c0_267, %c0_268] : memref<2x32x64xbf16, #tpu.memory_space<vmem>>, vector<1x32x64xbf16>
    %689 = vector.shape_cast %688 : vector<1x32x64xbf16> to vector<32x64xbf16>
    %c1_269 = arith.constant 1 : index
    %c0_270 = arith.constant 0 : index
    %c0_271 = arith.constant 0 : index
    %690 = vector.load %arg20[%c1_269, %c0_270, %c0_271] : memref<2x1x64xf32, #tpu.memory_space<vmem>>, vector<1x1x64xf32>
    %691 = vector.shape_cast %690 : vector<1x1x64xf32> to vector<1x64xf32>
    %692 = arith.truncf %687 : vector<8x32xf32> to vector<8x32xbf16>
    %cst_272 = arith.constant dense<0.000000e+00> : vector<8x64xf32>
    %693 = tpu.matmul %692, %689, %cst_272 {dimension_numbers = #tpu.dot_dimension_numbers<[1], [0], [0], [1], [0, 0, 1, 1], [], []>} : vector<8x32xbf16>, vector<32x64xbf16>, vector<8x64xf32> -> vector<8x64xf32>
    %694 = vector.broadcast %691 : vector<1x64xf32> to vector<8x64xf32>
    %695 = arith.addf %693, %694 : vector<8x64xf32>
    %696 = vector.extract_strided_slice %695 {offsets = [0, 0], sizes = [8, 32], strides = [1, 1]} : vector<8x64xf32> to vector<8x32xf32>
    %697 = vector.extract_strided_slice %695 {offsets = [0, 32], sizes = [8, 32], strides = [1, 1]} : vector<8x64xf32> to vector<8x32xf32>
    %698 = arith.negf %697 : vector<8x32xf32>
    %699 = math.exp %698 : vector<8x32xf32>
    %cst_273 = arith.constant 1.000000e+00 : f32
    %700 = vector.broadcast %cst_273 : f32 to vector<8x32xf32>
    %701 = arith.addf %700, %699 : vector<8x32xf32>
    %702 = arith.divf %700, %701 : vector<8x32xf32>
    %703 = arith.mulf %696, %702 : vector<8x32xf32>
    %704 = vector.shape_cast %703 : vector<8x32xf32> to vector<2x4x32xf32>
    %c1_274 = arith.constant 1 : index
    %c0_275 = arith.constant 0 : index
    %c0_276 = arith.constant 0 : index
    %705 = vector.load %arg21[%c1_274, %c0_275, %c0_276] : memref<2x31x32xf32, #tpu.memory_space<vmem>>, vector<1x31x32xf32>
    %706 = vector.shape_cast %705 : vector<1x31x32xf32> to vector<31x32xf32>
    %707 = vector.extract_strided_slice %704 {offsets = [0, 0, 0], sizes = [2, 1, 32], strides = [1, 1, 1]} : vector<2x4x32xf32> to vector<2x1x32xf32>
    %708 = vector.shape_cast %707 : vector<2x1x32xf32> to vector<2x32xf32>
    %709 = vector.extract_strided_slice %706 {offsets = [15, 0], sizes = [1, 32], strides = [1, 1]} : vector<31x32xf32> to vector<1x32xf32>
    %710 = vector.broadcast %709 : vector<1x32xf32> to vector<2x32xf32>
    %711 = arith.mulf %708, %710 : vector<2x32xf32>
    %712 = vector.extract_strided_slice %704 {offsets = [0, 1, 0], sizes = [2, 1, 32], strides = [1, 1, 1]} : vector<2x4x32xf32> to vector<2x1x32xf32>
    %713 = vector.shape_cast %712 : vector<2x1x32xf32> to vector<2x32xf32>
    %714 = vector.extract_strided_slice %706 {offsets = [16, 0], sizes = [1, 32], strides = [1, 1]} : vector<31x32xf32> to vector<1x32xf32>
    %715 = vector.broadcast %714 : vector<1x32xf32> to vector<2x32xf32>
    %716 = arith.mulf %713, %715 : vector<2x32xf32>
    %717 = arith.addf %711, %716 : vector<2x32xf32>
    %718 = vector.extract_strided_slice %704 {offsets = [0, 2, 0], sizes = [2, 1, 32], strides = [1, 1, 1]} : vector<2x4x32xf32> to vector<2x1x32xf32>
    %719 = vector.shape_cast %718 : vector<2x1x32xf32> to vector<2x32xf32>
    %720 = vector.extract_strided_slice %706 {offsets = [17, 0], sizes = [1, 32], strides = [1, 1]} : vector<31x32xf32> to vector<1x32xf32>
    %721 = vector.broadcast %720 : vector<1x32xf32> to vector<2x32xf32>
    %722 = arith.mulf %719, %721 : vector<2x32xf32>
    %723 = arith.addf %717, %722 : vector<2x32xf32>
    %724 = vector.extract_strided_slice %704 {offsets = [0, 3, 0], sizes = [2, 1, 32], strides = [1, 1, 1]} : vector<2x4x32xf32> to vector<2x1x32xf32>
    %725 = vector.shape_cast %724 : vector<2x1x32xf32> to vector<2x32xf32>
    %726 = vector.extract_strided_slice %706 {offsets = [18, 0], sizes = [1, 32], strides = [1, 1]} : vector<31x32xf32> to vector<1x32xf32>
    %727 = vector.broadcast %726 : vector<1x32xf32> to vector<2x32xf32>
    %728 = arith.mulf %725, %727 : vector<2x32xf32>
    %729 = arith.addf %723, %728 : vector<2x32xf32>
    %730 = vector.extract_strided_slice %704 {offsets = [0, 0, 0], sizes = [2, 1, 32], strides = [1, 1, 1]} : vector<2x4x32xf32> to vector<2x1x32xf32>
    %731 = vector.shape_cast %730 : vector<2x1x32xf32> to vector<2x32xf32>
    %732 = vector.extract_strided_slice %706 {offsets = [14, 0], sizes = [1, 32], strides = [1, 1]} : vector<31x32xf32> to vector<1x32xf32>
    %733 = vector.broadcast %732 : vector<1x32xf32> to vector<2x32xf32>
    %734 = arith.mulf %731, %733 : vector<2x32xf32>
    %735 = vector.extract_strided_slice %704 {offsets = [0, 1, 0], sizes = [2, 1, 32], strides = [1, 1, 1]} : vector<2x4x32xf32> to vector<2x1x32xf32>
    %736 = vector.shape_cast %735 : vector<2x1x32xf32> to vector<2x32xf32>
    %737 = vector.extract_strided_slice %706 {offsets = [15, 0], sizes = [1, 32], strides = [1, 1]} : vector<31x32xf32> to vector<1x32xf32>
    %738 = vector.broadcast %737 : vector<1x32xf32> to vector<2x32xf32>
    %739 = arith.mulf %736, %738 : vector<2x32xf32>
    %740 = arith.addf %734, %739 : vector<2x32xf32>
    %741 = vector.extract_strided_slice %704 {offsets = [0, 2, 0], sizes = [2, 1, 32], strides = [1, 1, 1]} : vector<2x4x32xf32> to vector<2x1x32xf32>
    %742 = vector.shape_cast %741 : vector<2x1x32xf32> to vector<2x32xf32>
    %743 = vector.extract_strided_slice %706 {offsets = [16, 0], sizes = [1, 32], strides = [1, 1]} : vector<31x32xf32> to vector<1x32xf32>
    %744 = vector.broadcast %743 : vector<1x32xf32> to vector<2x32xf32>
    %745 = arith.mulf %742, %744 : vector<2x32xf32>
    %746 = arith.addf %740, %745 : vector<2x32xf32>
    %747 = vector.extract_strided_slice %704 {offsets = [0, 3, 0], sizes = [2, 1, 32], strides = [1, 1, 1]} : vector<2x4x32xf32> to vector<2x1x32xf32>
    %748 = vector.shape_cast %747 : vector<2x1x32xf32> to vector<2x32xf32>
    %749 = vector.extract_strided_slice %706 {offsets = [17, 0], sizes = [1, 32], strides = [1, 1]} : vector<31x32xf32> to vector<1x32xf32>
    %750 = vector.broadcast %749 : vector<1x32xf32> to vector<2x32xf32>
    %751 = arith.mulf %748, %750 : vector<2x32xf32>
    %752 = arith.addf %746, %751 : vector<2x32xf32>
    %753 = vector.extract_strided_slice %704 {offsets = [0, 0, 0], sizes = [2, 1, 32], strides = [1, 1, 1]} : vector<2x4x32xf32> to vector<2x1x32xf32>
    %754 = vector.shape_cast %753 : vector<2x1x32xf32> to vector<2x32xf32>
    %755 = vector.extract_strided_slice %706 {offsets = [13, 0], sizes = [1, 32], strides = [1, 1]} : vector<31x32xf32> to vector<1x32xf32>
    %756 = vector.broadcast %755 : vector<1x32xf32> to vector<2x32xf32>
    %757 = arith.mulf %754, %756 : vector<2x32xf32>
    %758 = vector.extract_strided_slice %704 {offsets = [0, 1, 0], sizes = [2, 1, 32], strides = [1, 1, 1]} : vector<2x4x32xf32> to vector<2x1x32xf32>
    %759 = vector.shape_cast %758 : vector<2x1x32xf32> to vector<2x32xf32>
    %760 = vector.extract_strided_slice %706 {offsets = [14, 0], sizes = [1, 32], strides = [1, 1]} : vector<31x32xf32> to vector<1x32xf32>
    %761 = vector.broadcast %760 : vector<1x32xf32> to vector<2x32xf32>
    %762 = arith.mulf %759, %761 : vector<2x32xf32>
    %763 = arith.addf %757, %762 : vector<2x32xf32>
    %764 = vector.extract_strided_slice %704 {offsets = [0, 2, 0], sizes = [2, 1, 32], strides = [1, 1, 1]} : vector<2x4x32xf32> to vector<2x1x32xf32>
    %765 = vector.shape_cast %764 : vector<2x1x32xf32> to vector<2x32xf32>
    %766 = vector.extract_strided_slice %706 {offsets = [15, 0], sizes = [1, 32], strides = [1, 1]} : vector<31x32xf32> to vector<1x32xf32>
    %767 = vector.broadcast %766 : vector<1x32xf32> to vector<2x32xf32>
    %768 = arith.mulf %765, %767 : vector<2x32xf32>
    %769 = arith.addf %763, %768 : vector<2x32xf32>
    %770 = vector.extract_strided_slice %704 {offsets = [0, 3, 0], sizes = [2, 1, 32], strides = [1, 1, 1]} : vector<2x4x32xf32> to vector<2x1x32xf32>
    %771 = vector.shape_cast %770 : vector<2x1x32xf32> to vector<2x32xf32>
    %772 = vector.extract_strided_slice %706 {offsets = [16, 0], sizes = [1, 32], strides = [1, 1]} : vector<31x32xf32> to vector<1x32xf32>
    %773 = vector.broadcast %772 : vector<1x32xf32> to vector<2x32xf32>
    %774 = arith.mulf %771, %773 : vector<2x32xf32>
    %775 = arith.addf %769, %774 : vector<2x32xf32>
    %776 = vector.extract_strided_slice %704 {offsets = [0, 0, 0], sizes = [2, 1, 32], strides = [1, 1, 1]} : vector<2x4x32xf32> to vector<2x1x32xf32>
    %777 = vector.shape_cast %776 : vector<2x1x32xf32> to vector<2x32xf32>
    %778 = vector.extract_strided_slice %706 {offsets = [12, 0], sizes = [1, 32], strides = [1, 1]} : vector<31x32xf32> to vector<1x32xf32>
    %779 = vector.broadcast %778 : vector<1x32xf32> to vector<2x32xf32>
    %780 = arith.mulf %777, %779 : vector<2x32xf32>
    %781 = vector.extract_strided_slice %704 {offsets = [0, 1, 0], sizes = [2, 1, 32], strides = [1, 1, 1]} : vector<2x4x32xf32> to vector<2x1x32xf32>
    %782 = vector.shape_cast %781 : vector<2x1x32xf32> to vector<2x32xf32>
    %783 = vector.extract_strided_slice %706 {offsets = [13, 0], sizes = [1, 32], strides = [1, 1]} : vector<31x32xf32> to vector<1x32xf32>
    %784 = vector.broadcast %783 : vector<1x32xf32> to vector<2x32xf32>
    %785 = arith.mulf %782, %784 : vector<2x32xf32>
    %786 = arith.addf %780, %785 : vector<2x32xf32>
    %787 = vector.extract_strided_slice %704 {offsets = [0, 2, 0], sizes = [2, 1, 32], strides = [1, 1, 1]} : vector<2x4x32xf32> to vector<2x1x32xf32>
    %788 = vector.shape_cast %787 : vector<2x1x32xf32> to vector<2x32xf32>
    %789 = vector.extract_strided_slice %706 {offsets = [14, 0], sizes = [1, 32], strides = [1, 1]} : vector<31x32xf32> to vector<1x32xf32>
    %790 = vector.broadcast %789 : vector<1x32xf32> to vector<2x32xf32>
    %791 = arith.mulf %788, %790 : vector<2x32xf32>
    %792 = arith.addf %786, %791 : vector<2x32xf32>
    %793 = vector.extract_strided_slice %704 {offsets = [0, 3, 0], sizes = [2, 1, 32], strides = [1, 1, 1]} : vector<2x4x32xf32> to vector<2x1x32xf32>
    %794 = vector.shape_cast %793 : vector<2x1x32xf32> to vector<2x32xf32>
    %795 = vector.extract_strided_slice %706 {offsets = [15, 0], sizes = [1, 32], strides = [1, 1]} : vector<31x32xf32> to vector<1x32xf32>
    %796 = vector.broadcast %795 : vector<1x32xf32> to vector<2x32xf32>
    %797 = arith.mulf %794, %796 : vector<2x32xf32>
    %798 = arith.addf %792, %797 : vector<2x32xf32>
    %799 = vector.shape_cast %729 : vector<2x32xf32> to vector<2x1x32xf32>
    %800 = vector.shape_cast %752 : vector<2x32xf32> to vector<2x1x32xf32>
    %801 = vector.shape_cast %775 : vector<2x32xf32> to vector<2x1x32xf32>
    %802 = vector.shape_cast %798 : vector<2x32xf32> to vector<2x1x32xf32>
    %803 = tpu.concatenate %799, %800, %801, %802 in 1 : vector<2x1x32xf32>, vector<2x1x32xf32>, vector<2x1x32xf32>, vector<2x1x32xf32> -> vector<2x4x32xf32>
    %804 = vector.shape_cast %803 : vector<2x4x32xf32> to vector<8x32xf32>
    %c1_277 = arith.constant 1 : index
    %c0_278 = arith.constant 0 : index
    %c0_279 = arith.constant 0 : index
    %805 = vector.load %arg22[%c1_277, %c0_278, %c0_279] : memref<2x1x32xf32, #tpu.memory_space<vmem>>, vector<1x1x32xf32>
    %806 = vector.shape_cast %805 : vector<1x1x32xf32> to vector<1x32xf32>
    %cst_280 = arith.constant 0.999994993 : f32
    %807 = vector.broadcast %cst_280 : f32 to vector<1x32xf32>
    %808 = arith.mulf %806, %807 : vector<1x32xf32>
    %809 = vector.broadcast %808 : vector<1x32xf32> to vector<8x32xf32>
    %810 = arith.mulf %804, %809 : vector<8x32xf32>
    %c1_281 = arith.constant 1 : index
    %c0_282 = arith.constant 0 : index
    %c0_283 = arith.constant 0 : index
    %811 = vector.load %arg23[%c1_281, %c0_282, %c0_283] : memref<2x1x32xf32, #tpu.memory_space<vmem>>, vector<1x1x32xf32>
    %812 = vector.shape_cast %811 : vector<1x1x32xf32> to vector<1x32xf32>
    %813 = vector.broadcast %812 : vector<1x32xf32> to vector<8x32xf32>
    %814 = arith.addf %810, %813 : vector<8x32xf32>
    %815 = arith.negf %814 : vector<8x32xf32>
    %816 = math.exp %815 : vector<8x32xf32>
    %cst_284 = arith.constant 1.000000e+00 : f32
    %817 = vector.broadcast %cst_284 : f32 to vector<8x32xf32>
    %818 = arith.addf %817, %816 : vector<8x32xf32>
    %819 = arith.divf %817, %818 : vector<8x32xf32>
    %820 = arith.mulf %814, %819 : vector<8x32xf32>
    %c1_285 = arith.constant 1 : index
    %c0_286 = arith.constant 0 : index
    %c0_287 = arith.constant 0 : index
    %821 = vector.load %arg24[%c1_285, %c0_286, %c0_287] : memref<2x32x32xbf16, #tpu.memory_space<vmem>>, vector<1x32x32xbf16>
    %822 = vector.shape_cast %821 : vector<1x32x32xbf16> to vector<32x32xbf16>
    %c1_288 = arith.constant 1 : index
    %c0_289 = arith.constant 0 : index
    %c0_290 = arith.constant 0 : index
    %823 = vector.load %arg25[%c1_288, %c0_289, %c0_290] : memref<2x1x32xf32, #tpu.memory_space<vmem>>, vector<1x1x32xf32>
    %824 = vector.shape_cast %823 : vector<1x1x32xf32> to vector<1x32xf32>
    %825 = arith.truncf %820 : vector<8x32xf32> to vector<8x32xbf16>
    %cst_291 = arith.constant dense<0.000000e+00> : vector<8x32xf32>
    %826 = tpu.matmul %825, %822, %cst_291 {dimension_numbers = #tpu.dot_dimension_numbers<[1], [0], [0], [1], [0, 0, 1, 1], [], []>} : vector<8x32xbf16>, vector<32x32xbf16>, vector<8x32xf32> -> vector<8x32xf32>
    %827 = vector.broadcast %824 : vector<1x32xf32> to vector<8x32xf32>
    %828 = arith.addf %826, %827 : vector<8x32xf32>
    %829 = arith.addf %661, %828 : vector<8x32xf32>
    %c1_292 = arith.constant 1 : index
    %c1_293 = arith.constant 1 : index
    %c0_294 = arith.constant 0 : index
    %c0_295 = arith.constant 0 : index
    %830 = vector.load %arg5[%c1_292, %c1_293, %c0_294, %c0_295] : memref<2x2x1x32xf32, #tpu.memory_space<vmem>>, vector<1x1x1x32xf32>
    %831 = vector.shape_cast %830 : vector<1x1x1x32xf32> to vector<1x32xf32>
    %c1_296 = arith.constant 1 : index
    %c1_297 = arith.constant 1 : index
    %c0_298 = arith.constant 0 : index
    %c0_299 = arith.constant 0 : index
    %832 = vector.load %arg6[%c1_296, %c1_297, %c0_298, %c0_299] : memref<2x2x1x32xf32, #tpu.memory_space<vmem>>, vector<1x1x1x32xf32>
    %833 = vector.shape_cast %832 : vector<1x1x1x32xf32> to vector<1x32xf32>
    %c1_300 = arith.constant 1 : index
    %c1_301 = arith.constant 1 : index
    %c0_302 = arith.constant 0 : index
    %c0_303 = arith.constant 0 : index
    %834 = vector.load %arg7[%c1_300, %c1_301, %c0_302, %c0_303] : memref<2x2x32x128xbf16, #tpu.memory_space<vmem>>, vector<1x1x32x128xbf16>
    %835 = vector.shape_cast %834 : vector<1x1x32x128xbf16> to vector<32x128xbf16>
    %c1_304 = arith.constant 1 : index
    %c1_305 = arith.constant 1 : index
    %c0_306 = arith.constant 0 : index
    %c0_307 = arith.constant 0 : index
    %836 = vector.load %arg8[%c1_304, %c1_305, %c0_306, %c0_307] : memref<2x2x1x128xf32, #tpu.memory_space<vmem>>, vector<1x1x1x128xf32>
    %837 = vector.shape_cast %836 : vector<1x1x1x128xf32> to vector<1x128xf32>
    %c1_308 = arith.constant 1 : index
    %c1_309 = arith.constant 1 : index
    %c0_310 = arith.constant 0 : index
    %c0_311 = arith.constant 0 : index
    %838 = vector.load %arg9[%c1_308, %c1_309, %c0_310, %c0_311] : memref<2x2x128x32xbf16, #tpu.memory_space<vmem>>, vector<1x1x128x32xbf16>
    %839 = vector.shape_cast %838 : vector<1x1x128x32xbf16> to vector<128x32xbf16>
    %c1_312 = arith.constant 1 : index
    %c1_313 = arith.constant 1 : index
    %c0_314 = arith.constant 0 : index
    %c0_315 = arith.constant 0 : index
    %840 = vector.load %arg10[%c1_312, %c1_313, %c0_314, %c0_315] : memref<2x2x1x32xf32, #tpu.memory_space<vmem>>, vector<1x1x1x32xf32>
    %841 = vector.shape_cast %840 : vector<1x1x1x32xf32> to vector<1x32xf32>
    %cst_316 = arith.constant dense<0.000000e+00> : vector<8xf32>
    %842 = vector.multi_reduction <add>, %829, %cst_316 [1] : vector<8x32xf32> to vector<8xf32>
    %843 = vector.shape_cast %842 : vector<8xf32> to vector<8x1xf32>
    %cst_317 = arith.constant 3.200000e+01 : f32
    %844 = vector.broadcast %cst_317 : f32 to vector<8x1xf32>
    %845 = arith.divf %843, %844 : vector<8x1xf32>
    %846 = vector.broadcast %845 : vector<8x1xf32> to vector<8x32xf32>
    %847 = arith.subf %829, %846 : vector<8x32xf32>
    %848 = arith.mulf %847, %847 : vector<8x32xf32>
    %cst_318 = arith.constant dense<0.000000e+00> : vector<8xf32>
    %849 = vector.multi_reduction <add>, %848, %cst_318 [1] : vector<8x32xf32> to vector<8xf32>
    %850 = vector.shape_cast %849 : vector<8xf32> to vector<8x1xf32>
    %cst_319 = arith.constant 3.200000e+01 : f32
    %851 = vector.broadcast %cst_319 : f32 to vector<8x1xf32>
    %852 = arith.divf %850, %851 : vector<8x1xf32>
    %853 = vector.broadcast %845 : vector<8x1xf32> to vector<8x32xf32>
    %854 = arith.subf %829, %853 : vector<8x32xf32>
    %cst_320 = arith.constant 9.99999974E-6 : f32
    %855 = vector.broadcast %cst_320 : f32 to vector<8x1xf32>
    %856 = arith.addf %852, %855 : vector<8x1xf32>
    %857 = math.rsqrt %856 : vector<8x1xf32>
    %858 = vector.broadcast %857 : vector<8x1xf32> to vector<8x32xf32>
    %859 = arith.mulf %854, %858 : vector<8x32xf32>
    %860 = vector.broadcast %831 : vector<1x32xf32> to vector<8x32xf32>
    %861 = arith.mulf %859, %860 : vector<8x32xf32>
    %862 = vector.broadcast %833 : vector<1x32xf32> to vector<8x32xf32>
    %863 = arith.addf %861, %862 : vector<8x32xf32>
    %864 = arith.truncf %863 : vector<8x32xf32> to vector<8x32xbf16>
    %cst_321 = arith.constant dense<0.000000e+00> : vector<8x128xf32>
    %865 = tpu.matmul %864, %835, %cst_321 {dimension_numbers = #tpu.dot_dimension_numbers<[1], [0], [0], [1], [0, 0, 1, 1], [], []>} : vector<8x32xbf16>, vector<32x128xbf16>, vector<8x128xf32> -> vector<8x128xf32>
    %866 = vector.broadcast %837 : vector<1x128xf32> to vector<8x128xf32>
    %867 = arith.addf %865, %866 : vector<8x128xf32>
    %868 = arith.negf %867 : vector<8x128xf32>
    %869 = math.exp %868 : vector<8x128xf32>
    %cst_322 = arith.constant 1.000000e+00 : f32
    %870 = vector.broadcast %cst_322 : f32 to vector<8x128xf32>
    %871 = arith.addf %870, %869 : vector<8x128xf32>
    %872 = arith.divf %870, %871 : vector<8x128xf32>
    %873 = arith.mulf %867, %872 : vector<8x128xf32>
    %874 = arith.truncf %873 : vector<8x128xf32> to vector<8x128xbf16>
    %cst_323 = arith.constant dense<0.000000e+00> : vector<8x32xf32>
    %875 = tpu.matmul %874, %839, %cst_323 {dimension_numbers = #tpu.dot_dimension_numbers<[1], [0], [0], [1], [0, 0, 1, 1], [], []>} : vector<8x128xbf16>, vector<128x32xbf16>, vector<8x32xf32> -> vector<8x32xf32>
    %876 = vector.broadcast %841 : vector<1x32xf32> to vector<8x32xf32>
    %877 = arith.addf %875, %876 : vector<8x32xf32>
    %cst_324 = arith.constant 5.000000e-01 : f32
    %878 = vector.broadcast %cst_324 : f32 to vector<8x32xf32>
    %879 = arith.mulf %878, %877 : vector<8x32xf32>
    %880 = arith.addf %829, %879 : vector<8x32xf32>
    %c1_325 = arith.constant 1 : index
    %c0_326 = arith.constant 0 : index
    %c0_327 = arith.constant 0 : index
    %881 = vector.load %arg26[%c1_325, %c0_326, %c0_327] : memref<2x1x32xf32, #tpu.memory_space<vmem>>, vector<1x1x32xf32>
    %882 = vector.shape_cast %881 : vector<1x1x32xf32> to vector<1x32xf32>
    %c1_328 = arith.constant 1 : index
    %c0_329 = arith.constant 0 : index
    %c0_330 = arith.constant 0 : index
    %883 = vector.load %arg27[%c1_328, %c0_329, %c0_330] : memref<2x1x32xf32, #tpu.memory_space<vmem>>, vector<1x1x32xf32>
    %884 = vector.shape_cast %883 : vector<1x1x32xf32> to vector<1x32xf32>
    %cst_331 = arith.constant dense<0.000000e+00> : vector<8xf32>
    %885 = vector.multi_reduction <add>, %880, %cst_331 [1] : vector<8x32xf32> to vector<8xf32>
    %886 = vector.shape_cast %885 : vector<8xf32> to vector<8x1xf32>
    %cst_332 = arith.constant 3.200000e+01 : f32
    %887 = vector.broadcast %cst_332 : f32 to vector<8x1xf32>
    %888 = arith.divf %886, %887 : vector<8x1xf32>
    %889 = vector.broadcast %888 : vector<8x1xf32> to vector<8x32xf32>
    %890 = arith.subf %880, %889 : vector<8x32xf32>
    %891 = arith.mulf %890, %890 : vector<8x32xf32>
    %cst_333 = arith.constant dense<0.000000e+00> : vector<8xf32>
    %892 = vector.multi_reduction <add>, %891, %cst_333 [1] : vector<8x32xf32> to vector<8xf32>
    %893 = vector.shape_cast %892 : vector<8xf32> to vector<8x1xf32>
    %cst_334 = arith.constant 3.200000e+01 : f32
    %894 = vector.broadcast %cst_334 : f32 to vector<8x1xf32>
    %895 = arith.divf %893, %894 : vector<8x1xf32>
    %896 = vector.broadcast %888 : vector<8x1xf32> to vector<8x32xf32>
    %897 = arith.subf %880, %896 : vector<8x32xf32>
    %cst_335 = arith.constant 9.99999974E-6 : f32
    %898 = vector.broadcast %cst_335 : f32 to vector<8x1xf32>
    %899 = arith.addf %895, %898 : vector<8x1xf32>
    %900 = math.rsqrt %899 : vector<8x1xf32>
    %901 = vector.broadcast %900 : vector<8x1xf32> to vector<8x32xf32>
    %902 = arith.mulf %897, %901 : vector<8x32xf32>
    %903 = vector.broadcast %882 : vector<1x32xf32> to vector<8x32xf32>
    %904 = arith.mulf %902, %903 : vector<8x32xf32>
    %905 = vector.broadcast %884 : vector<1x32xf32> to vector<8x32xf32>
    %906 = arith.addf %904, %905 : vector<8x32xf32>
    %c0_336 = arith.constant 0 : index
    %c0_337 = arith.constant 0 : index
    %c0_338 = arith.constant 0 : index
    %907 = vector.load %arg28[%c0_336, %c0_337, %c0_338] : memref<6x2x32xf32, #tpu.memory_space<vmem>>, vector<6x2x32xf32>
    %908 = vector.shape_cast %907 : vector<6x2x32xf32> to vector<12x32xf32>
    %c0_339 = arith.constant 0 : index
    %c0_340 = arith.constant 0 : index
    %909 = vector.load %arg29[%c0_339, %c0_340] : memref<32x128xbf16, #tpu.memory_space<vmem>>, vector<32x128xbf16>
    %c0_341 = arith.constant 0 : index
    %c0_342 = arith.constant 0 : index
    %910 = vector.load %arg30[%c0_341, %c0_342] : memref<1x128xf32, #tpu.memory_space<vmem>>, vector<1x128xf32>
    %911 = arith.truncf %908 : vector<12x32xf32> to vector<12x32xbf16>
    %cst_343 = arith.constant dense<0.000000e+00> : vector<12x128xf32>
    %912 = tpu.matmul %911, %909, %cst_343 {dimension_numbers = #tpu.dot_dimension_numbers<[1], [0], [0], [1], [0, 0, 1, 1], [], []>} : vector<12x32xbf16>, vector<32x128xbf16>, vector<12x128xf32> -> vector<12x128xf32>
    %913 = vector.broadcast %910 : vector<1x128xf32> to vector<12x128xf32>
    %914 = arith.addf %912, %913 : vector<12x128xf32>
    %915 = vector.shape_cast %914 : vector<12x128xf32> to vector<6x2x128xf32>
    %c0_344 = arith.constant 0 : index
    %c0_345 = arith.constant 0 : index
    %916 = vector.load %arg31[%c0_344, %c0_345] : memref<32x128xbf16, #tpu.memory_space<vmem>>, vector<32x128xbf16>
    %c0_346 = arith.constant 0 : index
    %c0_347 = arith.constant 0 : index
    %917 = vector.load %arg32[%c0_346, %c0_347] : memref<1x128xf32, #tpu.memory_space<vmem>>, vector<1x128xf32>
    %cst_348 = arith.constant 0.000000e+00 : f32
    %918 = vector.broadcast %cst_348 : f32 to vector<2x32xf32>
    %cst_349 = arith.constant 0.000000e+00 : f32
    %919 = vector.broadcast %cst_349 : f32 to vector<2x32xf32>
    %920 = vector.extract_strided_slice %915 {offsets = [0, 0, 0], sizes = [1, 2, 128], strides = [1, 1, 1]} : vector<6x2x128xf32> to vector<1x2x128xf32>
    %921 = vector.shape_cast %920 : vector<1x2x128xf32> to vector<2x128xf32>
    %922 = arith.truncf %918 : vector<2x32xf32> to vector<2x32xbf16>
    %cst_350 = arith.constant dense<0.000000e+00> : vector<2x128xf32>
    %923 = tpu.matmul %922, %916, %cst_350 {dimension_numbers = #tpu.dot_dimension_numbers<[1], [0], [0], [1], [0, 0, 1, 1], [], []>} : vector<2x32xbf16>, vector<32x128xbf16>, vector<2x128xf32> -> vector<2x128xf32>
    %924 = vector.broadcast %917 : vector<1x128xf32> to vector<2x128xf32>
    %925 = arith.addf %923, %924 : vector<2x128xf32>
    %926 = arith.addf %921, %925 : vector<2x128xf32>
    %927 = vector.extract_strided_slice %926 {offsets = [0, 0], sizes = [2, 32], strides = [1, 1]} : vector<2x128xf32> to vector<2x32xf32>
    %928 = arith.negf %927 : vector<2x32xf32>
    %929 = math.exp %928 : vector<2x32xf32>
    %cst_351 = arith.constant 1.000000e+00 : f32
    %930 = vector.broadcast %cst_351 : f32 to vector<2x32xf32>
    %931 = arith.addf %930, %929 : vector<2x32xf32>
    %932 = arith.divf %930, %931 : vector<2x32xf32>
    %933 = vector.extract_strided_slice %926 {offsets = [0, 32], sizes = [2, 32], strides = [1, 1]} : vector<2x128xf32> to vector<2x32xf32>
    %934 = arith.negf %933 : vector<2x32xf32>
    %935 = math.exp %934 : vector<2x32xf32>
    %cst_352 = arith.constant 1.000000e+00 : f32
    %936 = vector.broadcast %cst_352 : f32 to vector<2x32xf32>
    %937 = arith.addf %936, %935 : vector<2x32xf32>
    %938 = arith.divf %936, %937 : vector<2x32xf32>
    %939 = vector.extract_strided_slice %926 {offsets = [0, 64], sizes = [2, 32], strides = [1, 1]} : vector<2x128xf32> to vector<2x32xf32>
    %940 = math.tanh %939 : vector<2x32xf32>
    %941 = vector.extract_strided_slice %926 {offsets = [0, 96], sizes = [2, 32], strides = [1, 1]} : vector<2x128xf32> to vector<2x32xf32>
    %942 = arith.negf %941 : vector<2x32xf32>
    %943 = math.exp %942 : vector<2x32xf32>
    %cst_353 = arith.constant 1.000000e+00 : f32
    %944 = vector.broadcast %cst_353 : f32 to vector<2x32xf32>
    %945 = arith.addf %944, %943 : vector<2x32xf32>
    %946 = arith.divf %944, %945 : vector<2x32xf32>
    %947 = arith.mulf %938, %919 : vector<2x32xf32>
    %948 = arith.mulf %932, %940 : vector<2x32xf32>
    %949 = arith.addf %947, %948 : vector<2x32xf32>
    %950 = math.tanh %949 : vector<2x32xf32>
    %951 = arith.mulf %946, %950 : vector<2x32xf32>
    %952 = vector.extract_strided_slice %915 {offsets = [1, 0, 0], sizes = [1, 2, 128], strides = [1, 1, 1]} : vector<6x2x128xf32> to vector<1x2x128xf32>
    %953 = vector.shape_cast %952 : vector<1x2x128xf32> to vector<2x128xf32>
    %954 = arith.truncf %951 : vector<2x32xf32> to vector<2x32xbf16>
    %cst_354 = arith.constant dense<0.000000e+00> : vector<2x128xf32>
    %955 = tpu.matmul %954, %916, %cst_354 {dimension_numbers = #tpu.dot_dimension_numbers<[1], [0], [0], [1], [0, 0, 1, 1], [], []>} : vector<2x32xbf16>, vector<32x128xbf16>, vector<2x128xf32> -> vector<2x128xf32>
    %956 = vector.broadcast %917 : vector<1x128xf32> to vector<2x128xf32>
    %957 = arith.addf %955, %956 : vector<2x128xf32>
    %958 = arith.addf %953, %957 : vector<2x128xf32>
    %959 = vector.extract_strided_slice %958 {offsets = [0, 0], sizes = [2, 32], strides = [1, 1]} : vector<2x128xf32> to vector<2x32xf32>
    %960 = arith.negf %959 : vector<2x32xf32>
    %961 = math.exp %960 : vector<2x32xf32>
    %cst_355 = arith.constant 1.000000e+00 : f32
    %962 = vector.broadcast %cst_355 : f32 to vector<2x32xf32>
    %963 = arith.addf %962, %961 : vector<2x32xf32>
    %964 = arith.divf %962, %963 : vector<2x32xf32>
    %965 = vector.extract_strided_slice %958 {offsets = [0, 32], sizes = [2, 32], strides = [1, 1]} : vector<2x128xf32> to vector<2x32xf32>
    %966 = arith.negf %965 : vector<2x32xf32>
    %967 = math.exp %966 : vector<2x32xf32>
    %cst_356 = arith.constant 1.000000e+00 : f32
    %968 = vector.broadcast %cst_356 : f32 to vector<2x32xf32>
    %969 = arith.addf %968, %967 : vector<2x32xf32>
    %970 = arith.divf %968, %969 : vector<2x32xf32>
    %971 = vector.extract_strided_slice %958 {offsets = [0, 64], sizes = [2, 32], strides = [1, 1]} : vector<2x128xf32> to vector<2x32xf32>
    %972 = math.tanh %971 : vector<2x32xf32>
    %973 = vector.extract_strided_slice %958 {offsets = [0, 96], sizes = [2, 32], strides = [1, 1]} : vector<2x128xf32> to vector<2x32xf32>
    %974 = arith.negf %973 : vector<2x32xf32>
    %975 = math.exp %974 : vector<2x32xf32>
    %cst_357 = arith.constant 1.000000e+00 : f32
    %976 = vector.broadcast %cst_357 : f32 to vector<2x32xf32>
    %977 = arith.addf %976, %975 : vector<2x32xf32>
    %978 = arith.divf %976, %977 : vector<2x32xf32>
    %979 = arith.mulf %970, %949 : vector<2x32xf32>
    %980 = arith.mulf %964, %972 : vector<2x32xf32>
    %981 = arith.addf %979, %980 : vector<2x32xf32>
    %982 = math.tanh %981 : vector<2x32xf32>
    %983 = arith.mulf %978, %982 : vector<2x32xf32>
    %984 = vector.extract_strided_slice %915 {offsets = [2, 0, 0], sizes = [1, 2, 128], strides = [1, 1, 1]} : vector<6x2x128xf32> to vector<1x2x128xf32>
    %985 = vector.shape_cast %984 : vector<1x2x128xf32> to vector<2x128xf32>
    %986 = arith.truncf %983 : vector<2x32xf32> to vector<2x32xbf16>
    %cst_358 = arith.constant dense<0.000000e+00> : vector<2x128xf32>
    %987 = tpu.matmul %986, %916, %cst_358 {dimension_numbers = #tpu.dot_dimension_numbers<[1], [0], [0], [1], [0, 0, 1, 1], [], []>} : vector<2x32xbf16>, vector<32x128xbf16>, vector<2x128xf32> -> vector<2x128xf32>
    %988 = vector.broadcast %917 : vector<1x128xf32> to vector<2x128xf32>
    %989 = arith.addf %987, %988 : vector<2x128xf32>
    %990 = arith.addf %985, %989 : vector<2x128xf32>
    %991 = vector.extract_strided_slice %990 {offsets = [0, 0], sizes = [2, 32], strides = [1, 1]} : vector<2x128xf32> to vector<2x32xf32>
    %992 = arith.negf %991 : vector<2x32xf32>
    %993 = math.exp %992 : vector<2x32xf32>
    %cst_359 = arith.constant 1.000000e+00 : f32
    %994 = vector.broadcast %cst_359 : f32 to vector<2x32xf32>
    %995 = arith.addf %994, %993 : vector<2x32xf32>
    %996 = arith.divf %994, %995 : vector<2x32xf32>
    %997 = vector.extract_strided_slice %990 {offsets = [0, 32], sizes = [2, 32], strides = [1, 1]} : vector<2x128xf32> to vector<2x32xf32>
    %998 = arith.negf %997 : vector<2x32xf32>
    %999 = math.exp %998 : vector<2x32xf32>
    %cst_360 = arith.constant 1.000000e+00 : f32
    %1000 = vector.broadcast %cst_360 : f32 to vector<2x32xf32>
    %1001 = arith.addf %1000, %999 : vector<2x32xf32>
    %1002 = arith.divf %1000, %1001 : vector<2x32xf32>
    %1003 = vector.extract_strided_slice %990 {offsets = [0, 64], sizes = [2, 32], strides = [1, 1]} : vector<2x128xf32> to vector<2x32xf32>
    %1004 = math.tanh %1003 : vector<2x32xf32>
    %1005 = vector.extract_strided_slice %990 {offsets = [0, 96], sizes = [2, 32], strides = [1, 1]} : vector<2x128xf32> to vector<2x32xf32>
    %1006 = arith.negf %1005 : vector<2x32xf32>
    %1007 = math.exp %1006 : vector<2x32xf32>
    %cst_361 = arith.constant 1.000000e+00 : f32
    %1008 = vector.broadcast %cst_361 : f32 to vector<2x32xf32>
    %1009 = arith.addf %1008, %1007 : vector<2x32xf32>
    %1010 = arith.divf %1008, %1009 : vector<2x32xf32>
    %1011 = arith.mulf %1002, %981 : vector<2x32xf32>
    %1012 = arith.mulf %996, %1004 : vector<2x32xf32>
    %1013 = arith.addf %1011, %1012 : vector<2x32xf32>
    %1014 = math.tanh %1013 : vector<2x32xf32>
    %1015 = arith.mulf %1010, %1014 : vector<2x32xf32>
    %1016 = vector.extract_strided_slice %915 {offsets = [3, 0, 0], sizes = [1, 2, 128], strides = [1, 1, 1]} : vector<6x2x128xf32> to vector<1x2x128xf32>
    %1017 = vector.shape_cast %1016 : vector<1x2x128xf32> to vector<2x128xf32>
    %1018 = arith.truncf %1015 : vector<2x32xf32> to vector<2x32xbf16>
    %cst_362 = arith.constant dense<0.000000e+00> : vector<2x128xf32>
    %1019 = tpu.matmul %1018, %916, %cst_362 {dimension_numbers = #tpu.dot_dimension_numbers<[1], [0], [0], [1], [0, 0, 1, 1], [], []>} : vector<2x32xbf16>, vector<32x128xbf16>, vector<2x128xf32> -> vector<2x128xf32>
    %1020 = vector.broadcast %917 : vector<1x128xf32> to vector<2x128xf32>
    %1021 = arith.addf %1019, %1020 : vector<2x128xf32>
    %1022 = arith.addf %1017, %1021 : vector<2x128xf32>
    %1023 = vector.extract_strided_slice %1022 {offsets = [0, 0], sizes = [2, 32], strides = [1, 1]} : vector<2x128xf32> to vector<2x32xf32>
    %1024 = arith.negf %1023 : vector<2x32xf32>
    %1025 = math.exp %1024 : vector<2x32xf32>
    %cst_363 = arith.constant 1.000000e+00 : f32
    %1026 = vector.broadcast %cst_363 : f32 to vector<2x32xf32>
    %1027 = arith.addf %1026, %1025 : vector<2x32xf32>
    %1028 = arith.divf %1026, %1027 : vector<2x32xf32>
    %1029 = vector.extract_strided_slice %1022 {offsets = [0, 32], sizes = [2, 32], strides = [1, 1]} : vector<2x128xf32> to vector<2x32xf32>
    %1030 = arith.negf %1029 : vector<2x32xf32>
    %1031 = math.exp %1030 : vector<2x32xf32>
    %cst_364 = arith.constant 1.000000e+00 : f32
    %1032 = vector.broadcast %cst_364 : f32 to vector<2x32xf32>
    %1033 = arith.addf %1032, %1031 : vector<2x32xf32>
    %1034 = arith.divf %1032, %1033 : vector<2x32xf32>
    %1035 = vector.extract_strided_slice %1022 {offsets = [0, 64], sizes = [2, 32], strides = [1, 1]} : vector<2x128xf32> to vector<2x32xf32>
    %1036 = math.tanh %1035 : vector<2x32xf32>
    %1037 = vector.extract_strided_slice %1022 {offsets = [0, 96], sizes = [2, 32], strides = [1, 1]} : vector<2x128xf32> to vector<2x32xf32>
    %1038 = arith.negf %1037 : vector<2x32xf32>
    %1039 = math.exp %1038 : vector<2x32xf32>
    %cst_365 = arith.constant 1.000000e+00 : f32
    %1040 = vector.broadcast %cst_365 : f32 to vector<2x32xf32>
    %1041 = arith.addf %1040, %1039 : vector<2x32xf32>
    %1042 = arith.divf %1040, %1041 : vector<2x32xf32>
    %1043 = arith.mulf %1034, %1013 : vector<2x32xf32>
    %1044 = arith.mulf %1028, %1036 : vector<2x32xf32>
    %1045 = arith.addf %1043, %1044 : vector<2x32xf32>
    %1046 = math.tanh %1045 : vector<2x32xf32>
    %1047 = arith.mulf %1042, %1046 : vector<2x32xf32>
    %1048 = vector.extract_strided_slice %915 {offsets = [4, 0, 0], sizes = [1, 2, 128], strides = [1, 1, 1]} : vector<6x2x128xf32> to vector<1x2x128xf32>
    %1049 = vector.shape_cast %1048 : vector<1x2x128xf32> to vector<2x128xf32>
    %1050 = arith.truncf %1047 : vector<2x32xf32> to vector<2x32xbf16>
    %cst_366 = arith.constant dense<0.000000e+00> : vector<2x128xf32>
    %1051 = tpu.matmul %1050, %916, %cst_366 {dimension_numbers = #tpu.dot_dimension_numbers<[1], [0], [0], [1], [0, 0, 1, 1], [], []>} : vector<2x32xbf16>, vector<32x128xbf16>, vector<2x128xf32> -> vector<2x128xf32>
    %1052 = vector.broadcast %917 : vector<1x128xf32> to vector<2x128xf32>
    %1053 = arith.addf %1051, %1052 : vector<2x128xf32>
    %1054 = arith.addf %1049, %1053 : vector<2x128xf32>
    %1055 = vector.extract_strided_slice %1054 {offsets = [0, 0], sizes = [2, 32], strides = [1, 1]} : vector<2x128xf32> to vector<2x32xf32>
    %1056 = arith.negf %1055 : vector<2x32xf32>
    %1057 = math.exp %1056 : vector<2x32xf32>
    %cst_367 = arith.constant 1.000000e+00 : f32
    %1058 = vector.broadcast %cst_367 : f32 to vector<2x32xf32>
    %1059 = arith.addf %1058, %1057 : vector<2x32xf32>
    %1060 = arith.divf %1058, %1059 : vector<2x32xf32>
    %1061 = vector.extract_strided_slice %1054 {offsets = [0, 32], sizes = [2, 32], strides = [1, 1]} : vector<2x128xf32> to vector<2x32xf32>
    %1062 = arith.negf %1061 : vector<2x32xf32>
    %1063 = math.exp %1062 : vector<2x32xf32>
    %cst_368 = arith.constant 1.000000e+00 : f32
    %1064 = vector.broadcast %cst_368 : f32 to vector<2x32xf32>
    %1065 = arith.addf %1064, %1063 : vector<2x32xf32>
    %1066 = arith.divf %1064, %1065 : vector<2x32xf32>
    %1067 = vector.extract_strided_slice %1054 {offsets = [0, 64], sizes = [2, 32], strides = [1, 1]} : vector<2x128xf32> to vector<2x32xf32>
    %1068 = math.tanh %1067 : vector<2x32xf32>
    %1069 = vector.extract_strided_slice %1054 {offsets = [0, 96], sizes = [2, 32], strides = [1, 1]} : vector<2x128xf32> to vector<2x32xf32>
    %1070 = arith.negf %1069 : vector<2x32xf32>
    %1071 = math.exp %1070 : vector<2x32xf32>
    %cst_369 = arith.constant 1.000000e+00 : f32
    %1072 = vector.broadcast %cst_369 : f32 to vector<2x32xf32>
    %1073 = arith.addf %1072, %1071 : vector<2x32xf32>
    %1074 = arith.divf %1072, %1073 : vector<2x32xf32>
    %1075 = arith.mulf %1066, %1045 : vector<2x32xf32>
    %1076 = arith.mulf %1060, %1068 : vector<2x32xf32>
    %1077 = arith.addf %1075, %1076 : vector<2x32xf32>
    %1078 = math.tanh %1077 : vector<2x32xf32>
    %1079 = arith.mulf %1074, %1078 : vector<2x32xf32>
    %1080 = vector.extract_strided_slice %915 {offsets = [5, 0, 0], sizes = [1, 2, 128], strides = [1, 1, 1]} : vector<6x2x128xf32> to vector<1x2x128xf32>
    %1081 = vector.shape_cast %1080 : vector<1x2x128xf32> to vector<2x128xf32>
    %1082 = arith.truncf %1079 : vector<2x32xf32> to vector<2x32xbf16>
    %cst_370 = arith.constant dense<0.000000e+00> : vector<2x128xf32>
    %1083 = tpu.matmul %1082, %916, %cst_370 {dimension_numbers = #tpu.dot_dimension_numbers<[1], [0], [0], [1], [0, 0, 1, 1], [], []>} : vector<2x32xbf16>, vector<32x128xbf16>, vector<2x128xf32> -> vector<2x128xf32>
    %1084 = vector.broadcast %917 : vector<1x128xf32> to vector<2x128xf32>
    %1085 = arith.addf %1083, %1084 : vector<2x128xf32>
    %1086 = arith.addf %1081, %1085 : vector<2x128xf32>
    %1087 = vector.extract_strided_slice %1086 {offsets = [0, 0], sizes = [2, 32], strides = [1, 1]} : vector<2x128xf32> to vector<2x32xf32>
    %1088 = arith.negf %1087 : vector<2x32xf32>
    %1089 = math.exp %1088 : vector<2x32xf32>
    %cst_371 = arith.constant 1.000000e+00 : f32
    %1090 = vector.broadcast %cst_371 : f32 to vector<2x32xf32>
    %1091 = arith.addf %1090, %1089 : vector<2x32xf32>
    %1092 = arith.divf %1090, %1091 : vector<2x32xf32>
    %1093 = vector.extract_strided_slice %1086 {offsets = [0, 32], sizes = [2, 32], strides = [1, 1]} : vector<2x128xf32> to vector<2x32xf32>
    %1094 = arith.negf %1093 : vector<2x32xf32>
    %1095 = math.exp %1094 : vector<2x32xf32>
    %cst_372 = arith.constant 1.000000e+00 : f32
    %1096 = vector.broadcast %cst_372 : f32 to vector<2x32xf32>
    %1097 = arith.addf %1096, %1095 : vector<2x32xf32>
    %1098 = arith.divf %1096, %1097 : vector<2x32xf32>
    %1099 = vector.extract_strided_slice %1086 {offsets = [0, 64], sizes = [2, 32], strides = [1, 1]} : vector<2x128xf32> to vector<2x32xf32>
    %1100 = math.tanh %1099 : vector<2x32xf32>
    %1101 = vector.extract_strided_slice %1086 {offsets = [0, 96], sizes = [2, 32], strides = [1, 1]} : vector<2x128xf32> to vector<2x32xf32>
    %1102 = arith.negf %1101 : vector<2x32xf32>
    %1103 = math.exp %1102 : vector<2x32xf32>
    %cst_373 = arith.constant 1.000000e+00 : f32
    %1104 = vector.broadcast %cst_373 : f32 to vector<2x32xf32>
    %1105 = arith.addf %1104, %1103 : vector<2x32xf32>
    %1106 = arith.divf %1104, %1105 : vector<2x32xf32>
    %1107 = arith.mulf %1098, %1077 : vector<2x32xf32>
    %1108 = arith.mulf %1092, %1100 : vector<2x32xf32>
    %1109 = arith.addf %1107, %1108 : vector<2x32xf32>
    %1110 = math.tanh %1109 : vector<2x32xf32>
    %1111 = arith.mulf %1106, %1110 : vector<2x32xf32>
    %1112 = vector.shape_cast %951 : vector<2x32xf32> to vector<2x1x32xf32>
    %1113 = vector.shape_cast %983 : vector<2x32xf32> to vector<2x1x32xf32>
    %1114 = vector.shape_cast %1015 : vector<2x32xf32> to vector<2x1x32xf32>
    %1115 = vector.shape_cast %1047 : vector<2x32xf32> to vector<2x1x32xf32>
    %1116 = vector.shape_cast %1079 : vector<2x32xf32> to vector<2x1x32xf32>
    %1117 = vector.shape_cast %1111 : vector<2x32xf32> to vector<2x1x32xf32>
    %1118 = tpu.concatenate %1112, %1113, %1114, %1115, %1116, %1117 in 1 : vector<2x1x32xf32>, vector<2x1x32xf32>, vector<2x1x32xf32>, vector<2x1x32xf32>, vector<2x1x32xf32>, vector<2x1x32xf32> -> vector<2x6x32xf32>
    %1119 = vector.shape_cast %1118 : vector<2x6x32xf32> to vector<12x32xf32>
    %c0_374 = arith.constant 0 : index
    %c0_375 = arith.constant 0 : index
    %1120 = vector.load %arg33[%c0_374, %c0_375] : memref<32x32xbf16, #tpu.memory_space<vmem>>, vector<32x32xbf16>
    %c0_376 = arith.constant 0 : index
    %c0_377 = arith.constant 0 : index
    %1121 = vector.load %arg34[%c0_376, %c0_377] : memref<1x32xf32, #tpu.memory_space<vmem>>, vector<1x32xf32>
    %1122 = arith.truncf %1119 : vector<12x32xf32> to vector<12x32xbf16>
    %cst_378 = arith.constant dense<0.000000e+00> : vector<12x32xf32>
    %1123 = tpu.matmul %1122, %1120, %cst_378 {dimension_numbers = #tpu.dot_dimension_numbers<[1], [0], [0], [1], [0, 0, 1, 1], [], []>} : vector<12x32xbf16>, vector<32x32xbf16>, vector<12x32xf32> -> vector<12x32xf32>
    %1124 = vector.broadcast %1121 : vector<1x32xf32> to vector<12x32xf32>
    %1125 = arith.addf %1123, %1124 : vector<12x32xf32>
    %c0_379 = arith.constant 0 : index
    %c0_380 = arith.constant 0 : index
    %1126 = vector.load %arg35[%c0_379, %c0_380] : memref<32x128xbf16, #tpu.memory_space<vmem>>, vector<32x128xbf16>
    %1127 = arith.truncf %906 : vector<8x32xf32> to vector<8x32xbf16>
    %cst_381 = arith.constant dense<0.000000e+00> : vector<8x128xf32>
    %1128 = tpu.matmul %1127, %1126, %cst_381 {dimension_numbers = #tpu.dot_dimension_numbers<[1], [0], [0], [1], [0, 0, 1, 1], [], []>} : vector<8x32xbf16>, vector<32x128xbf16>, vector<8x128xf32> -> vector<8x128xf32>
    %1129 = vector.shape_cast %1128 : vector<8x128xf32> to vector<2x4x128xf32>
    %c0_382 = arith.constant 0 : index
    %c0_383 = arith.constant 0 : index
    %1130 = vector.load %arg36[%c0_382, %c0_383] : memref<32x128xbf16, #tpu.memory_space<vmem>>, vector<32x128xbf16>
    %1131 = arith.truncf %1125 : vector<12x32xf32> to vector<12x32xbf16>
    %cst_384 = arith.constant dense<0.000000e+00> : vector<12x128xf32>
    %1132 = tpu.matmul %1131, %1130, %cst_384 {dimension_numbers = #tpu.dot_dimension_numbers<[1], [0], [0], [1], [0, 0, 1, 1], [], []>} : vector<12x32xbf16>, vector<32x128xbf16>, vector<12x128xf32> -> vector<12x128xf32>
    %1133 = vector.shape_cast %1132 : vector<12x128xf32> to vector<2x6x128xf32>
    %1134 = vector.shape_cast %1129 : vector<2x4x128xf32> to vector<2x4x1x128xf32>
    %1135 = vector.shape_cast %1133 : vector<2x6x128xf32> to vector<2x1x6x128xf32>
    %1136 = vector.broadcast %1134 : vector<2x4x1x128xf32> to vector<2x4x6x128xf32>
    %1137 = vector.broadcast %1135 : vector<2x1x6x128xf32> to vector<2x4x6x128xf32>
    %1138 = arith.addf %1136, %1137 : vector<2x4x6x128xf32>
    %c0_385 = arith.constant 0 : index
    %c0_386 = arith.constant 0 : index
    %c0_387 = arith.constant 0 : index
    %c0_388 = arith.constant 0 : index
    %1139 = vector.load %arg37[%c0_385, %c0_386, %c0_387, %c0_388] : memref<2x4x6x128xf32, #tpu.memory_space<vmem>>, vector<2x4x6x128xf32>
    tpu.vector_store %arg37[%c0_385, %c0_386, %c0_387, %c0_388], %1138 {strides = array<i32>} : memref<2x4x6x128xf32, #tpu.memory_space<vmem>>, vector<2x4x6x128xf32>,
    return
  }
}

</mosaic_0001>

<bundles_post_ra>
// kernel: conformer_forward.2
= control target key start
LH: loop header
LB: loop body
LE: loop exit
PB: predicated region body
PF: predicated region fallthrough
CT: control target
= control target key end

     0   :  { %vm78_vm0 = vcmask 1043456   ;;  %vm79_vm1 = vcmask 1044480   ;;  %v261_v1 = vmov 65535   ;;  %vm53_vm2 = vcmask 72704   ;;  %s407_s1 = inlined_call_operand.vmem [shape: bf16[9,32], index: 1, kind: input, shape index: {}]   ;;  %s408_s0 = inlined_call_operand.vmem [shape: f32[126,9], index: 0, kind: input, shape index: {}]   ;;  %s409_s2 = inlined_call_operand.vmem [shape: f32[1,32], index: 2, kind: input, shape index: {}]   ;;  %s410_s3 = inlined_call_operand.vmem [shape: f32[126,32], index: 3, kind: output, shape index: {}]  }
   0x1   :  { %v260_v0 = vld [vmem:[%s407_s1] sm:$0x1f]   ;;  %v80_v2 = vsel %vm78_vm0, 4294967295, %v261_v1  ;;  %v16_v4 = vld [vmem:[%s408_s0 + $0x8] sm:$0xff]  ;;  %v17_v9 = vld [vmem:[%s408_s0 + $0x10] sm:$0xff]  ;;  %vm198_vm3 = vcmask 261120  }
   0x2   :  { %v15_v3 = vld [vmem:[%s408_s0] sm:$0xff]  ;;  %v81_v6 = vsel %vm79_vm1, %v80_v2, 0  ;;  %v24_v8 = vld [vmem:[%s408_s0 + $0x48] sm:$0xff]  ;;  %v18_v10 = vld [vmem:[%s408_s0 + $0x18] sm:$0xff]  ;;  %vm214_vm4 = vcmask 259072  }
   0x3   :  { %v23_v5 = vld [vmem:[%s408_s0 + $0x40] sm:$0xff]  ;;  %v34_v7 = vpack.c.bf16 %v16_v4, %v15_v3  ;;  %v83_v11 = vand.u32 %v260_v0, %v81_v6  ;;  %v25_v13 = vld [vmem:[%s408_s0 + $0x50] sm:$0xff]  ;;  %v26_v14 = vld [vmem:[%s408_s0 + $0x58] sm:$0xff]  ;;  %v35_v19 = vpack.c.bf16 %v18_v10, %v17_v9 }
   0x4   :  { %v38_v12 = vpack.c.bf16 %v24_v8, %v23_v5  ;;  %v19_v15 = vld [vmem:[%s408_s0 + $0x20] sm:$0xff]  ;;  %v20_v16 = vld [vmem:[%s408_s0 + $0x28] sm:$0xff]  ;;  %v39_v20 = vpack.c.bf16 %v26_v14, %v25_v13  ;;  %v21_v23 = vld [vmem:[%s408_s0 + $0x30] sm:$0xff] }
   0x5   :  { %241 = vmatprep.mubr.msk.bf16.mxu0 %vm53_vm2, %v34_v7  ;;  %v27_v17 = vld [vmem:[%s408_s0 + $0x60] sm:$0xff]  ;;  %v28_v18 = vld [vmem:[%s408_s0 + $0x68] sm:$0xff]  ;;  %239 = vmatprep.subr.bf16.mxu0 %v83_v11  ;;  %v36_v21 = vpack.c.bf16 %v20_v16, %v19_v15  ;;  %v22_v24 = vld [vmem:[%s408_s0 + $0x38] sm:$0xff] }
   0x6   :  { %257 = vmatprep.subr.bf16.mxu1 %v83_v11  ;;  %240 = vmatpush3.bf16.msra.mxu0 %v83_v11  ;;  %v40_v22 = vpack.c.bf16 %v28_v18, %v27_v17  ;;  %v29_v25 = vld [vmem:[%s408_s0 + $0x70] sm:$0xff]  ;;  %v30_v26 = vld [vmem:[%s408_s0 + $0x78] sm:$0x3f]  ;;  %v37_v27 = vpack.c.bf16 %v22_v24, %v21_v23  ;;  %v220_v29 = vld [vmem:[%s409_s2] ss:$0 sm:$0xff] }
   0x7   :  { %258 = vmatpush3.bf16.msra.mxu1 %v83_v11  ;;  %249 = vmatprep.mubr.msk.bf16.mxu1 %vm53_vm2, %v38_v12  ;;  %v41_v28 = vpack.c.bf16 %v30_v26, %v29_v25 }
   0x9   :  { %242 = vmatmul.mubr.msk.bf16.vlgmr.msra.gmra.mxu0 %vm53_vm2, %v35_v19 }
   0xa   :  { %250 = vmatmul.mubr.msk.bf16.vlgmr.msra.gmra.mxu1 %vm53_vm2, %v39_v20  ;;  %245 = vmatprep.mubr.msk.bf16.mxu0 %vm53_vm2, %v36_v21 }
   0xb   :  { %253 = vmatprep.mubr.msk.bf16.mxu1 %vm53_vm2, %v40_v22 }
  0x11   :  { %246 = vmatmul.mubr.msk.bf16.gmra.mxu0 %vm53_vm2, %v37_v27 }
  0x12   :  { %254 = vmatmul.mubr.msk.bf16.gmra.mxu1 %vm53_vm2, %v41_v28 }
  0xc9   :  { %v243_v30 = vpop.f32.mrf.mxu0 }
  0xca   :  { %v251_v31 = vpop.f32.mrf.mxu1  ;;  %v128_v32 = vadd.f32 %v243_v30, %v220_v29 }
  0xcb   :  { %v160_v33 = vadd.f32 %v251_v31, %v220_v29  ;;  %v119_v34 = vpop.f32.mrf.mxu0 }
  0xcc   :  { %v151_v35 = vpop.f32.mrf.mxu1  ;;  %v184_v36 = vmax.f32 %v128_v32, 0.0  ;;  %v120_v38 = vadd.f32 %v220_v29, %v119_v34 }
  0xcd   :  { %v192_v37 = vmax.f32 %v160_v33, 0.0  ;;  %v152_v39 = vadd.f32 %v220_v29, %v151_v35  ;;  %v244_v40 = vpop.f32.mrf.mxu0 }
  0xce   :  { %v252_v41 = vpop.f32.mrf.mxu1  ;;  %201 = vst.msk [vmem:[%s410_s3 + $0x10] sm:$0xff] %vm198_vm3, %v184_v36  ;;  %v182_v42 = vmax.f32 %v120_v38, 0.0  ;;  %v131_v44 = vadd.f32 %v244_v40, %v220_v29 }
  0xcf   :  { %209 = vst.msk [vmem:[%s410_s3 + $0x50] sm:$0xff] %vm198_vm3, %v192_v37  ;;  %v190_v43 = vmax.f32 %v152_v39, 0.0  ;;  %v163_v45 = vadd.f32 %v252_v41, %v220_v29  ;;  %v122_v46 = vpop.f32.mrf.mxu0 }
  0xd0   :  { %v154_v47 = vpop.f32.mrf.mxu1  ;;  %199 = vst.msk [vmem:[%s410_s3] sm:$0xff] %vm198_vm3, %v182_v42  ;;  %v185_v48 = vmax.f32 %v131_v44, 0.0  ;;  %v123_v50 = vadd.f32 %v220_v29, %v122_v46 }
  0xd1   :  { %207 = vst.msk [vmem:[%s410_s3 + $0x40] sm:$0xff] %vm198_vm3, %v190_v43  ;;  %v193_v49 = vmax.f32 %v163_v45, 0.0  ;;  %v155_v51 = vadd.f32 %v220_v29, %v154_v47  ;;  %v247_v52 = vpop.f32.mrf.mxu0 }
  0xd2   :  { %v255_v53 = vpop.f32.mrf.mxu1  ;;  %202 = vst.msk [vmem:[%s410_s3 + $0x18] sm:$0xff] %vm198_vm3, %v185_v48  ;;  %v183_v54 = vmax.f32 %v123_v50, 0.0  ;;  %v144_v56 = vadd.f32 %v247_v52, %v220_v29 }
  0xd3   :  { %210 = vst.msk [vmem:[%s410_s3 + $0x58] sm:$0xff] %vm198_vm3, %v193_v49  ;;  %v191_v55 = vmax.f32 %v155_v51, 0.0  ;;  %v176_v57 = vadd.f32 %v255_v53, %v220_v29  ;;  %v135_v58 = vpop.f32.mrf.mxu0 }
  0xd4   :  { %v167_v59 = vpop.f32.mrf.mxu1  ;;  %200 = vst.msk [vmem:[%s410_s3 + $0x8] sm:$0xff] %vm198_vm3, %v183_v54  ;;  %v188_v60 = vmax.f32 %v144_v56, 0.0  ;;  %v136_v62 = vadd.f32 %v220_v29, %v135_v58 }
  0xd5   :  { %208 = vst.msk [vmem:[%s410_s3 + $0x48] sm:$0xff] %vm198_vm3, %v191_v55  ;;  %v196_v61 = vmax.f32 %v176_v57, 0.0  ;;  %v168_v63 = vadd.f32 %v220_v29, %v167_v59  ;;  %v248_v0 = vpop.f32.mrf.mxu0 }
  0xd6   :  { %v256_v1 = vpop.f32.mrf.mxu1  ;;  %205 = vst.msk [vmem:[%s410_s3 + $0x30] sm:$0xff] %vm198_vm3, %v188_v60  ;;  %v186_v2 = vmax.f32 %v136_v62, 0.0  ;;  %v147_v4 = vadd.f32 %v248_v0, %v220_v29 }
  0xd7   :  { %213 = vst.msk [vmem:[%s410_s3 + $0x70] sm:$0xff] %vm198_vm3, %v196_v61  ;;  %v194_v3 = vmax.f32 %v168_v63, 0.0  ;;  %v179_v5 = vadd.f32 %v256_v1, %v220_v29  ;;  %v138_v6 = vpop.f32.mrf.mxu0 }
  0xd8   :  { %v170_v7 = vpop.f32.mrf.mxu1  ;;  %203 = vst.msk [vmem:[%s410_s3 + $0x20] sm:$0xff] %vm198_vm3, %v186_v2  ;;  %v189_v8 = vmax.f32 %v147_v4, 0.0  ;;  %v139_v10 = vadd.f32 %v220_v29, %v138_v6 }
  0xd9   :  { %211 = vst.msk [vmem:[%s410_s3 + $0x60] sm:$0xff] %vm198_vm3, %v194_v3  ;;  %v197_v9 = vmax.f32 %v179_v5, 0.0  ;;  %v171_v11 = vadd.f32 %v220_v29, %v170_v7 }
  0xda   :  { %206 = vst.msk [vmem:[%s410_s3 + $0x38] sm:$0xff] %vm198_vm3, %v189_v8  ;;  %v187_v12 = vmax.f32 %v139_v10, 0.0 }
  0xdb   :  { %215 = vst.msk [vmem:[%s410_s3 + $0x78] sm:$0x3f] %vm214_vm4, %v197_v9  ;;  %v195_v13 = vmax.f32 %v171_v11, 0.0 }
  0xdc   :  { %204 = vst.msk [vmem:[%s410_s3 + $0x28] sm:$0xff] %vm198_vm3, %v187_v12 }
  0xdd   :  { %212 = vst.msk [vmem:[%s410_s3 + $0x68] sm:$0xff] %vm198_vm3, %v195_v13 }

// kernel: conformer_forward.3
= control target key start
LH: loop header
LB: loop body
LE: loop exit
PB: predicated region body
PF: predicated region fallthrough
CT: control target
= control target key end

     0   :  { %s7912_s3 = smov 1   ;;  %v7913_v44 = vmov 0.0   ;;  %vm7914_vm0 = vmmov 0   ;;  %vm608_vm1 = vcmask 785408   ;;  %s7915_s10 = smov 3   ;;  %vm896_vm2 = vcmask 261120   ;;  %s9263_s0 = inlined_call_operand.smem [shape: u32[38], index: -1, kind: input, shape index: {}] }
   0x1   :  { %s7973_s6 = sld [smem:[%s9263_s0 + %s7912_s3]]   ;;  %s7916_s14 = smov 2   ;;  %vm1199_vm3 = vcmask 64512   ;;  %vm1297_vm4 = vcmask 27648   ;;  %vm1328_vm5 = vcmask 1041408   ;;  %vm1324_vm6 = vcmask 31744  }
   0x2   :  { %s8002_s9 = sld [smem:[%s9263_s0]]   ;;  %s7917_s18 = smov 4   ;;  %vm1655_vm7 = vcmask 1043456   ;;  %vm2678_vm8 = vcmask 1040384   ;;  %vm2683_vm9 = vcmask 1042432   ;;  %vm5941_vm10 = vcmask 1044480  }
   0x3   :  { %s6370_s13 = sld [smem:[%s9263_s0 + %s7915_s10]]   ;;  %s7918_s22 = smov 7  }
   0x4   :  { %s6369_s17 = sld [smem:[%s9263_s0 + %s7916_s14]]   ;;  %s7919_s26 = smov 5  }
   0x5   :  { %s6371_s21 = sld [smem:[%s9263_s0 + %s7917_s18]]   ;;  %s7920_s30 = smov 6  }
   0x6   :  { %s8083_s25 = sld [smem:[%s9263_s0 + %s7918_s22]]   ;;  %s7921_s4 = smov 9  }
   0x7   :  { %v7618_v0 = vld [vmem:[%s7973_s6 + $0x78] sm:$0xff]   ;;  %v7622_v4 = vld [vmem:[%s7973_s6 + $0x70] sm:$0xff]   ;;  %v7626_v8 = vld [vmem:[%s7973_s6 + $0x68] sm:$0xff]   ;;  %s8092_s29 = sld [smem:[%s9263_s0 + %s7919_s26]]   ;;  %s7922_s8 = smov 8  }
   0x8   :  { %v7619_v1 = vld [vmem:[%s7973_s6 + $0x38] sm:$0xff]   ;;  %6797 = vmatprep.subr.bf16.mxu0 %v7618_v0  ;;  %v7623_v5 = vld [vmem:[%s7973_s6 + $0x30] sm:$0xff]   ;;  %v7627_v9 = vld [vmem:[%s7973_s6 + $0x28] sm:$0xff]   ;;  %s8097_s3 = sld [smem:[%s9263_s0 + %s7920_s30]]   ;;  %s7923_s12 = smov 10  }
   0x9   :  { %v7620_v2 = vld [vmem:[%s7973_s6 + $0xf8] sm:$0xff]   ;;  %6798 = vmatpush3.bf16.msra.mxu0 %v7619_v1  ;;  %v7624_v6 = vld [vmem:[%s7973_s6 + $0xf0] sm:$0xff]   ;;  %v7628_v10 = vld [vmem:[%s7973_s6 + $0xe8] sm:$0xff]   ;;  %s8107_s7 = sld [smem:[%s9263_s0 + %s7921_s4]]   ;;  %s7924_s16 = smov 13  }
   0xa   :  { %v7621_v3 = vld [vmem:[%s7973_s6 + $0xb8] sm:$0xff]   ;;  %6819 = vmatprep.subr.bf16.mxu1 %v7620_v2  ;;  %6799 = vmatprep.subr.bf16.mxu0 %v7622_v4  ;;  %v7625_v7 = vld [vmem:[%s7973_s6 + $0xb0] sm:$0xff]   ;;  %v7629_v11 = vld [vmem:[%s7973_s6 + $0xa8] sm:$0xff]   ;;  %s8128_s11 = sld [smem:[%s9263_s0 + %s7922_s8]]   ;;  %s7925_s20 = smov 11  }
   0xb   :  { %6820 = vmatpush3.bf16.msra.mxu1 %v7621_v3  ;;  %v7630_v12 = vld [vmem:[%s7973_s6 + $0x60] sm:$0xff]   ;;  %v7634_v16 = vld [vmem:[%s7973_s6 + $0x58] sm:$0xff]   ;;  %v7638_v20 = vld [vmem:[%s7973_s6 + $0x50] sm:$0xff]   ;;  %s8136_s15 = sld [smem:[%s9263_s0 + %s7923_s12]]   ;;  %s7926_s24 = smov 12  }
   0xc   :  { %6821 = vmatprep.subr.bf16.mxu1 %v7624_v6  ;;  %v7631_v13 = vld [vmem:[%s7973_s6 + $0x20] sm:$0xff]   ;;  %v7635_v17 = vld [vmem:[%s7973_s6 + $0x18] sm:$0xff]   ;;  %v7639_v21 = vld [vmem:[%s7973_s6 + $0x10] sm:$0xff]   ;;  %s8149_s19 = sld [smem:[%s9263_s0 + %s7924_s16]]   ;;  %s7927_s30 = smov 14  }
   0xd   :  { %6800 = vmatpush3.bf16.msra.mxu0 %v7623_v5  ;;  %v7632_v14 = vld [vmem:[%s7973_s6 + $0xe0] sm:$0xff]   ;;  %v7636_v18 = vld [vmem:[%s7973_s6 + $0xd8] sm:$0xff]   ;;  %v7640_v22 = vld [vmem:[%s7973_s6 + $0xd0] sm:$0xff]   ;;  %s8158_s23 = sld [smem:[%s9263_s0 + %s7925_s20]]   ;;  %s7928_s5 = smov 96  }
   0xe   :  { %6801 = vmatprep.subr.bf16.mxu0 %v7626_v8  ;;  %v7633_v15 = vld [vmem:[%s7973_s6 + $0xa0] sm:$0xff]   ;;  %v7637_v19 = vld [vmem:[%s7973_s6 + $0x98] sm:$0xff]   ;;  %v7641_v23 = vld [vmem:[%s7973_s6 + $0x90] sm:$0xff]   ;;  %s8163_s28 = sld [smem:[%s9263_s0 + %s7926_s24]]   ;;  %s9280_s8 = smov 88  }
   0xf   :  { %6822 = vmatpush3.bf16.msra.mxu1 %v7625_v7  ;;  %v7642_v24 = vld [vmem:[%s7973_s6 + $0x48] sm:$0xff]   ;;  %v7646_v28 = vld [vmem:[%s7973_s6 + $0x40] sm:$0xff]   ;;  %v7650_v36 = vld [vmem:[%s7973_s6 + $0x178] sm:$0xff]   ;;  %s8173_s4 = sld [smem:[%s9263_s0 + %s7927_s30]]   ;;  %s9276_s10 = smov 56  }
  0x10   :  { %6823 = vmatprep.subr.bf16.mxu1 %v7628_v10  ;;  %v7643_v25 = vld [vmem:[%s7973_s6 + $0x8] sm:$0xff]   ;;  %v7647_v29 = vld [vmem:[%s7973_s6] sm:$0xff]   ;;  %v158_v37 = vld [vmem:[%s8002_s9 + $0x18] sm:$0xff]  ;;  %s9274_s12 = smov 80   ;;  %s7935_s14 = smov 15  }
  0x11   :  { %6802 = vmatpush3.bf16.msra.mxu0 %v7627_v9  ;;  %v7644_v26 = vld [vmem:[%s7973_s6 + $0xc8] sm:$0xff]   ;;  %v7648_v30 = vld [vmem:[%s7973_s6 + $0xc0] sm:$0xff]   ;;  %v274_v38 = vpack.c.bf16 %v158_v37, %v158_v37  ;;  %v7651_v39 = vld [vmem:[%s7973_s6 + $0x138] sm:$0xff]   ;;  %s8256_s18 = sld [smem:[%s9263_s0 + %s7935_s14]]   ;;  %s9270_s20 = smov 48  }
  0x12   :  { %6803 = vmatprep.subr.bf16.mxu0 %v7630_v12  ;;  %v7645_v27 = vld [vmem:[%s7973_s6 + $0x88] sm:$0xff]   ;;  %v7649_v33 = vld [vmem:[%s7973_s6 + $0x80] sm:$0xff]   ;;  %v157_v40 = vld [vmem:[%s8002_s9 + $0x10] sm:$0xff]  ;;  %s9266_s22 = smov 104   ;;  %s9264_s24 = smov 40  }
  0x13   :  { %6824 = vmatpush3.bf16.msra.mxu1 %v7629_v11  ;;  %v156_v31 = vld [vmem:[%s8002_s9 + $0x8] sm:$0xff]  ;;  %v155_v34 = vld [vmem:[%s8002_s9] sm:$0xff]  ;;  %684 = vmatprep.mubr.bf16.mxu1 %v274_v38  ;;  %v273_v41 = vpack.c.bf16 %v157_v40, %v157_v40  ;;  %v7652_v42 = vld [vmem:[%s7973_s6 + $0x170] sm:$0xff]   ;;  %s7940_s26 = smov 16   ;;  %s7941_s2 = smov 19  }
  0x14   :  { %6825 = vmatprep.subr.bf16.mxu1 %v7632_v14  ;;  %v272_v32 = vpack.c.bf16 %v156_v31, %v156_v31  ;;  %v271_v35 = vpack.c.bf16 %v155_v34, %v155_v34  ;;  %v7653_v43 = vld [vmem:[%s7973_s6 + $0x130] sm:$0xff]   ;;  %v7654_v45 = vld [vmem:[%s7973_s6 + $0x168] sm:$0xff]   ;;  %v7657_v48 = vld [vmem:[%s7973_s6 + $0x160] sm:$0xff]   ;;  %s8364_s1 = sld [smem:[%s9263_s0 + %s7940_s26]]   ;;  %s7942_s26 = smov 17  }
  0x15   :  { %6804 = vmatpush3.bf16.msra.mxu0 %v7631_v13  ;;  %v7655_v46 = vld [vmem:[%s7973_s6 + $0x128] sm:$0xff]   ;;  %v7659_v49 = vld [vmem:[%s7973_s6 + $0x1a0] sm:$0xff]   ;;  %v7660_v51 = vld [vmem:[%s7973_s6 + $0x158] sm:$0xff]   ;;  %s7943_s14 = smov 18   ;;  %s7948_s30 = smov 23  }
  0x16   :  { %6805 = vmatprep.subr.bf16.mxu0 %v7634_v16  ;;  %644 = vmatprep.mubr.bf16.mxu0 %v272_v32  ;;  %v7656_v47 = vld [vmem:[%s7973_s6 + $0x1a8] sm:$0xff]   ;;  %v7658_v50 = vld [vmem:[%s7973_s6 + $0x120] sm:$0xff]   ;;  %v7662_v52 = vld [vmem:[%s7973_s6 + $0x198] sm:$0xff]   ;;  %s8530_s27 = sld [smem:[%s9263_s0 + %s7948_s30]]   ;;  %s7949_s30 = smov 25  }
  0x17   :  { %6826 = vmatpush3.bf16.msra.mxu1 %v7633_v15  ;;  %v7661_v53 = vld [vmem:[%s7973_s6 + $0x118] sm:$0xff]   ;;  %v7663_v54 = vld [vmem:[%s7973_s6 + $0x150] sm:$0xff]   ;;  %v7666_v57 = vld [vmem:[%s7973_s6 + $0x148] sm:$0xff]   ;;  %s9293_s16 = smov 40  }
  0x18   :  { %6827 = vmatprep.subr.bf16.mxu1 %v7636_v18  ;;  %v7665_v55 = vld [vmem:[%s7973_s6 + $0x190] sm:$0xff]   ;;  %v7668_v58 = vld [vmem:[%s7973_s6 + $0x188] sm:$0xff]   ;;  %v7669_v62 = vld [vmem:[%s7973_s6 + $0x140] sm:$0xff]  }
  0x19   :  { %6806 = vmatpush3.bf16.msra.mxu0 %v7635_v17  ;;  %v7664_v56 = vld [vmem:[%s7973_s6 + $0x110] sm:$0xff]   ;;  %v160_v59 = vld [vmem:[%s8002_s9 + $0x28] sm:$0xff]  ;;  %v7671_v63 = vld [vmem:[%s7973_s6 + $0x180] sm:$0xff]  }
  0x1a   :  { %6807 = vmatprep.subr.bf16.mxu0 %v7638_v20  ;;  %v7667_v60 = vld [vmem:[%s7973_s6 + $0x108] sm:$0xff]   ;;  %v276_v61 = vpack.c.bf16 %v160_v59, %v160_v59  ;;  %v161_v0 = vld [vmem:[%s8002_s9 + $0x30] sm:$0xff]  ;;  %v7670_v1 = vld [vmem:[%s7973_s6 + $0x100] sm:$0xff]   ;;  %s9282_s6 = smov 64  }
  0x1b   :  { %6828 = vmatpush3.bf16.msra.mxu1 %v7637_v19  ;;  %v159_v2 = vld [vmem:[%s8002_s9 + $0x20] sm:$0xff]  ;;  %v277_v3 = vpack.c.bf16 %v161_v0, %v161_v0  ;;  %v7672_v5 = vld [vmem:[%s6370_s13 + $0x28] sm:$0xff]   ;;  %v7674_v7 = vld [vmem:[%s6370_s13 + $0x18] sm:$0xff]   ;;  %s9278_s9 = smov 120  }
  0x1c   :  { %6829 = vmatprep.subr.bf16.mxu1 %v7640_v22  ;;  %v275_v4 = vpack.c.bf16 %v159_v2, %v159_v2  ;;  %v7673_v6 = vld [vmem:[%s6370_s13 + $0x20] sm:$0xff]   ;;  %v7675_v8 = vld [vmem:[%s6370_s13 + $0x10] sm:$0xff]   ;;  %v7676_v9 = vld [vmem:[%s6370_s13 + $0x8] sm:$0xff]  }
  0x1d   :  { %6808 = vmatpush3.bf16.msra.mxu0 %v7639_v21  ;;  %v7677_v10 = vld [vmem:[%s6370_s13] sm:$0xff]   ;;  %v7682_v0 = vld [vmem:[%s8107_s7 + $0x28] sm:$0xff]   ;;  %v7684_v2 = vld [vmem:[%s8107_s7 + $0x18] sm:$0xff]   ;;  %s9272_s13 = smov 112  }
  0x1e   :  { %6809 = vmatprep.subr.bf16.mxu0 %v7642_v24  ;;  %v6405_v20 = vld [vmem:[%s6369_s17] ss:$0 sm:$0xff]  ;;  %s8377_s17 = sld [smem:[%s9263_s0 + %s7941_s2]]  }
  0x1f   :  { %6830 = vmatpush3.bf16.msra.mxu1 %v7641_v23  ;;  %v6461_v37 = vld [vmem:[%s6371_s21] ss:$0 sm:$0xff]  ;;  %s9268_s21 = smov 72   ;;  %s8386_s2 = sld [smem:[%s9263_s0 + %s7942_s26]]  }
  0x20   :  { %6831 = vmatprep.subr.bf16.mxu1 %v7644_v26  ;;  %s7944_s26 = smov 20  }
  0x21   :  { %6810 = vmatpush3.bf16.msra.mxu0 %v7643_v25 }
  0x22   :  { %6811 = vmatprep.subr.bf16.mxu0 %v7646_v28 }
  0x23   :  { %6832 = vmatpush3.bf16.msra.mxu1 %v7645_v27 }
  0x24   :  { %6833 = vmatprep.subr.bf16.mxu1 %v7648_v30 }
  0x25   :  { %6812 = vmatpush3.bf16.msra.mxu0 %v7647_v29 }
  0x26   :  { %6841 = vmatprep.subr.bf16.mxu0 %v7650_v36 }
  0x27   :  { %6834 = vmatpush3.bf16.msra.mxu1 %v7649_v33 }
  0x28   :  { %645 = vmatmul.mubr.bf16.vlgmr.msra.gmra.mxu0 %v271_v35  ;;  %7053 = vmatprep.subr.bf16.mxu1 %v7913_v44 }
  0x29   :  { %6842 = vmatpush3.bf16.msra.mxu0 %v7651_v39  ;;  %724 = vmatprep.mubr.bf16.mxu0 %v276_v61 }
  0x2a   :  { %685 = vmatmul.mubr.bf16.vlgmr.msra.gmra.mxu1 %v273_v41  ;;  %6843 = vmatprep.subr.bf16.mxu0 %v7652_v42 }
  0x2b   :  { %7065 = vmatprep.mubr.msk.bf16.mxu1 %vm7914_vm0, %v7913_v44  ;;  %7054 = vmatpush3.bf16.msra.mxu1 %v7656_v47 }
  0x2c   :  { %7055 = vmatprep.subr.bf16.mxu1 %v7913_v44 }
  0x2d   :  { %6844 = vmatpush3.bf16.msra.mxu0 %v7653_v43 }
  0x2e   :  { %6845 = vmatprep.subr.bf16.mxu0 %v7654_v45 }
  0x2f   :  { %7056 = vmatpush3.bf16.msra.mxu1 %v7659_v49 }
  0x30   :  { %7057 = vmatprep.subr.bf16.mxu1 %v7913_v44 }
  0x31   :  { %6846 = vmatpush3.bf16.msra.mxu0 %v7655_v46 }
  0x32   :  { %6847 = vmatprep.subr.bf16.mxu0 %v7657_v48 }
  0x33   :  { %7058 = vmatpush3.bf16.msra.mxu1 %v7662_v52 }
  0x34   :  { %7059 = vmatprep.subr.bf16.mxu1 %v7913_v44 }
  0x35   :  { %6848 = vmatpush3.bf16.msra.mxu0 %v7658_v50  ;;  %v7678_v50 = vld [vmem:[%s8083_s25 + $0x8] sm:$0xff]  }
  0x36   :  { %6849 = vmatprep.subr.bf16.mxu0 %v7660_v51  ;;  %v7679_v51 = vld [vmem:[%s8083_s25] sm:$0xff]  }
  0x37   :  { %7060 = vmatpush3.bf16.msra.mxu1 %v7665_v55 }
  0x38   :  { %7061 = vmatprep.subr.bf16.mxu1 %v7913_v44 }
  0x39   :  { %6850 = vmatpush3.bf16.msra.mxu0 %v7661_v53 }
  0x3a   :  { %6851 = vmatprep.subr.bf16.mxu0 %v7663_v54 }
  0x3b   :  { %7062 = vmatpush3.bf16.msra.mxu1 %v7668_v58  ;;  %v6470_v58 = vld [vmem:[%s8097_s3] ss:$0 sm:$0xff] }
  0x3c   :  { %7063 = vmatprep.subr.bf16.mxu1 %v7913_v44 }
  0x3d   :  { %6852 = vmatpush3.bf16.msra.mxu0 %v7664_v56  ;;  %v6469_v56 = vld [vmem:[%s8092_s29] ss:$0 sm:$0xff] }
  0x3e   :  { %6853 = vmatprep.subr.bf16.mxu0 %v7666_v57 }
  0x3f   :  { %7064 = vmatpush3.bf16.msra.mxu1 %v7671_v63  ;;  %v7681_v63 = vld [vmem:[%s8107_s7 + $0x30] sm:$0xff]  }
  0x40   :  { %7069 = vmatprep.subr.bf16.mxu1 %v7913_v44 }
  0x41   :  { %6854 = vmatpush3.bf16.msra.mxu0 %v7667_v60 }
  0x42   :  { %6855 = vmatprep.subr.bf16.mxu0 %v7669_v62  ;;  %7066 = vmatmul.mubr.msk.bf16.vlgmr.msra.gmra.mxu1 %vm608_vm1, %v277_v3  ;;  %v7680_v62 = vld [vmem:[%s8107_s7 + $0x38] sm:$0xff]   ;;  %v7685_v3 = vld [vmem:[%s8107_s7 + $0x10] sm:$0xff]  }
  0x43   :  { %7081 = vmatprep.mubr.msk.bf16.mxu1 %vm7914_vm0, %v7913_v44  ;;  %7070 = vmatpush3.bf16.msra.mxu1 %v7672_v5  ;;  %v7687_v5 = vld [vmem:[%s8107_s7] sm:$0xff]  }
  0x44   :  { %7071 = vmatprep.subr.bf16.mxu1 %v7913_v44 }
  0x45   :  { %6856 = vmatpush3.bf16.msra.mxu0 %v7670_v1  ;;  %v7683_v1 = vld [vmem:[%s8107_s7 + $0x20] sm:$0xff]  }
  0x46   :  { %7085 = vmatprep.subr.bf16.mxu0 %v7913_v44 }
  0x47   :  { %7072 = vmatpush3.bf16.msra.mxu1 %v7673_v6  ;;  %v6471_v6 = vld [vmem:[%s8128_s11] ss:$0 sm:$0xff] }
  0x48   :  { %725 = vmatmul.mubr.bf16.vlgmr.msra.gmra.mxu0 %v275_v4  ;;  %7073 = vmatprep.subr.bf16.mxu1 %v7913_v44  ;;  %v7686_v4 = vld [vmem:[%s8107_s7 + $0x8] sm:$0xff]  }
  0x49   :  { %7089 = vmatprep.mubr.msk.bf16.mxu0 %vm7914_vm0, %v7913_v44  ;;  %7086 = vmatpush3.bf16.msra.mxu0 %v7678_v50 }
  0x4a   :  { %7087 = vmatprep.subr.bf16.mxu0 %v7913_v44 }
  0x4b   :  { %7074 = vmatpush3.bf16.msra.mxu1 %v7674_v7 }
  0x4c   :  { %7075 = vmatprep.subr.bf16.mxu1 %v7913_v44 }
  0x4d   :  { %7088 = vmatpush3.bf16.msra.mxu0 %v7679_v51 }
  0x4e   :  { %7093 = vmatprep.subr.bf16.mxu0 %v7913_v44 }
  0x4f   :  { %7076 = vmatpush3.bf16.msra.mxu1 %v7675_v8 }
  0x50   :  { %7077 = vmatprep.subr.bf16.mxu1 %v7913_v44 }
  0x53   :  { %7078 = vmatpush3.bf16.msra.mxu1 %v7676_v9 }
  0x54   :  { %7079 = vmatprep.subr.bf16.mxu1 %v7913_v44 }
  0x57   :  { %7080 = vmatpush3.bf16.msra.mxu1 %v7677_v10 }
  0x58   :  { %7113 = vmatprep.subr.bf16.mxu1 %v7913_v44 }
  0xe8   :  { %v6813_v11 = vpop.f32.mrf.mxu0 }
  0xea   :  { %v6814_v12 = vpop.f32.mrf.mxu0  ;;  %v6835_v13 = vpop.f32.mrf.mxu1 }
  0xeb   :  { %v6815_v19 = vadd.f32 %v6814_v12, %v6813_v11 }
  0xec   :  { %v6816_v14 = vpop.f32.mrf.mxu0  ;;  %v6836_v15 = vpop.f32.mrf.mxu1 }
  0xed   :  { %v647_v22 = vadd.f32 %v6815_v19, %v6405_v20  ;;  %v6837_v23 = vadd.f32 %v6836_v15, %v6835_v13 }
  0xee   :  { %v6817_v16 = vpop.f32.mrf.mxu0  ;;  %v6838_v17 = vpop.f32.mrf.mxu1 }
  0xef   :  { %v687_v28 = vadd.f32 %v6837_v23, %v647_v22 }
  0xf0   :  { %v6839_v18 = vpop.f32.mrf.mxu1 }
  0xf1   :  { %v6476_v18 = vld [vmem:[%s8136_s15] ss:$0 sm:$0xff] }
 0x102   :  { %v766_v21 = vpop.f32.mrf.mxu1 }
 0x104   :  { %v7067_v25 = vpop.f32.mrf.mxu1 }
 0x106   :  { %v769_v27 = vpop.f32.mrf.mxu1 }
 0x108   :  { %v6857_v24 = vpop.f32.mrf.mxu0  ;;  %v7068_v31 = vpop.f32.mrf.mxu1 }
 0x10a   :  { %v6858_v26 = vpop.f32.mrf.mxu0 }
 0x10b   :  { %v6859_v29 = vadd.f32 %v6858_v26, %v6857_v24 }
 0x10c   :  { %v6860_v30 = vpop.f32.mrf.mxu0 }
 0x10d   :  { %v727_v32 = vadd.f32 %v6859_v29, %v687_v28 }
 0x10e   :  { %v6861_v33 = vpop.f32.mrf.mxu0 }
 0x10f   :  { %v767_v34 = vadd.f32 %v766_v21, %v727_v32  ;;  %v7688_v32 = vld [vmem:[%s8149_s19 + $0x8] sm:$0xff]   ;;  %v7689_v33 = vld [vmem:[%s8149_s19] sm:$0xff]  }
 0x111   :  { %v772_v35 = vmax.f32 %v767_v34, 0.0 }
 0x113   :  { %v786_v36 = vpack.c.bf16 %v772_v35, %v772_v35 }
 0x115   :  { %7082 = vmatmul.mubr.msk.bf16.vlgmr.msra.gmra.mxu1 %vm608_vm1, %v786_v36 }
 0x116   :  { %7117 = vmatprep.mubr.msk.bf16.mxu1 %vm7914_vm0, %v7913_v44  ;;  %7114 = vmatpush3.bf16.msra.mxu1 %v7688_v32 }
 0x117   :  { %7115 = vmatprep.subr.bf16.mxu1 %v7913_v44 }
 0x11a   :  { %7116 = vmatpush3.bf16.msra.mxu1 %v7689_v33 }
 0x11b   :  { %7121 = vmatprep.subr.bf16.mxu1 %v7913_v44 }
 0x1d5   :  { %v866_v38 = vpop.f32.mrf.mxu1 }
 0x1d6   :  { %v8074_v39 = vadd.f32 %v6461_v37, %v866_v38  ;;  %v6485_v38 = vld [vmem:[%s8158_s23] ss:$0 sm:$0xff] }
 0x1d7   :  { %v7083_v40 = vpop.f32.mrf.mxu1 }
 0x1d8   :  { %v897_v41 = vsel %vm896_vm2, %v8074_v39, 0.0  ;;  %v6486_v40 = vld [vmem:[%s8163_s28] ss:$0 sm:$0xff] }
 0x1d9   :  { %898 = vadd.xlane.f32.xlu0 %v897_v41  ;;  %v869_v42 = vpop.f32.mrf.mxu1 }
 0x1db   :  { %v7084_v43 = vpop.f32.mrf.mxu1 }
 0x262   :  { %v899_v45 = vpop.xlane.xlu0 %898 }
 0x263   :  { %v901_v46 = vmul.f32 0.03125, %v899_v45  ;;  %v6487_v45 = vld [vmem:[%s8173_s4] ss:$0 sm:$0xff] }
 0x265   :  { %v902_v47 = vsub.f32 %v8074_v39, %v901_v46 }
 0x267   :  { %v903_v48 = vmul.f32 %v902_v47, %v902_v47 }
 0x269   :  { %v904_v49 = vsel %vm896_vm2, %v903_v48, 0.0 }
 0x26a   :  { %905 = vadd.xlane.f32.xlu0 %v904_v49 }
 0x2f3   :  { %v906_v52 = vpop.xlane.xlu0 %905 }
 0x2f4   :  { %v907_v53 = vmul.f32 0.03125, %v906_v52 }
 0x2f6   :  { %v908_v54 = vadd.f32 1e-05, %v907_v53 }
 0x2f8   :  { %7740 = vrsqrt.f32 %v908_v54 }
 0x305   :  { %v7741_v55 = vpop.eup %7740 }
 0x306   :  { %v910_v57 = vmul.f32 %v7741_v55, %v902_v47 }
 0x308   :  { %v917_v59 = vmul.f32 %v6469_v56, %v910_v57 }
 0x30a   :  { %v924_v60 = vadd.f32 %v6470_v58, %v917_v59 }
 0x30c   :  { %v925_v61 = vpack.c.bf16 %v924_v60, %v924_v60 }
 0x30e   :  { %7090 = vmatmul.mubr.msk.bf16.vlgmr.msra.gmra.mxu0 %vm896_vm2, %v925_v61 }
 0x30f   :  { %7109 = vmatprep.mubr.msk.bf16.mxu0 %vm7914_vm0, %v7913_v44  ;;  %7094 = vmatpush3.bf16.msra.mxu0 %v7680_v62 }
 0x310   :  { %7095 = vmatprep.subr.bf16.mxu0 %v7913_v44 }
 0x313   :  { %7096 = vmatpush3.bf16.msra.mxu0 %v7681_v63 }
 0x314   :  { %7097 = vmatprep.subr.bf16.mxu0 %v7913_v44 }
 0x317   :  { %7098 = vmatpush3.bf16.msra.mxu0 %v7682_v0 }
 0x318   :  { %7099 = vmatprep.subr.bf16.mxu0 %v7913_v44 }
 0x31b   :  { %7100 = vmatpush3.bf16.msra.mxu0 %v7683_v1 }
 0x31c   :  { %7101 = vmatprep.subr.bf16.mxu0 %v7913_v44 }
 0x31f   :  { %7102 = vmatpush3.bf16.msra.mxu0 %v7684_v2 }
 0x320   :  { %7103 = vmatprep.subr.bf16.mxu0 %v7913_v44 }
 0x323   :  { %7104 = vmatpush3.bf16.msra.mxu0 %v7685_v3 }
 0x324   :  { %7105 = vmatprep.subr.bf16.mxu0 %v7913_v44 }
 0x327   :  { %7106 = vmatpush3.bf16.msra.mxu0 %v7686_v4 }
 0x328   :  { %7107 = vmatprep.subr.bf16.mxu0 %v7913_v44 }
 0x32b   :  { %7108 = vmatpush3.bf16.msra.mxu0 %v7687_v5 }
 0x32c   :  { %7133 = vmatprep.subr.bf16.mxu0 %v7913_v44 }
 0x3ce   :  { %v981_v7 = vpop.f32.mrf.mxu0 }
 0x3cf   :  { %v982_v8 = vadd.f32 %v6471_v6, %v981_v7 }
 0x3d0   :  { %v7091_v9 = vpop.f32.mrf.mxu0 }
 0x3d1   :  { %v6475_v10 = vmul.f32 -1.442695, %v982_v8 }
 0x3d2   :  { %v984_v11 = vpop.f32.mrf.mxu0 }
 0x3d3   :  { %7742 = vpow2.f32 %v6475_v10 }
 0x3d4   :  { %v7092_v12 = vpop.f32.mrf.mxu0 }
 0x3e0   :  { %v7743_v13 = vpop.eup %7742 }
 0x3e1   :  { %v990_v14 = vadd.f32 1.0, %v7743_v13 }
 0x3e3   :  { %7744 = vrcp.f32 %v990_v14 }
 0x3f0   :  { %v7745_v15 = vpop.eup %7744 }
 0x3f1   :  { %v993_v16 = vmul.f32 %v7745_v15, %v982_v8 }
 0x3f3   :  { %v994_v17 = vpack.c.bf16 %v993_v16, %v993_v16 }
 0x3f5   :  { %7110 = vmatmul.mubr.bf16.vlgmr.msra.gmra.mxu0 %v994_v17 }
 0x3f6   :  { %7135 = vmatprep.mubr.msk.bf16.mxu0 %vm7914_vm0, %v7913_v44 }
 0x4b5   :  { %v1083_v19 = vpop.f32.mrf.mxu0 }
 0x4b6   :  { %v1084_v20 = vadd.f32 %v6476_v18, %v1083_v19 }
 0x4b7   :  { %v7111_v21 = vpop.f32.mrf.mxu0 }
 0x4b8   :  { %v1089_v22 = vmul.f32 0.5, %v1084_v20 }
 0x4b9   :  { %v1086_v23 = vpop.f32.mrf.mxu0 }
 0x4ba   :  { %v8140_v24 = vadd.f32 %v1089_v22, %v8074_v39 }
 0x4bb   :  { %v7112_v25 = vpop.f32.mrf.mxu0 }
 0x4bc   :  { %v1093_v26 = vsel %vm896_vm2, %v8140_v24, 0.0 }
 0x4bd   :  { %1094 = vadd.xlane.f32.xlu1 %v1093_v26 }
 0x546   :  { %v1095_v27 = vpop.xlane.xlu1 %1094 }
 0x547   :  { %v1096_v28 = vmul.f32 0.03125, %v1095_v27 }
 0x549   :  { %v1097_v29 = vsub.f32 %v8140_v24, %v1096_v28 }
 0x54b   :  { %v1098_v30 = vmul.f32 %v1097_v29, %v1097_v29 }
 0x54d   :  { %v1099_v31 = vsel %vm896_vm2, %v1098_v30, 0.0 }
 0x54e   :  { %1100 = vadd.xlane.f32.xlu1 %v1099_v31 }
 0x5d7   :  { %v1101_v34 = vpop.xlane.xlu1 %1100 }
 0x5d8   :  { %v1102_v35 = vmul.f32 0.03125, %v1101_v34 }
 0x5da   :  { %v1103_v36 = vadd.f32 1e-05, %v1102_v35 }
 0x5dc   :  { %7746 = vrsqrt.f32 %v1103_v36 }
 0x5e9   :  { %v7747_v37 = vpop.eup %7746 }
 0x5ea   :  { %v1105_v39 = vmul.f32 %v7747_v37, %v1097_v29 }
 0x5ec   :  { %v1112_v41 = vmul.f32 %v6485_v38, %v1105_v39 }
 0x5ee   :  { %v1119_v42 = vadd.f32 %v6486_v40, %v1112_v41 }
 0x5f0   :  { %v1125_v43 = vpack.c.bf16 %v1119_v42, %v1119_v42 }
 0x5f2   :  { %7118 = vmatmul.mubr.msk.bf16.vlgmr.msra.gmra.mxu1 %vm896_vm2, %v1125_v43 }
 0x5f3   :  { %7123 = vmatprep.mubr.msk.bf16.mxu1 %vm7914_vm0, %v7913_v44 }
 0x6b2   :  { %v1181_v46 = vpop.f32.mrf.mxu1 }
 0x6b3   :  { %v1182_v47 = vadd.f32 %v6487_v45, %v1181_v46 }
 0x6b4   :  { %v7119_v48 = vpop.f32.mrf.mxu1 }
 0x6b5   :  { %v1188_v49 = vcombine.high %v1182_v47, %v1182_v47  ;;  %v8176_v50 = vpack.c.bf16 %v1182_v47, %v1182_v47 }
 0x6b6   :  { %v1184_v51 = vpop.f32.mrf.mxu1 }
 0x6b7   :  { %v8178_v52 = vpack.c.bf16 %v1188_v49, %v1188_v49  ;;  %1197 = vrot.lane.b32.xlu0 %v8176_v50, %s7928_s5 }
 0x6b8   :  { %v7120_v53 = vpop.f32.mrf.mxu1 }
 0x6b9   :  { %1247 = vrot.lane.b32.xlu1 %v8178_v52, %s7928_s5 }
 0x729   :  { %v1198_v54 = vpop.permute.xlu0 %1197 }
 0x72a   :  { %v1204_v55 = vsel %vm1199_vm3, %v1198_v54, 0 }
 0x72b   :  { %7122 = vmatpush3.bf16.xpose.msra.mxu1 %v1204_v55  ;;  %v1248_v56 = vpop.permute.xlu1 %1247 }
 0x72c   :  { %7127 = vmatprep.subr.bf16.mxu1 %v7913_v44  ;;  %v1253_v57 = vsel %vm1199_vm3, %v1248_v56, 0 }
 0x732   :  { %7124 = vmatmul.mubr.msk.bf16.vlgmr.msra.gmra.mxu1 %vm1199_vm3, %v8176_v50 }
 0x733   :  { %7128 = vmatpush3.bf16.xpose.msra.mxu1 %v1253_v57  ;;  %7129 = vmatprep.mubr.msk.bf16.mxu1 %vm7914_vm0, %v7913_v44 }
 0x734   :  { %7139 = vmatprep.subr.bf16.mxu1 %v7913_v44 }
 0x73a   :  { %7130 = vmatmul.mubr.msk.bf16.vlgmr.msra.gmra.mxu1 %vm1199_vm3, %v8178_v52 }
 0x73b   :  { %7141 = vmatprep.mubr.msk.bf16.mxu1 %vm7914_vm0, %v7913_v44 }
 0x7f2   :  { %v1240_v58 = vpop.f32.mrf.mxu1 }
 0x7f3   :  { %v1295_v59 = vmul.f32 0.35355338, %v1240_v58 }
 0x7f4   :  { %v7125_v60 = vpop.f32.mrf.mxu1 }
 0x7f5   :  { %v1298_v61 = vsel %vm1297_vm4, %v1295_v59, -inf }
 0x7f6   :  { %1299 = vmax.xlane.f32.xlu1 %v1298_v61  ;;  %v1243_v62 = vpop.f32.mrf.mxu1 }
 0x7f8   :  { %v7126_v63 = vpop.f32.mrf.mxu1 }
 0x7fa   :  { %v1289_v0 = vpop.f32.mrf.mxu1 }
 0x7fb   :  { %v1296_v1 = vmul.f32 0.35355338, %v1289_v0 }
 0x7fc   :  { %v7131_v2 = vpop.f32.mrf.mxu1 }
 0x7fd   :  { %v1301_v3 = vsel %vm1297_vm4, %v1296_v1, -inf }
 0x7fe   :  { %1302 = vmax.xlane.f32.xlu0 %v1301_v3  ;;  %v1292_v4 = vpop.f32.mrf.mxu1 }
 0x800   :  { %v7132_v5 = vpop.f32.mrf.mxu1 }
 0x807   :  { %1372 = vrot.lane.b32.xlu1 %v8178_v52, %s9282_s6 }
 0x80b   :  { %1427 = vrot.lane.b32.xlu1 %v8176_v50, %s9280_s8 }
 0x87f   :  { %v1300_v6 = vpop.xlane.xlu1 %1299 }
 0x880   :  { %v1304_v7 = vsub.f32 %v1295_v59, %v1300_v6 }
 0x882   :  { %v1306_v8 = vmul.f32 1.442695, %v1304_v7 }
 0x883   :  { %v1373_v9 = vpop.permute.xlu1 %1372 }
 0x884   :  { %7748 = vpow2.f32 %v1306_v8  ;;  %v1378_v10 = vsel %vm1328_vm5, %v1373_v9, 0 }
 0x885   :  { %7140 = vmatpush3.bf16.msra.mxu1 %v1378_v10 }
 0x886   :  { %7151 = vmatprep.subr.bf16.mxu1 %v7913_v44 }
 0x887   :  { %v1303_v11 = vpop.xlane.xlu0 %1302  ;;  %v1428_v19 = vpop.permute.xlu1 %1427 }
 0x888   :  { %v1305_v12 = vsub.f32 %v1296_v1, %v1303_v11  ;;  %v1433_v27 = vsel %vm1199_vm3, %v1428_v19, 0 }
 0x88a   :  { %v1308_v13 = vmul.f32 1.442695, %v1305_v12 }
 0x88c   :  { %7750 = vpow2.f32 %v1308_v13 }
 0x891   :  { %v7749_v14 = vpop.eup %7748 }
 0x892   :  { %v1310_v15 = vsel %vm1297_vm4, %v7749_v14, 0.0 }
 0x893   :  { %1311 = vadd.xlane.f32.xlu0 %v1310_v15  ;;  %v1190_v15 = vld [vmem:[%s8256_s18] sm:$0xf] }
 0x899   :  { %v7751_v16 = vpop.eup %7750 }
 0x89a   :  { %v1313_v17 = vsel %vm1297_vm4, %v7751_v16, 0.0 }
 0x89b   :  { %1314 = vadd.xlane.f32.xlu1 %v1313_v17 }
 0x8a9   :  { %1322 = vrot.lane.b32.xlu0 %v8176_v50, %s9282_s6 }
 0x8ac   :  { %1477 = vrot.lane.b32.xlu1 %v8178_v52, %s9280_s8  ;;  %s9288_s8 = smov 80  }
 0x8ad   :  { %1425 = vrot.lane.b32.xlu0 %v8176_v50, %s9278_s9 }
 0x8b0   :  { %1475 = vrot.lane.b32.xlu1 %v8178_v52, %s9278_s9  ;;  %s9289_s9 = smov 112  }
 0x91c   :  { %v1312_v18 = vpop.xlane.xlu0 %1311 }
 0x91d   :  { %7752 = vrcp.f32 %v1312_v18  ;;  %v1703_v18 = vsel %vm1655_vm7, %v1190_v15, 0 }
 0x920   :  { %v1323_v20 = vpop.permute.xlu0 %1322 }
 0x921   :  { %v1330_v21 = vsel %vm1328_vm5, %v1323_v20, 0 }
 0x922   :  { %7134 = vmatpush3.bf16.msra.mxu0 %v1330_v21 }
 0x923   :  { %7145 = vmatprep.subr.bf16.mxu0 %v7913_v44 }
 0x924   :  { %v1315_v22 = vpop.xlane.xlu1 %1314  ;;  %v1426_v32 = vpop.permute.xlu0 %1425 }
 0x925   :  { %7754 = vrcp.f32 %v1315_v22 }
 0x928   :  { %v1478_v30 = vpop.permute.xlu1 %1477 }
 0x929   :  { %v1483_v33 = vsel %vm1199_vm3, %v1478_v30, 0 }
 0x92a   :  { %v7753_v23 = vpop.eup %7752 }
 0x92b   :  { %v1318_v25 = vmul.f32 %v7753_v23, %v7749_v14 }
 0x92c   :  { %v1476_v34 = vpop.permute.xlu1 %1475 }
 0x92d   :  { %v1320_v26 = vpack.c.bf16 %v1318_v25, %v1318_v25  ;;  %v1191_v25 = vld [vmem:[%s8256_s18 + $0x4] sm:$0xf] }
 0x92f   :  { %7136 = vmatmul.mubr.msk.bf16.vlgmr.msra.gmra.mxu0 %vm1324_vm6, %v1320_v26  ;;  %v1657_v26 = vsel %vm1655_vm7, %v1191_v25, 0 }
 0x930   :  { %7146 = vmatpush3.bf16.xpose.msra.mxu0 %v1433_v27  ;;  %7147 = vmatprep.mubr.msk.bf16.mxu0 %vm7914_vm0, %v7913_v44 }
 0x931   :  { %7157 = vmatprep.subr.bf16.mxu0 %v7913_v44 }
 0x932   :  { %v7755_v28 = vpop.eup %7754 }
 0x933   :  { %v1319_v29 = vmul.f32 %v7755_v28, %v7751_v16 }
 0x935   :  { %v1321_v31 = vpack.c.bf16 %v1319_v29, %v1319_v29 }
 0x937   :  { %7142 = vmatmul.mubr.msk.bf16.vlgmr.msra.gmra.mxu1 %vm1324_vm6, %v1321_v31  ;;  %7148 = vmatmul.mubr.msk.bf16.vlgmr.msra.gmra.mxu0 %vm1199_vm3, %v1426_v32 }
 0x938   :  { %7152 = vmatpush3.bf16.xpose.msra.mxu1 %v1483_v33  ;;  %7153 = vmatprep.mubr.msk.bf16.mxu1 %vm7914_vm0, %v7913_v44 }
 0x939   :  { %7163 = vmatprep.subr.bf16.mxu1 %v7913_v44  ;;  %7159 = vmatprep.mubr.msk.bf16.mxu0 %vm7914_vm0, %v7913_v44 }
 0x93f   :  { %7154 = vmatmul.mubr.msk.bf16.vlgmr.msra.gmra.mxu1 %vm1199_vm3, %v1476_v34 }
 0x940   :  { %7165 = vmatprep.mubr.msk.bf16.mxu1 %vm7914_vm0, %v7913_v44 }
 0x9ef   :  { %v1366_v35 = vpop.f32.mrf.mxu0 }
 0x9f1   :  { %v7137_v36 = vpop.f32.mrf.mxu0 }
 0x9f3   :  { %v1369_v37 = vpop.f32.mrf.mxu0 }
 0x9f5   :  { %v7138_v38 = vpop.f32.mrf.mxu0 }
 0x9f7   :  { %v1414_v39 = vpop.f32.mrf.mxu1  ;;  %v1469_v40 = vpop.f32.mrf.mxu0 }
 0x9f8   :  { %v8232_v41 = vcombine.low %v1366_v35, %v1414_v39  ;;  %v1525_v42 = vmul.f32 0.35355338, %v1469_v40 }
 0x9f9   :  { %v7143_v43 = vpop.f32.mrf.mxu1  ;;  %v7149_v45 = vpop.f32.mrf.mxu0 }
 0x9fa   :  { %v1527_v46 = vsel %vm1297_vm4, %v1525_v42, -inf  ;;  %v1424_v21 = vpack.c.bf16 %v8232_v41, %v8232_v41 }
 0x9fb   :  { %1528 = vmax.xlane.f32.xlu0 %v1527_v46  ;;  %v1417_v47 = vpop.f32.mrf.mxu1  ;;  %v1472_v48 = vpop.f32.mrf.mxu0 }
 0x9fd   :  { %v7144_v49 = vpop.f32.mrf.mxu1  ;;  %v7150_v51 = vpop.f32.mrf.mxu0 }
 0x9ff   :  { %v1519_v53 = vpop.f32.mrf.mxu1 }
 0xa00   :  { %v1526_v54 = vmul.f32 0.35355338, %v1519_v53 }
 0xa01   :  { %v7155_v55 = vpop.f32.mrf.mxu1 }
 0xa02   :  { %v1530_v56 = vsel %vm1297_vm4, %v1526_v54, -inf }
 0xa03   :  { %1531 = vmax.xlane.f32.xlu1 %v1530_v56  ;;  %v1522_v57 = vpop.f32.mrf.mxu1 }
 0xa05   :  { %v7156_v58 = vpop.f32.mrf.mxu1 }
 0xa14   :  { %1599 = vrot.lane.b32.xlu1 %v8178_v52, %s9276_s10 }
 0xa18   :  { %1747 = vrot.lane.b32.xlu1 %v8176_v50, %s9274_s12 }
 0xa1c   :  { %1797 = vrot.lane.b32.xlu1 %v8178_v52, %s9274_s12 }
 0xa20   :  { %1795 = vrot.lane.b32.xlu1 %v8178_v52, %s9272_s13 }
 0xa84   :  { %v1529_v59 = vpop.xlane.xlu0 %1528 }
 0xa85   :  { %v1533_v60 = vsub.f32 %v1525_v42, %v1529_v59 }
 0xa87   :  { %v1535_v61 = vmul.f32 1.442695, %v1533_v60 }
 0xa89   :  { %7756 = vpow2.f32 %v1535_v61 }
 0xa8c   :  { %v1532_v62 = vpop.xlane.xlu1 %1531 }
 0xa8d   :  { %v1534_v63 = vsub.f32 %v1526_v54, %v1532_v62 }
 0xa8f   :  { %v1537_v0 = vmul.f32 1.442695, %v1534_v63 }
 0xa90   :  { %v1600_v1 = vpop.permute.xlu1 %1599 }
 0xa91   :  { %7758 = vpow2.f32 %v1537_v0  ;;  %v1605_v2 = vsel %vm1328_vm5, %v1600_v1, 0 }
 0xa92   :  { %7164 = vmatpush3.bf16.msra.mxu1 %v1605_v2 }
 0xa93   :  { %7175 = vmatprep.subr.bf16.mxu1 %v7913_v44 }
 0xa94   :  { %v1748_v19 = vpop.permute.xlu1 %1747 }
 0xa95   :  { %v1753_v36 = vsel %vm1199_vm3, %v1748_v19, 0 }
 0xa96   :  { %v7757_v3 = vpop.eup %7756 }
 0xa97   :  { %v1539_v4 = vsel %vm1297_vm4, %v7757_v3, 0.0 }
 0xa98   :  { %1540 = vadd.xlane.f32.xlu0 %v1539_v4  ;;  %v1798_v20 = vpop.permute.xlu1 %1797 }
 0xa99   :  { %v1803_v22 = vsel %vm1199_vm3, %v1798_v20, 0 }
 0xa9c   :  { %v1796_v23 = vpop.permute.xlu1 %1795 }
 0xa9e   :  { %v7759_v5 = vpop.eup %7758 }
 0xa9f   :  { %v1542_v6 = vsel %vm1297_vm4, %v7759_v5, 0.0 }
 0xaa0   :  { %1543 = vadd.xlane.f32.xlu0 %v1542_v6 }
 0xab6   :  { %1551 = vrot.lane.b32.xlu0 %v8176_v50, %s9276_s10  ;;  %s7951_s10 = smov 27  }
 0xab7   :  { %s8620_s6 = sld [smem:[%s9263_s0 + %s7951_s10]]   ;;  %s9290_s10 = smov 48  }
 0xaba   :  { %1745 = vrot.lane.b32.xlu0 %v8176_v50, %s9272_s13  ;;  %s8570_s13 = sld [smem:[%s9263_s0 + %s7949_s30]]   ;;  %s7950_s30 = smov 26  }
 0xabb   :  { %s8615_s12 = sld [smem:[%s9263_s0 + %s7950_s30]]   ;;  %s9291_s30 = smov 72  }
 0xb21   :  { %v1541_v7 = vpop.xlane.xlu0 %1540 }
 0xb22   :  { %7760 = vrcp.f32 %v1541_v7 }
 0xb29   :  { %v1544_v8 = vpop.xlane.xlu0 %1543 }
 0xb2a   :  { %7762 = vrcp.f32 %v1544_v8 }
 0xb2d   :  { %v1552_v9 = vpop.permute.xlu0 %1551 }
 0xb2e   :  { %v1557_v10 = vsel %vm1328_vm5, %v1552_v9, 0 }
 0xb2f   :  { %v7761_v11 = vpop.eup %7760  ;;  %7158 = vmatpush3.bf16.msra.mxu0 %v1557_v10 }
 0xb30   :  { %v1547_v12 = vmul.f32 %v7761_v11, %v7757_v3  ;;  %7169 = vmatprep.subr.bf16.mxu0 %v7913_v44 }
 0xb31   :  { %v1746_v40 = vpop.permute.xlu0 %1745 }
 0xb32   :  { %v1549_v13 = vpack.c.bf16 %v1547_v12, %v1547_v12 }
 0xb34   :  { %7160 = vmatmul.mubr.msk.bf16.vlgmr.msra.gmra.mxu0 %vm1324_vm6, %v1549_v13 }
 0xb35   :  { %7171 = vmatprep.mubr.msk.bf16.mxu0 %vm7914_vm0, %v7913_v44  ;;  %7170 = vmatpush3.bf16.msra.mxu0 %v1657_v26 }
 0xb36   :  { %7181 = vmatprep.subr.bf16.mxu0 %v7913_v44 }
 0xb37   :  { %v7763_v14 = vpop.eup %7762 }
 0xb38   :  { %v1548_v16 = vmul.f32 %v7763_v14, %v7759_v5 }
 0xb3a   :  { %v1550_v17 = vpack.c.bf16 %v1548_v16, %v1548_v16 }
 0xb3c   :  { %7166 = vmatmul.mubr.msk.bf16.vlgmr.msra.gmra.mxu1 %vm1324_vm6, %v1550_v17 }
 0xb3d   :  { %7176 = vmatpush3.bf16.msra.mxu1 %v1703_v18  ;;  %7177 = vmatprep.mubr.msk.bf16.mxu1 %vm7914_vm0, %v7913_v44 }
 0xb3e   :  { %7187 = vmatprep.subr.bf16.mxu1 %v7913_v44 }
 0xb44   :  { %7178 = vmatmul.mubr.msk.bf16.vlgmr.msra.gmra.mxu1 %vm1199_vm3, %v1424_v21 }
 0xb45   :  { %7188 = vmatpush3.bf16.xpose.msra.mxu1 %v1803_v22  ;;  %7189 = vmatprep.mubr.msk.bf16.mxu1 %vm7914_vm0, %v7913_v44 }
 0xb46   :  { %7199 = vmatprep.subr.bf16.mxu1 %v7913_v44 }
 0xb4c   :  { %7190 = vmatmul.mubr.msk.bf16.vlgmr.msra.gmra.mxu1 %vm1199_vm3, %v1796_v23 }
 0xb4d   :  { %7201 = vmatprep.mubr.msk.bf16.mxu1 %vm7914_vm0, %v7913_v44 }
 0xbf4   :  { %v1593_v27 = vpop.f32.mrf.mxu0 }
 0xbf6   :  { %v7161_v28 = vpop.f32.mrf.mxu0 }
 0xbf7   :  { %v1192_v28 = vld [vmem:[%s8256_s18 + $0x8] sm:$0xf] }
 0xbf8   :  { %v1596_v29 = vpop.f32.mrf.mxu0 }
 0xbf9   :  { %v1976_v29 = vsel %vm1655_vm7, %v1192_v28, 0 }
 0xbfa   :  { %v7162_v30 = vpop.f32.mrf.mxu0 }
 0xbfc   :  { %v1641_v31 = vpop.f32.mrf.mxu1 }
 0xbfd   :  { %v1649_v32 = vcombine.low %v1593_v27, %v1641_v31 }
 0xbfe   :  { %v7167_v33 = vpop.f32.mrf.mxu1 }
 0xbff   :  { %v1651_v34 = vpack.c.bf16 %v1649_v32, %v1649_v32 }
 0xc00   :  { %v1644_v35 = vpop.f32.mrf.mxu1 }
 0xc01   :  { %7172 = vmatmul.mubr.msk.bf16.vlgmr.msra.gmra.mxu0 %vm1199_vm3, %v1651_v34 }
 0xc02   :  { %7182 = vmatpush3.bf16.xpose.msra.mxu0 %v1753_v36  ;;  %v7168_v37 = vpop.f32.mrf.mxu1  ;;  %7183 = vmatprep.mubr.msk.bf16.mxu0 %vm7914_vm0, %v7913_v44 }
 0xc03   :  { %7193 = vmatprep.subr.bf16.mxu0 %v7913_v44 }
 0xc04   :  { %v8286_v38 = vpop.f32.mrf.mxu1 }
 0xc06   :  { %v7179_v39 = vpop.f32.mrf.mxu1 }
 0xc08   :  { %v1742_v41 = vpop.f32.mrf.mxu1 }
 0xc09   :  { %7184 = vmatmul.mubr.msk.bf16.vlgmr.msra.gmra.mxu0 %vm1199_vm3, %v1746_v40 }
 0xc0a   :  { %v7180_v42 = vpop.f32.mrf.mxu1  ;;  %7195 = vmatprep.mubr.msk.bf16.mxu0 %vm7914_vm0, %v7913_v44 }
 0xc0c   :  { %v1839_v43 = vpop.f32.mrf.mxu1 }
 0xc0d   :  { %v1846_v45 = vmul.f32 0.35355338, %v1839_v43 }
 0xc0e   :  { %v7191_v46 = vpop.f32.mrf.mxu1 }
 0xc0f   :  { %v1850_v47 = vsel %vm1297_vm4, %v1846_v45, -inf }
 0xc10   :  { %1851 = vmax.xlane.f32.xlu1 %v1850_v47  ;;  %v1842_v48 = vpop.f32.mrf.mxu1 }
 0xc12   :  { %v7192_v49 = vpop.f32.mrf.mxu1 }
 0xc21   :  { %1919 = vrot.lane.b32.xlu1 %v8178_v52, %s9270_s20 }
 0xc25   :  { %2021 = vrot.lane.b32.xlu1 %v8176_v50, %s9268_s21 }
 0xc29   :  { %2071 = vrot.lane.b32.xlu1 %v8178_v52, %s9268_s21 }
 0xc2d   :  { %2069 = vrot.lane.b32.xlu1 %v8178_v52, %s9266_s22 }
 0xc99   :  { %v1852_v51 = vpop.xlane.xlu1 %1851 }
 0xc9a   :  { %v1854_v55 = vsub.f32 %v1846_v45, %v1852_v51 }
 0xc9c   :  { %v1857_v56 = vmul.f32 1.442695, %v1854_v55 }
 0xc9d   :  { %v1920_v53 = vpop.permute.xlu1 %1919 }
 0xc9e   :  { %v1925_v54 = vsel %vm1328_vm5, %v1920_v53, 0  ;;  %7764 = vpow2.f32 %v1857_v56 }
 0xc9f   :  { %7200 = vmatpush3.bf16.msra.mxu1 %v1925_v54 }
 0xca0   :  { %7211 = vmatprep.subr.bf16.mxu1 %v7913_v44 }
 0xca1   :  { %v2022_v13 = vpop.permute.xlu1 %2021 }
 0xca2   :  { %v2027_v15 = vsel %vm1199_vm3, %v2022_v13, 0 }
 0xca5   :  { %v2072_v39 = vpop.permute.xlu1 %2071 }
 0xca6   :  { %v2077_v43 = vsel %vm1199_vm3, %v2072_v39, 0 }
 0xca9   :  { %v2070_v46 = vpop.permute.xlu1 %2069 }
 0xcab   :  { %v7765_v1 = vpop.eup %7764 }
 0xcac   :  { %v1862_v4 = vsel %vm1297_vm4, %v7765_v1, 0.0 }
 0xcc1   :  { %v8302_v57 = vpop.f32.mrf.mxu0 }
 0xcc2   :  { %v1740_v54 = vadd.f32 %v8286_v38, %v8302_v57 }
 0xcc3   :  { %v7173_v58 = vpop.f32.mrf.mxu0 }
 0xcc5   :  { %v1696_v59 = vpop.f32.mrf.mxu0 }
 0xcc7   :  { %v7174_v60 = vpop.f32.mrf.mxu0 }
 0xcc9   :  { %v1789_v61 = vpop.f32.mrf.mxu0 }
 0xcca   :  { %v1845_v62 = vmul.f32 0.35355338, %v1789_v61 }
 0xccb   :  { %v7185_v63 = vpop.f32.mrf.mxu0 }
 0xccc   :  { %v1847_v0 = vsel %vm1297_vm4, %v1845_v62, -inf }
 0xccd   :  { %1848 = vmax.xlane.f32.xlu0 %v1847_v0  ;;  %v1792_v2 = vpop.f32.mrf.mxu0 }
 0xccf   :  { %v7186_v3 = vpop.f32.mrf.mxu0 }
 0xcd1   :  { %1863 = vadd.xlane.f32.xlu0 %v1862_v4 }
 0xd56   :  { %v1849_v5 = vpop.xlane.xlu0 %1848 }
 0xd57   :  { %v1853_v6 = vsub.f32 %v1845_v62, %v1849_v5 }
 0xd59   :  { %v1855_v7 = vmul.f32 1.442695, %v1853_v6 }
 0xd5a   :  { %v1864_v8 = vpop.xlane.xlu0 %1863 }
 0xd5b   :  { %7766 = vpow2.f32 %v1855_v7 }
 0xd5c   :  { %7768 = vrcp.f32 %v1864_v8 }
 0xd68   :  { %v7767_v9 = vpop.eup %7766 }
 0xd69   :  { %v7769_v10 = vpop.eup %7768  ;;  %v1859_v11 = vsel %vm1297_vm4, %v7767_v9, 0.0 }
 0xd6a   :  { %1860 = vadd.xlane.f32.xlu0 %v1859_v11  ;;  %v1868_v12 = vmul.f32 %v7769_v10, %v7765_v1 }
 0xd6c   :  { %v1870_v14 = vpack.c.bf16 %v1868_v12, %v1868_v12 }
 0xd6e   :  { %7202 = vmatmul.mubr.msk.bf16.vlgmr.msra.gmra.mxu1 %vm1324_vm6, %v1870_v14 }
 0xd6f   :  { %7212 = vmatpush3.bf16.xpose.msra.mxu1 %v2027_v15  ;;  %7213 = vmatprep.mubr.msk.bf16.mxu1 %vm7914_vm0, %v7913_v44 }
 0xd70   :  { %7223 = vmatprep.subr.bf16.mxu1 %v7913_v44 }
 0xd80   :  { %1871 = vrot.lane.b32.xlu0 %v8176_v50, %s9270_s20 }
 0xd84   :  { %2019 = vrot.lane.b32.xlu0 %v8176_v50, %s9266_s22  ;;  %s8391_s22 = sld [smem:[%s9263_s0 + %s7943_s14]]   ;;  %s7945_s14 = smov 24  }
 0xd85   :  { %s8407_s20 = sld [smem:[%s9263_s0 + %s7945_s14]]   ;;  %s7947_s14 = smov 22  }
 0xdf3   :  { %v1861_v16 = vpop.xlane.xlu0 %1860 }
 0xdf4   :  { %7770 = vrcp.f32 %v1861_v16  ;;  %v1193_v16 = vld [vmem:[%s8256_s18 + $0xc] sm:$0xf] }
 0xdf7   :  { %v1872_v17 = vpop.permute.xlu0 %1871 }
 0xdf8   :  { %v1877_v18 = vsel %vm1328_vm5, %v1872_v17, 0  ;;  %v2250_v17 = vsel %vm1655_vm7, %v1193_v16, 0 }
 0xdf9   :  { %7194 = vmatpush3.bf16.msra.mxu0 %v1877_v18 }
 0xdfa   :  { %7205 = vmatprep.subr.bf16.mxu0 %v7913_v44 }
 0xdfb   :  { %v2020_v19 = vpop.permute.xlu0 %2019 }
 0xdfc   :  { %7214 = vmatmul.mubr.msk.bf16.vlgmr.msra.gmra.mxu1 %vm1199_vm3, %v2020_v19 }
 0xdfd   :  { %7225 = vmatprep.mubr.msk.bf16.mxu1 %vm7914_vm0, %v7913_v44 }
 0xe01   :  { %v7771_v20 = vpop.eup %7770 }
 0xe02   :  { %v1867_v21 = vmul.f32 %v7771_v20, %v7767_v9 }
 0xe04   :  { %v1869_v22 = vpack.c.bf16 %v1867_v21, %v1867_v21 }
 0xe06   :  { %7196 = vmatmul.mubr.msk.bf16.vlgmr.msra.gmra.mxu0 %vm1324_vm6, %v1869_v22 }
 0xe07   :  { %7207 = vmatprep.mubr.msk.bf16.mxu0 %vm7914_vm0, %v7913_v44  ;;  %7206 = vmatpush3.bf16.msra.mxu0 %v1976_v29 }
 0xe08   :  { %7217 = vmatprep.subr.bf16.mxu0 %v7913_v44 }
 0xe2e   :  { %v1961_v23 = vpop.f32.mrf.mxu1 }
 0xe30   :  { %v7203_v25 = vpop.f32.mrf.mxu1 }
 0xe32   :  { %v1964_v26 = vpop.f32.mrf.mxu1 }
 0xe34   :  { %v7204_v27 = vpop.f32.mrf.mxu1 }
 0xebc   :  { %v2063_v30 = vpop.f32.mrf.mxu1 }
 0xebd   :  { %v2119_v31 = vmul.f32 0.35355338, %v2063_v30 }
 0xebe   :  { %v7215_v32 = vpop.f32.mrf.mxu1 }
 0xebf   :  { %v2121_v33 = vsel %vm1297_vm4, %v2119_v31, -inf }
 0xec0   :  { %2122 = vmax.xlane.f32.xlu0 %v2121_v33  ;;  %v2066_v34 = vpop.f32.mrf.mxu1 }
 0xec2   :  { %v7216_v35 = vpop.f32.mrf.mxu1 }
 0xec6   :  { %v1913_v36 = vpop.f32.mrf.mxu0 }
 0xec7   :  { %v1969_v37 = vcombine.low %v1913_v36, %v1961_v23 }
 0xec8   :  { %v7197_v40 = vpop.f32.mrf.mxu0 }
 0xec9   :  { %v1971_v41 = vpack.c.bf16 %v1969_v37, %v1969_v37 }
 0xeca   :  { %v1916_v42 = vpop.f32.mrf.mxu0 }
 0xecb   :  { %7208 = vmatmul.mubr.msk.bf16.vlgmr.msra.gmra.mxu0 %vm1199_vm3, %v1971_v41 }
 0xecc   :  { %7218 = vmatpush3.bf16.xpose.msra.mxu0 %v2077_v43  ;;  %v7198_v45 = vpop.f32.mrf.mxu0  ;;  %7219 = vmatprep.mubr.msk.bf16.mxu0 %vm7914_vm0, %v7913_v44 }
 0xecd   :  { %7229 = vmatprep.subr.bf16.mxu0 %v7913_v44  ;;  %v7691_v45 = vld [vmem:[%s8377_s17] sm:$0xff]  }
 0xed3   :  { %7220 = vmatmul.mubr.msk.bf16.vlgmr.msra.gmra.mxu0 %vm1199_vm3, %v2070_v46 }
 0xed4   :  { %7231 = vmatprep.mubr.msk.bf16.mxu0 %vm7914_vm0, %v7913_v44 }
 0xf49   :  { %v2123_v47 = vpop.xlane.xlu0 %2122 }
 0xf4a   :  { %v2127_v48 = vsub.f32 %v2119_v31, %v2123_v47  ;;  %v6511_v31 = vld [vmem:[%s8364_s1] ss:$0 sm:$0xff] }
 0xf4c   :  { %v2129_v49 = vmul.f32 1.442695, %v2127_v48 }
 0xf4e   :  { %7772 = vpow2.f32 %v2129_v49 }
 0xf5b   :  { %v7773_v51 = vpop.eup %7772 }
 0xf5c   :  { %v2133_v53 = vsel %vm1297_vm4, %v7773_v51, 0.0 }
 0xf5d   :  { %2134 = vadd.xlane.f32.xlu0 %v2133_v53 }
 0xf8b   :  { %v2012_v55 = vpop.f32.mrf.mxu0 }
 0xf8c   :  { %v2018_v56 = vadd.f32 %v2012_v55, %v1740_v54  ;;  %v6513_v54 = vld [vmem:[%s8391_s22] ss:$0 sm:$0xff] }
 0xf8d   :  { %v7209_v58 = vpop.f32.mrf.mxu0 }
 0xf8f   :  { %v2015_v59 = vpop.f32.mrf.mxu0 }
 0xf91   :  { %v7210_v60 = vpop.f32.mrf.mxu0 }
 0xf93   :  { %v2113_v61 = vpop.f32.mrf.mxu0 }
 0xf94   :  { %v2120_v62 = vmul.f32 0.35355338, %v2113_v61 }
 0xf95   :  { %v7221_v63 = vpop.f32.mrf.mxu0 }
 0xf96   :  { %v2124_v0 = vsel %vm1297_vm4, %v2120_v62, -inf }
 0xf97   :  { %2125 = vmax.xlane.f32.xlu1 %v2124_v0  ;;  %v2116_v1 = vpop.f32.mrf.mxu0 }
 0xf99   :  { %v7222_v2 = vpop.f32.mrf.mxu0 }
 0xfa8   :  { %2193 = vrot.lane.b32.xlu1 %v8178_v52, %s9264_s24 }
 0xfe6   :  { %v2135_v8 = vpop.xlane.xlu0 %2134 }
0x1020   :  { %v2126_v3 = vpop.xlane.xlu1 %2125 }
0x1021   :  { %v2128_v4 = vsub.f32 %v2120_v62, %v2126_v3 }
0x1023   :  { %v2131_v38 = vmul.f32 1.442695, %v2128_v4  ;;  %v7692_v4 = vld [vmem:[%s8407_s20 + $0x8] sm:$0xff]  }
0x1024   :  { %v2194_v57 = vpop.permute.xlu1 %2193 }
0x1025   :  { %7774 = vpow2.f32 %v2131_v38  ;;  %v2199_v5 = vsel %vm1328_vm5, %v2194_v57, 0  ;;  %v7693_v38 = vld [vmem:[%s8407_s20] sm:$0xff]  }
0x1026   :  { %7230 = vmatpush3.bf16.msra.mxu0 %v2199_v5  ;;  %7776 = vrcp.f32 %v2135_v8  ;;  %v2414_v5 = vlaneseq }
0x1027   :  { %7241 = vmatprep.subr.bf16.mxu0 %v7913_v44 }
0x1032   :  { %v7775_v6 = vpop.eup %7774 }
0x1033   :  { %v2136_v7 = vsel %vm1297_vm4, %v7775_v6, 0.0  ;;  %v7777_v52 = vpop.eup %7776 }
0x1034   :  { %2137 = vadd.xlane.f32.xlu0 %v2136_v7  ;;  %v2141_v10 = vmul.f32 %v7777_v52, %v7773_v51  ;;  %v6512_v51 = vld [vmem:[%s8386_s2] ss:$0 sm:$0xff] }
0x1036   :  { %v2143_v13 = vpack.c.bf16 %v2141_v10, %v2141_v10 }
0x104a   :  { %2145 = vrot.lane.b32.xlu0 %v8176_v50, %s9264_s24  ;;  %s8401_s24 = sld [smem:[%s9263_s0 + %s7944_s26]]   ;;  %s7946_s26 = smov 21  }
0x104b   :  { %s8417_s21 = sld [smem:[%s9263_s0 + %s7946_s26]]  }
0x104c   :  { %s8432_s26 = sld [smem:[%s9263_s0 + %s7947_s14]]   ;;  %s9292_s14 = smov 104  }
0x1050   :  { %v6514_v59 = vld [vmem:[%s8401_s24] ss:$0 sm:$0xff] }
0x1051   :  { %v2413_v8 = vld [vmem:[%s8417_s21 + $0x10] sm:$0xff] }
0x10bd   :  { %v2138_v9 = vpop.xlane.xlu0 %2137 }
0x10be   :  { %7778 = vrcp.f32 %v2138_v9 }
0x10c1   :  { %v2146_v11 = vpop.permute.xlu0 %2145 }
0x10c2   :  { %v2151_v12 = vsel %vm1328_vm5, %v2146_v11, 0  ;;  %v2412_v11 = vld [vmem:[%s8417_s21 + $0x8] sm:$0xff] }
0x10c3   :  { %7224 = vmatpush3.bf16.msra.mxu1 %v2151_v12 }
0x10c4   :  { %7235 = vmatprep.subr.bf16.mxu1 %v7913_v44 }
0x10c6   :  { %7226 = vmatmul.mubr.msk.bf16.vlgmr.msra.gmra.mxu1 %vm1324_vm6, %v2143_v13 }
0x10c7   :  { %7237 = vmatprep.mubr.msk.bf16.mxu1 %vm7914_vm0, %v7913_v44  ;;  %7236 = vmatpush3.bf16.msra.mxu1 %v2250_v17 }
0x10c8   :  { %7249 = vmatprep.subr.bf16.mxu1 %v7913_v44 }
0x10cb   :  { %v7779_v50 = vpop.eup %7778 }
0x10cc   :  { %v2142_v14 = vmul.f32 %v7779_v50, %v7775_v6  ;;  %v8419_v6 = vshrl.u32 %v2414_v5, 7 }
0x10ce   :  { %v2144_v15 = vpack.c.bf16 %v2142_v14, %v2142_v14  ;;  %v8422_v7 = vsub.s32 0, %v8419_v6  ;;  %v2416_v52 = vsub.s32 7, %v8419_v6  ;;  %v2446_v9 = vsub.s32 1, %v8419_v6 }
0x10cf   :  { %v2467_v10 = vsub.s32 2, %v8419_v6  ;;  %v2488_v12 = vsub.s32 6, %v8419_v6  ;;  %v2540_v50 = vsub.s32 5, %v8419_v6  ;;  %v2592_v14 = vsub.s32 4, %v8419_v6 }
0x10d0   :  { %7232 = vmatmul.mubr.msk.bf16.vlgmr.msra.gmra.mxu0 %vm1324_vm6, %v2144_v15  ;;  %v8436_v13 = vrot.slane %v2413_v8, %v8422_v7  ;;  %v8442_v15 = vrot.slane %v2412_v11, %v2416_v52  ;;  %v2447_v16 = vrot.slane %v2413_v8, %v2446_v9 }
0x10d1   :  { %7245 = vmatprep.mubr.msk.bf16.mxu0 %vm7914_vm0, %v7913_v44  ;;  %v2468_v17 = vrot.slane %v2413_v8, %v2467_v10 }
0x1186   :  { %v2187_v18 = vpop.f32.mrf.mxu1 }
0x1188   :  { %v7227_v19 = vpop.f32.mrf.mxu1 }
0x1189   :  { %v2419_v19 = vrot.slane %v8442_v15, 1 }
0x118a   :  { %v2190_v20 = vpop.f32.mrf.mxu1 }
0x118b   :  { %v2429_v20 = vrot.slane %v8436_v13, 7 }
0x118c   :  { %v7228_v21 = vpop.f32.mrf.mxu1 }
0x118d   :  { %v8456_v21 = vrot.slane %v2412_v11, %v2540_v50 }
0x1190   :  { %v2235_v22 = vpop.f32.mrf.mxu0 }
0x1191   :  { %v2243_v23 = vcombine.low %v2187_v18, %v2235_v22  ;;  %v8450_v18 = vrot.slane %v2412_v11, %v2488_v12  ;;  %v8460_v22 = vrot.slane %v2412_v11, %v2592_v14 }
0x1192   :  { %v7233_v25 = vpop.f32.mrf.mxu0 }
0x1193   :  { %v2245_v26 = vpack.c.bf16 %v2243_v23, %v2243_v23  ;;  %v2449_v23 = vrot.slane %v2447_v16, 6  ;;  %v2470_v25 = vrot.slane %v2468_v17, 5 }
0x1194   :  { %v2238_v27 = vpop.f32.mrf.mxu0 }
0x1195   :  { %7238 = vmatmul.mubr.msk.bf16.vlgmr.msra.gmra.mxu1 %vm1199_vm3, %v2245_v26  ;;  %v2496_v26 = vrot.slane %v8442_v15, 7  ;;  %v2510_v27 = vrot.slane %v8436_v13, 6 }
0x1196   :  { %v7234_v28 = vpop.f32.mrf.mxu0  ;;  %7253 = vmatprep.mubr.msk.bf16.mxu1 %vm7914_vm0, %v7913_v44  ;;  %7250 = vmatpush3.bf16.msra.mxu1 %v7692_v4 }
0x1197   :  { %7251 = vmatprep.subr.bf16.mxu1 %v7913_v44 }
0x119a   :  { %7252 = vmatpush3.bf16.msra.mxu1 %v7693_v38 }
0x119b   :  { %7265 = vmatprep.subr.bf16.mxu1 %v7913_v44 }
0x1255   :  { %v2286_v29 = vpop.f32.mrf.mxu1 }
0x1256   :  { %v2292_v30 = vadd.f32 %v2286_v29, %v2018_v56  ;;  %v2450_v29 = vrot.slane %v2447_v16, 7 }
0x1257   :  { %v7239_v32 = vpop.f32.mrf.mxu1 }
0x1258   :  { %v2293_v33 = vadd.f32 %v2292_v30, %v8140_v24  ;;  %v7690_v24 = vld [vmem:[%s8377_s17 + $0x8] sm:$0xff]   ;;  %v2471_v30 = vrot.slane %v2468_v17, 6  ;;  %v2524_v32 = vrot.slane %v2447_v16, 5 }
0x1259   :  { %v2289_v34 = vpop.f32.mrf.mxu1  ;;  %7242 = vmatpush3.bf16.msra.mxu0 %v7690_v24 }
0x125a   :  { %v8368_v35 = vadd.f32 %v6511_v31, %v2293_v33  ;;  %7243 = vmatprep.subr.bf16.mxu0 %v7913_v44  ;;  %v2491_v31 = vrot.slane %v8450_v18, 1  ;;  %v2543_v34 = vrot.slane %v8456_v21, 1 }
0x125b   :  { %v7240_v36 = vpop.f32.mrf.mxu1 }
0x125c   :  { %v2304_v37 = vsel %vm896_vm2, %v8368_v35, 0.0  ;;  %v2548_v36 = vrot.slane %v8450_v18, 7 }
0x125d   :  { %2305 = vadd.xlane.f32.xlu1 %v2304_v37  ;;  %7244 = vmatpush3.bf16.msra.mxu0 %v7691_v45  ;;  %v2562_v37 = vrot.slane %v8442_v15, 6 }
0x125e   :  { %7257 = vmatprep.subr.bf16.mxu0 %v7913_v44 }
0x12e6   :  { %v2306_v39 = vpop.xlane.xlu1 %2305 }
0x12e7   :  { %v2307_v40 = vmul.f32 0.03125, %v2306_v39  ;;  %v2686_v39 = vld [vmem:[%s8432_s26] sm:$0x1] }
0x12e9   :  { %v2308_v41 = vsub.f32 %v8368_v35, %v2307_v40  ;;  %v2576_v40 = vrot.slane %v8436_v13, 5 }
0x12eb   :  { %v2309_v42 = vmul.f32 %v2308_v41, %v2308_v41 }
0x12ed   :  { %v2310_v43 = vsel %vm896_vm2, %v2309_v42, 0.0  ;;  %v2600_v42 = vrot.slane %v8456_v21, 7 }
0x12ee   :  { %2311 = vadd.xlane.f32.xlu0 %v2310_v43  ;;  %v2614_v43 = vrot.slane %v8450_v18, 6 }
0x1377   :  { %v2312_v46 = vpop.xlane.xlu0 %2311 }
0x1378   :  { %v2313_v47 = vmul.f32 0.03125, %v2312_v46 }
0x137a   :  { %v2314_v48 = vadd.f32 1e-05, %v2313_v47  ;;  %v2628_v47 = vrot.slane %v8442_v15, 5 }
0x137c   :  { %7780 = vrsqrt.f32 %v2314_v48 }
0x1389   :  { %v7781_v49 = vpop.eup %7780 }
0x138a   :  { %v2316_v53 = vmul.f32 %v7781_v49, %v2308_v41  ;;  %v2595_v41 = vrot.slane %v8460_v22, 1 }
0x138c   :  { %v2323_v55 = vmul.f32 %v6512_v51, %v2316_v53  ;;  %v8488_v53 = vmul.f32 0.999995, %v2686_v39 }
0x138e   :  { %v2330_v56 = vadd.f32 %v6513_v54, %v2323_v55 }
0x1390   :  { %v2336_v58 = vpack.c.bf16 %v2330_v56, %v2330_v56 }
0x1392   :  { %7246 = vmatmul.mubr.msk.bf16.vlgmr.msra.gmra.mxu0 %vm896_vm2, %v2336_v58 }
0x1393   :  { %7261 = vmatprep.mubr.msk.bf16.mxu0 %vm7914_vm0, %v7913_v44 }
0x1452   :  { %v2392_v60 = vpop.f32.mrf.mxu0 }
0x1453   :  { %v2393_v61 = vadd.f32 %v6514_v59, %v2392_v60 }
0x1454   :  { %v7247_v62 = vpop.f32.mrf.mxu0 }
0x1455   :  { %v6518_v63 = vmul.f32 -1.442695, %v2393_v61 }
0x1456   :  { %v2395_v0 = vpop.f32.mrf.mxu0 }
0x1457   :  { %7782 = vpow2.f32 %v6518_v63 }
0x1458   :  { %v7248_v1 = vpop.f32.mrf.mxu0 }
0x1464   :  { %v7783_v2 = vpop.eup %7782 }
0x1465   :  { %v2401_v3 = vadd.f32 1.0, %v7783_v2 }
0x1467   :  { %7784 = vrcp.f32 %v2401_v3 }
0x1474   :  { %v7785_v57 = vpop.eup %7784 }
0x1475   :  { %2405 = vrot.lane.b32.xlu0 %v7785_v57, %s7928_s5 }
0x14e7   :  { %v2406_v28 = vpop.permute.xlu0 %2405 }
0x14e8   :  { %v8465_v33 = vmul.f32 %v2406_v28, %v2393_v61 }
0x14ea   :  { %v8477_v24 = vcombine.high %v8465_v33, %v8465_v33  ;;  %v2432_v45 = vmul.f32 %v2429_v20, %v8465_v33  ;;  %v2453_v46 = vmul.f32 %v2449_v23, %v8465_v33  ;;  %v2422_v48 = vmul.f32 %v8442_v15, %v8465_v33 }
0x14eb   :  { %v2474_v49 = vmul.f32 %v2470_v25, %v8465_v33  ;;  %v2498_v51 = vmul.f32 %v2496_v26, %v8465_v33  ;;  %v2494_v58 = vmul.f32 %v8450_v18, %v8465_v33  ;;  %v2512_v62 = vmul.f32 %v2510_v27, %v8465_v33 }
0x14ec   :  { %v2433_v54 = vmul.f32 %v8436_v13, %v8477_v24  ;;  %v6519_v55 = vrot.slane %v2432_v45, 9  ;;  %v2454_v56 = vmul.f32 %v2450_v29, %v8477_v24  ;;  %v2423_v59 = vmul.f32 %v2419_v19, %v8477_v24 }
0x14ed   :  { %v6521_v60 = vrot.slane %v2453_v46, 10  ;;  %v2475_v61 = vmul.f32 %v2471_v30, %v8477_v24  ;;  %v6523_v1 = vrot.slane %v2474_v49, 11  ;;  %v2499_v2 = vmul.f32 %v8442_v15, %v8477_v24 }
0x14ee   :  { %v6520_v63 = vrot.slane %v2433_v54, 9  ;;  %v2442_v0 = vadd.f32 %v6519_v55, %v2422_v48  ;;  %v6522_v3 = vrot.slane %v2454_v56, 10  ;;  %v2495_v4 = vmul.f32 %v2491_v31, %v8477_v24 }
0x14ef   :  { %v6525_v38 = vrot.slane %v2498_v51, 9  ;;  %v2513_v57 = vmul.f32 %v2429_v20, %v8477_v24  ;;  %v6526_v11 = vrot.slane %v2499_v2, 9  ;;  %v2526_v16 = vmul.f32 %v2524_v32, %v8465_v33 }
0x14f0   :  { %v2443_v5 = vadd.f32 %v6520_v63, %v2423_v59  ;;  %v2463_v8 = vadd.f32 %v6521_v60, %v2442_v0  ;;  %v6524_v17 = vrot.slane %v2475_v61, 11  ;;  %v6527_v25 = vrot.slane %v2512_v62, 10 }
0x14f1   :  { %v2508_v19 = vadd.f32 %v6525_v38, %v2494_v58  ;;  %v2527_v28 = vmul.f32 %v2449_v23, %v8477_v24  ;;  %v2509_v30 = vadd.f32 %v6526_v11, %v2495_v4  ;;  %v6528_v39 = vrot.slane %v2513_v57, 10 }
0x14f2   :  { %v2464_v29 = vadd.f32 %v6522_v3, %v2443_v5  ;;  %v2546_v45 = vmul.f32 %v8456_v21, %v8465_v33  ;;  %v2484_v31 = vadd.f32 %v6523_v1, %v2463_v8  ;;  %v6529_v48 = vrot.slane %v2526_v16, 11 }
0x14f3   :  { %v2522_v46 = vadd.f32 %v6527_v25, %v2508_v19  ;;  %v2550_v20 = vmul.f32 %v2548_v36, %v8465_v33  ;;  %v2523_v49 = vadd.f32 %v6528_v39, %v2509_v30  ;;  %v6530_v32 = vrot.slane %v2527_v28, 11 }
0x14f4   :  { %v2551_v51 = vmul.f32 %v8450_v18, %v8477_v24  ;;  %v2564_v23 = vmul.f32 %v2562_v37, %v8465_v33  ;;  %v2547_v54 = vmul.f32 %v2543_v34, %v8477_v24  ;;  %v2565_v56 = vmul.f32 %v2496_v26, %v8477_v24 }
0x14f5   :  { %v6531_v55 = vrot.slane %v2550_v20, 9  ;;  %v2578_v58 = vmul.f32 %v2576_v40, %v8465_v33  ;;  %v2485_v59 = vadd.f32 %v6524_v17, %v2464_v29  ;;  %v2536_v60 = vadd.f32 %v6529_v48, %v2522_v46  ;;  %v6543_v20 = vld [vmem:[%s8530_s27] ss:$0 sm:$0xff] }
0x14f6   :  { %v6532_v61 = vrot.slane %v2551_v51, 9  ;;  %v2579_v62 = vmul.f32 %v2510_v27, %v8477_v24  ;;  %v2537_v63 = vadd.f32 %v6530_v32, %v2523_v49  ;;  %v6533_v1 = vrot.slane %v2564_v23, 10 }
0x14f7   :  { %v2560_v0 = vadd.f32 %v6531_v55, %v2546_v45  ;;  %v6534_v2 = vrot.slane %v2565_v56, 10  ;;  %v6535_v34 = vrot.slane %v2578_v58, 11  ;;  %v2598_v4 = vmul.f32 %v8460_v22, %v8465_v33 }
0x14f8   :  { %v2561_v3 = vadd.f32 %v6532_v61, %v2547_v54  ;;  %v2602_v26 = vmul.f32 %v2600_v42, %v8465_v33  ;;  %v2603_v13 = vmul.f32 %v8456_v21, %v8477_v24  ;;  %v2616_v27 = vmul.f32 %v2614_v43, %v8465_v33 }
0x14f9   :  { %v2574_v40 = vadd.f32 %v6533_v1, %v2560_v0  ;;  %v2617_v38 = vmul.f32 %v2548_v36, %v8477_v24  ;;  %v6536_v42 = vrot.slane %v2579_v62, 11  ;;  %v2630_v8 = vmul.f32 %v2628_v47, %v8465_v33 }
0x14fa   :  { %v2575_v57 = vadd.f32 %v6534_v2, %v2561_v3  ;;  %v6537_v5 = vrot.slane %v2602_v26, 9  ;;  %v2599_v21 = vmul.f32 %v2595_v41, %v8477_v24  ;;  %v6538_v16 = vrot.slane %v2603_v13, 9  ;;  %v6546_v13 = vld [vmem:[%s8570_s13] ss:$0 sm:$0xff] }
0x14fb   :  { %v2588_v11 = vadd.f32 %v6535_v34, %v2574_v40  ;;  %v2631_v43 = vmul.f32 %v2562_v37, %v8477_v24  ;;  %v6539_v36 = vrot.slane %v2616_v27, 10  ;;  %v6540_v19 = vrot.slane %v2617_v38, 10 }
0x14fc   :  { %v2589_v17 = vadd.f32 %v6536_v42, %v2575_v57  ;;  %v2612_v18 = vadd.f32 %v6537_v5, %v2598_v4  ;;  %v2613_v25 = vadd.f32 %v6538_v16, %v2599_v21  ;;  %v2647_v28 = vrot.slane %v2536_v60, %v8422_v7 }
0x14fd   :  { %v2651_v33 = vrot.slane %v2537_v63, %v8422_v7  ;;  %v2659_v47 = vrot.slane %v2588_v11, %v8422_v7  ;;  %v6541_v22 = vrot.slane %v2630_v8, 11  ;;  %v2692_v15 = vrot.slane %v8488_v53, %v8422_v7 }
0x14fe   :  { %v2626_v29 = vadd.f32 %v6539_v36, %v2612_v18  ;;  %v2663_v41 = vrot.slane %v2589_v17, %v8422_v7  ;;  %v2627_v37 = vadd.f32 %v6540_v19, %v2613_v25  ;;  %v6542_v24 = vrot.slane %v2631_v43, 11  ;;  %v7694_v36 = vld [vmem:[%s8083_s25 + $0x18] sm:$0xff]  }
0x14ff   :  { %v2679_v30 = vsel %vm2678_vm8, %v2484_v31, %v2647_v28  ;;  %v2680_v39 = vsel %vm2678_vm8, %v2485_v59, %v2651_v33  ;;  %v2694_v51 = vcombine.high %v2692_v15, %v2692_v15  ;;  %v2705_v54 = vcombine.high %v6543_v20, %v6543_v20  ;;  %7258 = vmatpush3.bf16.msra.mxu0 %v7694_v36 }
0x1500   :  { %v2640_v45 = vadd.f32 %v6541_v22, %v2626_v29  ;;  %v2641_v46 = vadd.f32 %v6542_v24, %v2627_v37  ;;  %v2681_v48 = vsel %vm1328_vm5, %v2679_v30, %v2659_v47  ;;  %v2682_v32 = vsel %vm1328_vm5, %v2680_v39, %v2663_v41  ;;  %7259 = vmatprep.subr.bf16.mxu0 %v7913_v44  ;;  %v6574_v47 = vld [vmem:[%s8092_s29 + $0x1] ss:$0 sm:$0xff]  ;;  %v7696_v24 = vld [vmem:[%s8107_s7 + $0x78] sm:$0xff]   ;;  %v7697_v30 = vld [vmem:[%s8107_s7 + $0x70] sm:$0xff]  }
0x1501   :  { %v6575_v22 = vld [vmem:[%s8097_s3 + $0x1] ss:$0 sm:$0xff]  ;;  %v7698_v39 = vld [vmem:[%s8107_s7 + $0x68] sm:$0xff]  }
0x1502   :  { %v2671_v49 = vrot.slane %v2640_v45, %v8422_v7  ;;  %v2675_v23 = vrot.slane %v2641_v46, %v8422_v7  ;;  %v7699_v45 = vld [vmem:[%s8107_s7 + $0x60] sm:$0xff]   ;;  %v7700_v46 = vld [vmem:[%s8107_s7 + $0x58] sm:$0xff]  }
0x1504   :  { %v2684_v53 = vsel %vm2683_vm9, %v2681_v48, %v2671_v49  ;;  %v2685_v31 = vsel %vm2683_vm9, %v2682_v32, %v2675_v23  ;;  %v7701_v48 = vld [vmem:[%s8107_s7 + $0x50] sm:$0xff]   ;;  %v7703_v49 = vld [vmem:[%s8107_s7 + $0x40] sm:$0xff]  }
0x1505   :  { %v2696_v55 = vmul.f32 %v2692_v15, %v2684_v53  ;;  %v2697_v56 = vmul.f32 %v2694_v51, %v2685_v31  ;;  %v6576_v32 = vld [vmem:[%s8128_s11 + $0x1] ss:$0 sm:$0xff] }
0x1507   :  { %v2707_v58 = vadd.f32 %v6543_v20, %v2696_v55  ;;  %v2708_v59 = vadd.f32 %v2705_v54, %v2697_v56  ;;  %v7702_v20 = vld [vmem:[%s8107_s7 + $0x48] sm:$0xff]  }
0x1509   :  { %v6544_v60 = vmul.f32 -1.442695, %v2707_v58  ;;  %v6545_v61 = vmul.f32 -1.442695, %v2708_v59 }
0x150b   :  { %7786 = vpow2.f32 %v6544_v60 }
0x150c   :  { %7788 = vpow2.f32 %v6545_v61 }
0x1518   :  { %v7787_v62 = vpop.eup %7786 }
0x1519   :  { %v7789_v63 = vpop.eup %7788  ;;  %v2715_v0 = vadd.f32 1.0, %v7787_v62  ;;  %v6581_v62 = vld [vmem:[%s8136_s15 + $0x1] ss:$0 sm:$0xff] }
0x151a   :  { %v2716_v1 = vadd.f32 1.0, %v7789_v63 }
0x151b   :  { %7790 = vrcp.f32 %v2715_v0 }
0x151c   :  { %7792 = vrcp.f32 %v2716_v1 }
0x1528   :  { %v7791_v2 = vpop.eup %7790 }
0x1529   :  { %v7793_v3 = vpop.eup %7792  ;;  %v2721_v34 = vmul.f32 %v7791_v2, %v2707_v58 }
0x152a   :  { %v2722_v4 = vmul.f32 %v7793_v3, %v2708_v59 }
0x152c   :  { %v2730_v26 = vcombine.low %v2721_v34, %v2722_v4 }
0x152e   :  { %v2732_v40 = vpack.c.bf16 %v2730_v26, %v2730_v26 }
0x1530   :  { %7254 = vmatmul.mubr.msk.bf16.vlgmr.msra.gmra.mxu1 %vm896_vm2, %v2732_v40 }
0x1531   :  { %7281 = vmatprep.mubr.msk.bf16.mxu1 %vm7914_vm0, %v7913_v44  ;;  %7266 = vmatpush3.bf16.msra.mxu1 %v7696_v24  ;;  %v6616_v24 = vld [vmem:[%s8092_s29 + $0x2] ss:$0 sm:$0xff] }
0x1532   :  { %7267 = vmatprep.subr.bf16.mxu1 %v7913_v44 }
0x1535   :  { %7268 = vmatpush3.bf16.msra.mxu1 %v7697_v30 }
0x1536   :  { %7269 = vmatprep.subr.bf16.mxu1 %v7913_v44 }
0x1539   :  { %7270 = vmatpush3.bf16.msra.mxu1 %v7698_v39  ;;  %v6617_v39 = vld [vmem:[%s8097_s3 + $0x2] ss:$0 sm:$0xff] }
0x153a   :  { %7271 = vmatprep.subr.bf16.mxu1 %v7913_v44 }
0x153d   :  { %7272 = vmatpush3.bf16.msra.mxu1 %v7699_v45 }
0x153e   :  { %7273 = vmatprep.subr.bf16.mxu1 %v7913_v44 }
0x1541   :  { %7274 = vmatpush3.bf16.msra.mxu1 %v7700_v46 }
0x1542   :  { %7275 = vmatprep.subr.bf16.mxu1 %v7913_v44 }
0x1545   :  { %7276 = vmatpush3.bf16.msra.mxu1 %v7701_v48 }
0x1546   :  { %7277 = vmatprep.subr.bf16.mxu1 %v7913_v44 }
0x1549   :  { %7278 = vmatpush3.bf16.msra.mxu1 %v7702_v20  ;;  %v7706_v20 = vld [vmem:[%s8107_s7 + $0xb8] sm:$0xff]  }
0x154a   :  { %7279 = vmatprep.subr.bf16.mxu1 %v7913_v44 }
0x154d   :  { %7280 = vmatpush3.bf16.msra.mxu1 %v7703_v49  ;;  %v7707_v49 = vld [vmem:[%s8107_s7 + $0xb0] sm:$0xff]  }
0x154e   :  { %7313 = vmatprep.subr.bf16.mxu1 %v7913_v44 }
0x15f0   :  { %v2788_v27 = vpop.f32.mrf.mxu1 }
0x15f1   :  { %v2789_v38 = vadd.f32 %v6546_v13, %v2788_v27 }
0x15f2   :  { %v7255_v57 = vpop.f32.mrf.mxu1 }
0x15f3   :  { %v8574_v42 = vadd.f32 %v2789_v38, %v8368_v35  ;;  %v7695_v35 = vld [vmem:[%s8083_s25 + $0x10] sm:$0xff]  }
0x15f4   :  { %v2791_v5 = vpop.f32.mrf.mxu1  ;;  %7260 = vmatpush3.bf16.msra.mxu0 %v7695_v35 }
0x15f5   :  { %v2825_v8 = vsel %vm896_vm2, %v8574_v42, 0.0  ;;  %7285 = vmatprep.subr.bf16.mxu0 %v7913_v44 }
0x15f6   :  { %2826 = vadd.xlane.f32.xlu1 %v2825_v8  ;;  %v7256_v11 = vpop.f32.mrf.mxu1 }
0x167f   :  { %v2827_v21 = vpop.xlane.xlu1 %2826 }
0x1680   :  { %v2828_v16 = vmul.f32 0.03125, %v2827_v21  ;;  %v6590_v21 = vld [vmem:[%s8615_s12] ss:$0 sm:$0xff] }
0x1682   :  { %v2829_v43 = vsub.f32 %v8574_v42, %v2828_v16 }
0x1684   :  { %v2830_v17 = vmul.f32 %v2829_v43, %v2829_v43 }
0x1686   :  { %v2831_v18 = vsel %vm896_vm2, %v2830_v17, 0.0 }
0x1687   :  { %2832 = vadd.xlane.f32.xlu1 %v2831_v18 }
0x1710   :  { %v2833_v19 = vpop.xlane.xlu1 %2832 }
0x1711   :  { %v2834_v25 = vmul.f32 0.03125, %v2833_v19 }
0x1713   :  { %v2835_v28 = vadd.f32 1e-05, %v2834_v25 }
0x1715   :  { %7794 = vrsqrt.f32 %v2835_v28 }
0x1722   :  { %v7795_v33 = vpop.eup %7794 }
0x1723   :  { %v2837_v29 = vmul.f32 %v7795_v33, %v2829_v43  ;;  %v6591_v43 = vld [vmem:[%s8620_s6] ss:$0 sm:$0xff] }
0x1725   :  { %v2844_v41 = vmul.f32 %v6574_v47, %v2837_v29  ;;  %v7704_v47 = vld [vmem:[%s8083_s25 + $0x28] sm:$0xff]   ;;  %v7705_v29 = vld [vmem:[%s8083_s25 + $0x20] sm:$0xff]  }
0x1727   :  { %v2851_v15 = vadd.f32 %v6575_v22, %v2844_v41 }
0x1729   :  { %v2852_v37 = vpack.c.bf16 %v2851_v15, %v2851_v15 }
0x172b   :  { %7262 = vmatmul.mubr.msk.bf16.vlgmr.msra.gmra.mxu0 %vm896_vm2, %v2852_v37 }
0x172c   :  { %7289 = vmatprep.mubr.msk.bf16.mxu0 %vm7914_vm0, %v7913_v44  ;;  %7286 = vmatpush3.bf16.msra.mxu0 %v7704_v47 }
0x172d   :  { %7287 = vmatprep.subr.bf16.mxu0 %v7913_v44 }
0x1730   :  { %7288 = vmatpush3.bf16.msra.mxu0 %v7705_v29 }
0x1731   :  { %7293 = vmatprep.subr.bf16.mxu0 %v7913_v44 }
0x17eb   :  { %v2908_v51 = vpop.f32.mrf.mxu0 }
0x17ec   :  { %v2909_v23 = vadd.f32 %v6576_v32, %v2908_v51  ;;  %v7708_v32 = vld [vmem:[%s8107_s7 + $0xa8] sm:$0xff]   ;;  %v7709_v51 = vld [vmem:[%s8107_s7 + $0xa0] sm:$0xff]  }
0x17ed   :  { %v7263_v53 = vpop.f32.mrf.mxu0 }
0x17ee   :  { %v6580_v54 = vmul.f32 -1.442695, %v2909_v23  ;;  %v7711_v53 = vld [vmem:[%s8107_s7 + $0x90] sm:$0xff]  }
0x17ef   :  { %v2911_v31 = vpop.f32.mrf.mxu0 }
0x17f0   :  { %7796 = vpow2.f32 %v6580_v54  ;;  %v7712_v54 = vld [vmem:[%s8107_s7 + $0x88] sm:$0xff]   ;;  %v7713_v31 = vld [vmem:[%s8107_s7 + $0x80] sm:$0xff]  }
0x17f1   :  { %v7264_v55 = vpop.f32.mrf.mxu0 }
0x17f2   :  { %v6618_v55 = vld [vmem:[%s8128_s11 + $0x2] ss:$0 sm:$0xff] }
0x17fd   :  { %v7797_v56 = vpop.eup %7796 }
0x17fe   :  { %v2917_v58 = vadd.f32 1.0, %v7797_v56 }
0x1800   :  { %7798 = vrcp.f32 %v2917_v58 }
0x180d   :  { %v7799_v59 = vpop.eup %7798 }
0x180e   :  { %v2920_v60 = vmul.f32 %v7799_v59, %v2909_v23  ;;  %v7710_v23 = vld [vmem:[%s8107_s7 + $0x98] sm:$0xff]  }
0x1810   :  { %v2921_v61 = vpack.c.bf16 %v2920_v60, %v2920_v60 }
0x1812   :  { %7282 = vmatmul.mubr.bf16.vlgmr.msra.gmra.mxu1 %v2921_v61 }
0x1813   :  { %7317 = vmatprep.mubr.msk.bf16.mxu1 %vm7914_vm0, %v7913_v44 }
0x18d2   :  { %v3010_v63 = vpop.f32.mrf.mxu1 }
0x18d3   :  { %v3011_v0 = vadd.f32 %v6581_v62, %v3010_v63 }
0x18d4   :  { %v7283_v1 = vpop.f32.mrf.mxu1 }
0x18d5   :  { %v3016_v2 = vmul.f32 0.5, %v3011_v0 }
0x18d6   :  { %v3013_v3 = vpop.f32.mrf.mxu1 }
0x18d7   :  { %v3017_v34 = vadd.f32 %v3016_v2, %v8574_v42 }
0x18d8   :  { %v7284_v4 = vpop.f32.mrf.mxu1 }
0x18d9   :  { %v3020_v26 = vsel %vm896_vm2, %v3017_v34, 0.0 }
0x18da   :  { %3021 = vadd.xlane.f32.xlu1 %v3020_v26 }
0x1963   :  { %v3022_v40 = vpop.xlane.xlu1 %3021 }
0x1964   :  { %v3023_v13 = vmul.f32 0.03125, %v3022_v40 }
0x1966   :  { %v3024_v27 = vsub.f32 %v3017_v34, %v3023_v13  ;;  %v6623_v34 = vld [vmem:[%s8136_s15 + $0x2] ss:$0 sm:$0xff] }
0x1968   :  { %v3025_v38 = vmul.f32 %v3024_v27, %v3024_v27 }
0x196a   :  { %v3026_v57 = vsel %vm896_vm2, %v3025_v38, 0.0 }
0x196b   :  { %3027 = vadd.xlane.f32.xlu1 %v3026_v57 }
0x19f4   :  { %v3028_v5 = vpop.xlane.xlu1 %3027 }
0x19f5   :  { %v3029_v8 = vmul.f32 0.03125, %v3028_v5 }
0x19f7   :  { %v3030_v11 = vadd.f32 1e-05, %v3029_v8 }
0x19f9   :  { %7800 = vrsqrt.f32 %v3030_v11 }
0x1a06   :  { %v7801_v42 = vpop.eup %7800 }
0x1a07   :  { %v3032_v16 = vmul.f32 %v7801_v42, %v3024_v27 }
0x1a09   :  { %v3039_v17 = vmul.f32 %v6590_v21, %v3032_v16 }
0x1a0b   :  { %v8624_v18 = vadd.f32 %v6591_v43, %v3039_v17  ;;  %v7714_v43 = vld [vmem:[%s8149_s19 + $0x18] sm:$0xff]   ;;  %v7715_v17 = vld [vmem:[%s8149_s19 + $0x10] sm:$0xff]   ;;  %s9284_s19 = smov 64  }
0x1a0c   :  { %7314 = vmatpush3.bf16.msra.mxu1 %v7714_v43 }
0x1a0d   :  { %v3077_v36 = vsel %vm896_vm2, %v8624_v18, 0.0  ;;  %7315 = vmatprep.subr.bf16.mxu1 %v7913_v44 }
0x1a0e   :  { %3078 = vadd.xlane.f32.xlu1 %v3077_v36 }
0x1a10   :  { %7316 = vmatpush3.bf16.msra.mxu1 %v7715_v17 }
0x1a11   :  { %7321 = vmatprep.subr.bf16.mxu1 %v7913_v44 }
0x1a97   :  { %v3079_v35 = vpop.xlane.xlu1 %3078 }
0x1a98   :  { %v3080_v19 = vmul.f32 0.03125, %v3079_v35 }
0x1a9a   :  { %v3081_v25 = vsub.f32 %v8624_v18, %v3080_v19 }
0x1a9c   :  { %v3082_v28 = vmul.f32 %v3081_v25, %v3081_v25 }
0x1a9e   :  { %v3083_v33 = vsel %vm896_vm2, %v3082_v28, 0.0 }
0x1a9f   :  { %3084 = vadd.xlane.f32.xlu1 %v3083_v33  ;;  %v6635_v33 = vld [vmem:[%s8163_s28 + $0x1] ss:$0 sm:$0xff]  ;;  %s9286_s28 = smov 120  }
0x1b28   :  { %v3085_v22 = vpop.xlane.xlu1 %3084 }
0x1b29   :  { %v3086_v41 = vmul.f32 0.03125, %v3085_v22 }
0x1b2b   :  { %v3087_v15 = vadd.f32 1e-05, %v3086_v41  ;;  %v6641_v41 = vld [vmem:[%s8173_s4 + $0x1] ss:$0 sm:$0xff]  ;;  %s9287_s4 = smov 56  }
0x1b2d   :  { %7802 = vrsqrt.f32 %v3087_v15 }
0x1b3a   :  { %v7803_v37 = vpop.eup %7802 }
0x1b3b   :  { %v3089_v30 = vmul.f32 %v7803_v37, %v3081_v25  ;;  %v6634_v25 = vld [vmem:[%s8158_s23 + $0x1] ss:$0 sm:$0xff]  ;;  %s9285_s23 = smov 88  }
0x1b3d   :  { %v3096_v45 = vmul.f32 %v6616_v24, %v3089_v30 }
0x1b3f   :  { %v3103_v46 = vadd.f32 %v6617_v39, %v3096_v45 }
0x1b41   :  { %v3104_v48 = vpack.c.bf16 %v3103_v46, %v3103_v46 }
0x1b43   :  { %7290 = vmatmul.mubr.msk.bf16.vlgmr.msra.gmra.mxu0 %vm896_vm2, %v3104_v48 }
0x1b44   :  { %7309 = vmatprep.mubr.msk.bf16.mxu0 %vm7914_vm0, %v7913_v44  ;;  %7294 = vmatpush3.bf16.msra.mxu0 %v7706_v20 }
0x1b45   :  { %7295 = vmatprep.subr.bf16.mxu0 %v7913_v44 }
0x1b48   :  { %7296 = vmatpush3.bf16.msra.mxu0 %v7707_v49 }
0x1b49   :  { %7297 = vmatprep.subr.bf16.mxu0 %v7913_v44 }
0x1b4c   :  { %7298 = vmatpush3.bf16.msra.mxu0 %v7708_v32 }
0x1b4d   :  { %7299 = vmatprep.subr.bf16.mxu0 %v7913_v44 }
0x1b50   :  { %7300 = vmatpush3.bf16.msra.mxu0 %v7709_v51 }
0x1b51   :  { %7301 = vmatprep.subr.bf16.mxu0 %v7913_v44 }
0x1b54   :  { %7302 = vmatpush3.bf16.msra.mxu0 %v7710_v23 }
0x1b55   :  { %7303 = vmatprep.subr.bf16.mxu0 %v7913_v44 }
0x1b58   :  { %7304 = vmatpush3.bf16.msra.mxu0 %v7711_v53 }
0x1b59   :  { %7305 = vmatprep.subr.bf16.mxu0 %v7913_v44 }
0x1b5c   :  { %7306 = vmatpush3.bf16.msra.mxu0 %v7712_v54 }
0x1b5d   :  { %7307 = vmatprep.subr.bf16.mxu0 %v7913_v44 }
0x1b60   :  { %7308 = vmatpush3.bf16.msra.mxu0 %v7713_v31 }
0x1b61   :  { %7327 = vmatprep.subr.bf16.mxu0 %v7913_v44 }
0x1c03   :  { %v3160_v56 = vpop.f32.mrf.mxu0 }
0x1c04   :  { %v3161_v58 = vadd.f32 %v6618_v55, %v3160_v56 }
0x1c05   :  { %v7291_v59 = vpop.f32.mrf.mxu0 }
0x1c06   :  { %v6622_v60 = vmul.f32 -1.442695, %v3161_v58 }
0x1c07   :  { %v3163_v61 = vpop.f32.mrf.mxu0 }
0x1c08   :  { %7804 = vpow2.f32 %v6622_v60 }
0x1c09   :  { %v7292_v62 = vpop.f32.mrf.mxu0 }
0x1c15   :  { %v7805_v63 = vpop.eup %7804 }
0x1c16   :  { %v3169_v0 = vadd.f32 1.0, %v7805_v63 }
0x1c18   :  { %7806 = vrcp.f32 %v3169_v0 }
0x1c25   :  { %v7807_v1 = vpop.eup %7806 }
0x1c26   :  { %v3172_v2 = vmul.f32 %v7807_v1, %v3161_v58 }
0x1c28   :  { %v3173_v3 = vpack.c.bf16 %v3172_v2, %v3172_v2 }
0x1c2a   :  { %7310 = vmatmul.mubr.bf16.vlgmr.msra.gmra.mxu0 %v3173_v3 }
0x1c2b   :  { %7329 = vmatprep.mubr.msk.bf16.mxu0 %vm7914_vm0, %v7913_v44 }
0x1cea   :  { %v3262_v4 = vpop.f32.mrf.mxu0 }
0x1ceb   :  { %v3263_v26 = vadd.f32 %v6623_v34, %v3262_v4 }
0x1cec   :  { %v7311_v40 = vpop.f32.mrf.mxu0 }
0x1ced   :  { %v3268_v13 = vmul.f32 0.5, %v3263_v26 }
0x1cee   :  { %v3265_v27 = vpop.f32.mrf.mxu0 }
0x1cef   :  { %v8660_v38 = vadd.f32 %v3268_v13, %v8624_v18 }
0x1cf0   :  { %v7312_v57 = vpop.f32.mrf.mxu0 }
0x1cf1   :  { %v3274_v5 = vsel %vm896_vm2, %v8660_v38, 0.0 }
0x1cf2   :  { %3275 = vadd.xlane.f32.xlu0 %v3274_v5 }
0x1d7b   :  { %v3276_v8 = vpop.xlane.xlu0 %3275 }
0x1d7c   :  { %v3277_v11 = vmul.f32 0.03125, %v3276_v8 }
0x1d7e   :  { %v3278_v42 = vsub.f32 %v8660_v38, %v3277_v11 }
0x1d80   :  { %v3279_v21 = vmul.f32 %v3278_v42, %v3278_v42 }
0x1d82   :  { %v3280_v16 = vsel %vm896_vm2, %v3279_v21, 0.0 }
0x1d83   :  { %3281 = vadd.xlane.f32.xlu1 %v3280_v16 }
0x1e0c   :  { %v3282_v18 = vpop.xlane.xlu1 %3281 }
0x1e0d   :  { %v3283_v36 = vmul.f32 0.03125, %v3282_v18 }
0x1e0f   :  { %v3284_v35 = vadd.f32 1e-05, %v3283_v36 }
0x1e11   :  { %7808 = vrsqrt.f32 %v3284_v35 }
0x1e1e   :  { %v7809_v19 = vpop.eup %7808 }
0x1e1f   :  { %v3286_v28 = vmul.f32 %v7809_v19, %v3278_v42 }
0x1e21   :  { %v3293_v47 = vmul.f32 %v6634_v25, %v3286_v28 }
0x1e23   :  { %v3300_v29 = vadd.f32 %v6635_v33, %v3293_v47 }
0x1e25   :  { %v3308_v22 = vpack.c.bf16 %v3300_v29, %v3300_v29 }
0x1e27   :  { %7318 = vmatmul.mubr.msk.bf16.vlgmr.msra.gmra.mxu1 %vm896_vm2, %v3308_v22 }
0x1e28   :  { %7323 = vmatprep.mubr.msk.bf16.mxu1 %vm7914_vm0, %v7913_v44 }
0x1ee7   :  { %v3364_v15 = vpop.f32.mrf.mxu1 }
0x1ee8   :  { %v3365_v37 = vadd.f32 %v6641_v41, %v3364_v15 }
0x1ee9   :  { %v7319_v24 = vpop.f32.mrf.mxu1 }
0x1eea   :  { %v3371_v30 = vcombine.high %v3365_v37, %v3365_v37  ;;  %v8676_v39 = vpack.c.bf16 %v3365_v37, %v3365_v37 }
0x1eeb   :  { %v3367_v45 = vpop.f32.mrf.mxu1 }
0x1eec   :  { %3381 = vrot.lane.b32.xlu1 %v8676_v39, %s7928_s5  ;;  %v8680_v48 = vpack.c.bf16 %v3371_v30, %v3371_v30 }
0x1eed   :  { %v7320_v46 = vpop.f32.mrf.mxu1 }
0x1ef0   :  { %3430 = vrot.lane.b32.xlu1 %v8680_v48, %s7928_s5 }
0x1f5e   :  { %v3382_v20 = vpop.permute.xlu1 %3381 }
0x1f5f   :  { %v3387_v49 = vsel %vm1199_vm3, %v3382_v20, 0 }
0x1f60   :  { %7322 = vmatpush3.bf16.xpose.msra.mxu1 %v3387_v49 }
0x1f61   :  { %7333 = vmatprep.subr.bf16.mxu1 %v7913_v44 }
0x1f62   :  { %v3431_v32 = vpop.permute.xlu1 %3430 }
0x1f63   :  { %v3436_v51 = vsel %vm1199_vm3, %v3431_v32, 0 }
0x1f64   :  { %7328 = vmatpush3.bf16.xpose.msra.mxu0 %v3436_v51 }
0x1f65   :  { %7339 = vmatprep.subr.bf16.mxu0 %v7913_v44 }
0x1f67   :  { %7324 = vmatmul.mubr.msk.bf16.vlgmr.msra.gmra.mxu1 %vm1199_vm3, %v8676_v39 }
0x1f68   :  { %7335 = vmatprep.mubr.msk.bf16.mxu1 %vm7914_vm0, %v7913_v44 }
0x1f6b   :  { %7330 = vmatmul.mubr.msk.bf16.vlgmr.msra.gmra.mxu0 %vm1199_vm3, %v8680_v48 }
0x1f6c   :  { %7341 = vmatprep.mubr.msk.bf16.mxu0 %vm7914_vm0, %v7913_v44 }
0x2027   :  { %v3423_v23 = vpop.f32.mrf.mxu1 }
0x2028   :  { %v3478_v53 = vmul.f32 0.35355338, %v3423_v23 }
0x2029   :  { %v7325_v54 = vpop.f32.mrf.mxu1 }
0x202a   :  { %v3480_v31 = vsel %vm1297_vm4, %v3478_v53, -inf }
0x202b   :  { %v3472_v55 = vpop.f32.mrf.mxu0  ;;  %3481 = vmax.xlane.f32.xlu1 %v3480_v31  ;;  %v3426_v56 = vpop.f32.mrf.mxu1 }
0x202c   :  { %v3479_v58 = vmul.f32 0.35355338, %v3472_v55 }
0x202d   :  { %v7326_v59 = vpop.f32.mrf.mxu1  ;;  %v7331_v60 = vpop.f32.mrf.mxu0 }
0x202e   :  { %v3483_v61 = vsel %vm1297_vm4, %v3479_v58, -inf }
0x202f   :  { %3484 = vmax.xlane.f32.xlu0 %v3483_v61  ;;  %v3475_v62 = vpop.f32.mrf.mxu0 }
0x2031   :  { %v7332_v63 = vpop.f32.mrf.mxu0 }
0x203c   :  { %3552 = vrot.lane.b32.xlu1 %v8680_v48, %s9284_s19 }
0x2045   :  { %3504 = vrot.lane.b32.xlu0 %v8676_v39, %s9284_s19 }
0x2049   :  { %3607 = vrot.lane.b32.xlu0 %v8676_v39, %s9285_s23 }
0x20b4   :  { %v3482_v0 = vpop.xlane.xlu1 %3481 }
0x20b5   :  { %v3486_v1 = vsub.f32 %v3478_v53, %v3482_v0 }
0x20b7   :  { %v3488_v2 = vmul.f32 1.442695, %v3486_v1 }
0x20b8   :  { %v3485_v3 = vpop.xlane.xlu0 %3484  ;;  %v3553_v34 = vpop.permute.xlu1 %3552 }
0x20b9   :  { %7810 = vpow2.f32 %v3488_v2  ;;  %v3487_v4 = vsub.f32 %v3479_v58, %v3485_v3  ;;  %v3558_v26 = vsel %vm1328_vm5, %v3553_v34, 0 }
0x20ba   :  { %7340 = vmatpush3.bf16.msra.mxu0 %v3558_v26 }
0x20bb   :  { %v3490_v40 = vmul.f32 1.442695, %v3487_v4  ;;  %7351 = vmatprep.subr.bf16.mxu0 %v7913_v44 }
0x20bc   :  { %v3505_v13 = vpop.permute.xlu0 %3504 }
0x20bd   :  { %7812 = vpow2.f32 %v3490_v40  ;;  %v3510_v27 = vsel %vm1328_vm5, %v3505_v13, 0 }
0x20be   :  { %7334 = vmatpush3.bf16.msra.mxu1 %v3510_v27 }
0x20bf   :  { %7345 = vmatprep.subr.bf16.mxu1 %v7913_v44 }
0x20c0   :  { %v3608_v42 = vpop.permute.xlu0 %3607 }
0x20c1   :  { %v3613_v19 = vsel %vm1199_vm3, %v3608_v42, 0 }
0x20c6   :  { %v7811_v57 = vpop.eup %7810 }
0x20c7   :  { %v3492_v5 = vsel %vm1297_vm4, %v7811_v57, 0.0 }
0x20c8   :  { %3493 = vadd.xlane.f32.xlu0 %v3492_v5 }
0x20ca   :  { %v7813_v8 = vpop.eup %7812 }
0x20cb   :  { %v3495_v11 = vsel %vm1297_vm4, %v7813_v8, 0.0 }
0x20cc   :  { %3496 = vadd.xlane.f32.xlu0 %v3495_v11 }
0x20e2   :  { %3657 = vrot.lane.b32.xlu0 %v8680_v48, %s9285_s23 }
0x20e6   :  { %3605 = vrot.lane.b32.xlu0 %v8676_v39, %s9286_s28 }
0x20ea   :  { %3655 = vrot.lane.b32.xlu0 %v8680_v48, %s9286_s28  ;;  %s7958_s28 = smov 32  }
0x2151   :  { %v3494_v21 = vpop.xlane.xlu0 %3493 }
0x2152   :  { %7814 = vrcp.f32 %v3494_v21 }
0x2155   :  { %v3497_v16 = vpop.xlane.xlu0 %3496 }
0x2156   :  { %7816 = vrcp.f32 %v3497_v16 }
0x2159   :  { %v3658_v35 = vpop.permute.xlu0 %3657 }
0x215a   :  { %v3663_v33 = vsel %vm1199_vm3, %v3658_v35, 0 }
0x215d   :  { %v3606_v47 = vpop.permute.xlu0 %3605 }
0x215f   :  { %v7815_v43 = vpop.eup %7814 }
0x2160   :  { %v3500_v17 = vmul.f32 %v7815_v43, %v7811_v57  ;;  %v6645_v43 = vld [vmem:[%s8256_s18 + $0x10] sm:$0xf] }
0x2161   :  { %v3656_v29 = vpop.permute.xlu0 %3655 }
0x2162   :  { %v3502_v18 = vpack.c.bf16 %v3500_v17, %v3500_v17 }
0x2163   :  { %v7817_v36 = vpop.eup %7816 }
0x2164   :  { %7336 = vmatmul.mubr.msk.bf16.vlgmr.msra.gmra.mxu1 %vm1324_vm6, %v3502_v18  ;;  %v3501_v25 = vmul.f32 %v7817_v36, %v7813_v8  ;;  %v3882_v36 = vsel %vm1655_vm7, %v6645_v43, 0 }
0x2165   :  { %7346 = vmatpush3.bf16.xpose.msra.mxu1 %v3613_v19  ;;  %7347 = vmatprep.mubr.msk.bf16.mxu1 %vm7914_vm0, %v7913_v44 }
0x2166   :  { %v3503_v28 = vpack.c.bf16 %v3501_v25, %v3501_v25  ;;  %7357 = vmatprep.subr.bf16.mxu1 %v7913_v44 }
0x2168   :  { %7342 = vmatmul.mubr.msk.bf16.vlgmr.msra.gmra.mxu0 %vm1324_vm6, %v3503_v28 }
0x2169   :  { %7352 = vmatpush3.bf16.xpose.msra.mxu0 %v3663_v33  ;;  %7353 = vmatprep.mubr.msk.bf16.mxu0 %vm7914_vm0, %v7913_v44 }
0x216a   :  { %7363 = vmatprep.subr.bf16.mxu0 %v7913_v44 }
0x216c   :  { %7348 = vmatmul.mubr.msk.bf16.vlgmr.msra.gmra.mxu1 %vm1199_vm3, %v3606_v47  ;;  %v6646_v47 = vld [vmem:[%s8256_s18 + $0x14] sm:$0xf] }
0x216d   :  { %7359 = vmatprep.mubr.msk.bf16.mxu1 %vm7914_vm0, %v7913_v44 }
0x2170   :  { %7354 = vmatmul.mubr.msk.bf16.vlgmr.msra.gmra.mxu0 %vm1199_vm3, %v3656_v29  ;;  %v3836_v29 = vsel %vm1655_vm7, %v6646_v47, 0 }
0x2171   :  { %7365 = vmatprep.mubr.msk.bf16.mxu0 %vm7914_vm0, %v7913_v44 }
0x2224   :  { %v3546_v22 = vpop.f32.mrf.mxu1 }
0x2226   :  { %v7337_v41 = vpop.f32.mrf.mxu1 }
0x2228   :  { %v3549_v15 = vpop.f32.mrf.mxu1  ;;  %v3594_v37 = vpop.f32.mrf.mxu0 }
0x2229   :  { %v8732_v24 = vcombine.low %v3546_v22, %v3594_v37 }
0x222a   :  { %v7338_v30 = vpop.f32.mrf.mxu1  ;;  %v7343_v45 = vpop.f32.mrf.mxu0 }
0x222b   :  { %v3604_v25 = vpack.c.bf16 %v8732_v24, %v8732_v24 }
0x222c   :  { %v3597_v46 = vpop.f32.mrf.mxu0  ;;  %v3649_v20 = vpop.f32.mrf.mxu1 }
0x222d   :  { %v3705_v49 = vmul.f32 0.35355338, %v3649_v20 }
0x222e   :  { %v7344_v32 = vpop.f32.mrf.mxu0  ;;  %v7349_v51 = vpop.f32.mrf.mxu1 }
0x222f   :  { %v3707_v23 = vsel %vm1297_vm4, %v3705_v49, -inf }
0x2230   :  { %v3699_v53 = vpop.f32.mrf.mxu0  ;;  %3708 = vmax.xlane.f32.xlu1 %v3707_v23  ;;  %v3652_v54 = vpop.f32.mrf.mxu1 }
0x2231   :  { %v3706_v31 = vmul.f32 0.35355338, %v3699_v53 }
0x2232   :  { %v7350_v55 = vpop.f32.mrf.mxu1  ;;  %v7355_v56 = vpop.f32.mrf.mxu0 }
0x2233   :  { %v3710_v58 = vsel %vm1297_vm4, %v3706_v31, -inf }
0x2234   :  { %3711 = vmax.xlane.f32.xlu0 %v3710_v58  ;;  %v3702_v59 = vpop.f32.mrf.mxu0 }
0x2236   :  { %v7356_v60 = vpop.f32.mrf.mxu0 }
0x2241   :  { %3731 = vrot.lane.b32.xlu1 %v8676_v39, %s9287_s4 }
0x2245   :  { %3926 = vrot.lane.b32.xlu1 %v8676_v39, %s9288_s8 }
0x2249   :  { %3976 = vrot.lane.b32.xlu1 %v8680_v48, %s9288_s8  ;;  %s6399_s8 = sld [smem:[%s9263_s0 + %s7958_s28]]  }
0x224d   :  { %3924 = vrot.lane.b32.xlu1 %v8676_v39, %s9289_s9 }
0x22b9   :  { %v3709_v61 = vpop.xlane.xlu1 %3708 }
0x22ba   :  { %v3713_v62 = vsub.f32 %v3705_v49, %v3709_v61 }
0x22bc   :  { %v3715_v63 = vmul.f32 1.442695, %v3713_v62 }
0x22bd   :  { %v3712_v0 = vpop.xlane.xlu0 %3711  ;;  %v3732_v1 = vpop.permute.xlu1 %3731 }
0x22be   :  { %7818 = vpow2.f32 %v3715_v63  ;;  %v3714_v2 = vsub.f32 %v3706_v31, %v3712_v0  ;;  %v3737_v3 = vsel %vm1328_vm5, %v3732_v1, 0 }
0x22bf   :  { %7358 = vmatpush3.bf16.msra.mxu1 %v3737_v3 }
0x22c0   :  { %v3717_v34 = vmul.f32 1.442695, %v3714_v2  ;;  %7369 = vmatprep.subr.bf16.mxu1 %v7913_v44 }
0x22c1   :  { %v3927_v35 = vpop.permute.xlu1 %3926 }
0x22c2   :  { %7820 = vpow2.f32 %v3717_v34  ;;  %v3932_v49 = vsel %vm1199_vm3, %v3927_v35, 0 }
0x22c5   :  { %v3977_v19 = vpop.permute.xlu1 %3976 }
0x22c6   :  { %v3982_v28 = vsel %vm1199_vm3, %v3977_v19, 0 }
0x22c9   :  { %v3925_v53 = vpop.permute.xlu1 %3924 }
0x22cb   :  { %v7819_v4 = vpop.eup %7818 }
0x22cc   :  { %v3719_v26 = vsel %vm1297_vm4, %v7819_v4, 0.0 }
0x22cd   :  { %3720 = vadd.xlane.f32.xlu0 %v3719_v26 }
0x22cf   :  { %v7821_v40 = vpop.eup %7820 }
0x22d0   :  { %v3722_v13 = vsel %vm1297_vm4, %v7821_v40, 0.0 }
0x22d1   :  { %3723 = vadd.xlane.f32.xlu0 %v3722_v13 }
0x22e7   :  { %3779 = vrot.lane.b32.xlu0 %v8680_v48, %s9287_s4 }
0x22eb   :  { %3974 = vrot.lane.b32.xlu0 %v8680_v48, %s9289_s9 }
0x2356   :  { %v3721_v27 = vpop.xlane.xlu0 %3720 }
0x2357   :  { %7822 = vrcp.f32 %v3721_v27 }
0x235a   :  { %v3724_v57 = vpop.xlane.xlu0 %3723 }
0x235b   :  { %7824 = vrcp.f32 %v3724_v57 }
0x235e   :  { %v3780_v5 = vpop.permute.xlu0 %3779 }
0x235f   :  { %v3785_v8 = vsel %vm1328_vm5, %v3780_v5, 0 }
0x2360   :  { %7364 = vmatpush3.bf16.msra.mxu0 %v3785_v8 }
0x2361   :  { %7375 = vmatprep.subr.bf16.mxu0 %v7913_v44 }
0x2362   :  { %v3975_v33 = vpop.permute.xlu0 %3974 }
0x2364   :  { %v7823_v11 = vpop.eup %7822 }
0x2365   :  { %v3727_v42 = vmul.f32 %v7823_v11, %v7819_v4 }
0x2367   :  { %v3729_v21 = vpack.c.bf16 %v3727_v42, %v3727_v42 }
0x2368   :  { %v7825_v16 = vpop.eup %7824 }
0x2369   :  { %7360 = vmatmul.mubr.msk.bf16.vlgmr.msra.gmra.mxu1 %vm1324_vm6, %v3729_v21  ;;  %v3728_v17 = vmul.f32 %v7825_v16, %v7821_v40 }
0x236a   :  { %7371 = vmatprep.mubr.msk.bf16.mxu1 %vm7914_vm0, %v7913_v44  ;;  %7370 = vmatpush3.bf16.msra.mxu1 %v3836_v29 }
0x236b   :  { %v3730_v18 = vpack.c.bf16 %v3728_v17, %v3728_v17  ;;  %7381 = vmatprep.subr.bf16.mxu1 %v7913_v44 }
0x236d   :  { %7366 = vmatmul.mubr.msk.bf16.vlgmr.msra.gmra.mxu0 %vm1324_vm6, %v3730_v18 }
0x236e   :  { %7376 = vmatpush3.bf16.msra.mxu0 %v3882_v36  ;;  %7377 = vmatprep.mubr.msk.bf16.mxu0 %vm7914_vm0, %v7913_v44 }
0x236f   :  { %7387 = vmatprep.subr.bf16.mxu0 %v7913_v44 }
0x2375   :  { %7378 = vmatmul.mubr.msk.bf16.vlgmr.msra.gmra.mxu0 %vm1199_vm3, %v3604_v25 }
0x2376   :  { %7388 = vmatpush3.bf16.xpose.msra.mxu0 %v3982_v28  ;;  %7389 = vmatprep.mubr.msk.bf16.mxu0 %vm7914_vm0, %v7913_v44 }
0x2377   :  { %7399 = vmatprep.subr.bf16.mxu0 %v7913_v44 }
0x237d   :  { %7390 = vmatmul.mubr.msk.bf16.vlgmr.msra.gmra.mxu0 %vm1199_vm3, %v3975_v33 }
0x237e   :  { %7401 = vmatprep.mubr.msk.bf16.mxu0 %vm7914_vm0, %v7913_v44 }
0x2429   :  { %v3773_v22 = vpop.f32.mrf.mxu1 }
0x242b   :  { %v7361_v41 = vpop.f32.mrf.mxu1 }
0x242d   :  { %v3776_v15 = vpop.f32.mrf.mxu1  ;;  %v3821_v37 = vpop.f32.mrf.mxu0 }
0x242e   :  { %v3829_v24 = vcombine.low %v3773_v22, %v3821_v37 }
0x242f   :  { %v7362_v30 = vpop.f32.mrf.mxu1  ;;  %v7367_v45 = vpop.f32.mrf.mxu0 }
0x2430   :  { %v3831_v46 = vpack.c.bf16 %v3829_v24, %v3829_v24  ;;  %v6647_v45 = vld [vmem:[%s8256_s18 + $0x18] sm:$0xf] }
0x2431   :  { %v3824_v20 = vpop.f32.mrf.mxu0 }
0x2432   :  { %7372 = vmatmul.mubr.msk.bf16.vlgmr.msra.gmra.mxu1 %vm1199_vm3, %v3831_v46  ;;  %v4155_v46 = vsel %vm1655_vm7, %v6647_v45, 0 }
0x2433   :  { %7382 = vmatpush3.bf16.xpose.msra.mxu1 %v3932_v49  ;;  %v7368_v32 = vpop.f32.mrf.mxu0  ;;  %7383 = vmatprep.mubr.msk.bf16.mxu1 %vm7914_vm0, %v7913_v44 }
0x2434   :  { %7393 = vmatprep.subr.bf16.mxu1 %v7913_v44 }
0x2435   :  { %v8781_v51 = vpop.f32.mrf.mxu0 }
0x2437   :  { %v7379_v23 = vpop.f32.mrf.mxu0 }
0x2439   :  { %v3921_v54 = vpop.f32.mrf.mxu0 }
0x243a   :  { %7384 = vmatmul.mubr.msk.bf16.vlgmr.msra.gmra.mxu1 %vm1199_vm3, %v3925_v53 }
0x243b   :  { %v7380_v31 = vpop.f32.mrf.mxu0  ;;  %7395 = vmatprep.mubr.msk.bf16.mxu1 %vm7914_vm0, %v7913_v44 }
0x243d   :  { %v4018_v55 = vpop.f32.mrf.mxu0 }
0x243e   :  { %v4025_v56 = vmul.f32 0.35355338, %v4018_v55 }
0x243f   :  { %v7391_v58 = vpop.f32.mrf.mxu0 }
0x2440   :  { %v4029_v59 = vsel %vm1297_vm4, %v4025_v56, -inf }
0x2441   :  { %4030 = vmax.xlane.f32.xlu0 %v4029_v59  ;;  %v4021_v60 = vpop.f32.mrf.mxu0 }
0x2443   :  { %v7392_v61 = vpop.f32.mrf.mxu0 }
0x24ca   :  { %v4031_v62 = vpop.xlane.xlu0 %4030 }
0x24cb   :  { %v4033_v63 = vsub.f32 %v4025_v56, %v4031_v62 }
0x24cd   :  { %v4036_v0 = vmul.f32 1.442695, %v4033_v63 }
0x24cf   :  { %7826 = vpow2.f32 %v4036_v0 }
0x24dc   :  { %v7827_v1 = vpop.eup %7826 }
0x24dd   :  { %v4041_v2 = vsel %vm1297_vm4, %v7827_v1, 0.0 }
0x24de   :  { %4042 = vadd.xlane.f32.xlu0 %v4041_v2 }
0x24f2   :  { %v8788_v3 = vpop.f32.mrf.mxu1 }
0x24f4   :  { %v7373_v34 = vpop.f32.mrf.mxu1 }
0x24f6   :  { %v3875_v4 = vpop.f32.mrf.mxu1 }
0x24f8   :  { %v7374_v26 = vpop.f32.mrf.mxu1 }
0x24fa   :  { %v3968_v40 = vpop.f32.mrf.mxu1 }
0x24fb   :  { %v4024_v13 = vmul.f32 0.35355338, %v3968_v40 }
0x24fc   :  { %v7385_v27 = vpop.f32.mrf.mxu1 }
0x24fd   :  { %v4026_v57 = vsel %vm1297_vm4, %v4024_v13, -inf  ;;  %v3919_v27 = vadd.f32 %v8781_v51, %v8788_v3 }
0x24fe   :  { %4027 = vmax.xlane.f32.xlu1 %v4026_v57  ;;  %v3971_v5 = vpop.f32.mrf.mxu1 }
0x2500   :  { %v7386_v8 = vpop.f32.mrf.mxu1 }
0x250f   :  { %4050 = vrot.lane.b32.xlu1 %v8676_v39, %s9290_s10 }
0x2513   :  { %4200 = vrot.lane.b32.xlu1 %v8676_v39, %s9291_s30 }
0x2517   :  { %4250 = vrot.lane.b32.xlu1 %v8680_v48, %s9291_s30 }
0x251b   :  { %4198 = vrot.lane.b32.xlu1 %v8676_v39, %s9292_s14 }
0x2567   :  { %v4043_v36 = vpop.xlane.xlu0 %4042 }
0x2587   :  { %v4028_v11 = vpop.xlane.xlu1 %4027 }
0x2588   :  { %v4032_v42 = vsub.f32 %v4024_v13, %v4028_v11 }
0x258a   :  { %v4034_v21 = vmul.f32 1.442695, %v4032_v42 }
0x258b   :  { %v4051_v16 = vpop.permute.xlu1 %4050 }
0x258c   :  { %7828 = vpow2.f32 %v4034_v21  ;;  %v4056_v43 = vsel %vm1328_vm5, %v4051_v16, 0 }
0x258d   :  { %7394 = vmatpush3.bf16.msra.mxu1 %v4056_v43  ;;  %7830 = vrcp.f32 %v4043_v36 }
0x258e   :  { %7405 = vmatprep.subr.bf16.mxu1 %v7913_v44 }
0x258f   :  { %v4201_v28 = vpop.permute.xlu1 %4200 }
0x2590   :  { %v4206_v22 = vsel %vm1199_vm3, %v4201_v28, 0 }
0x2593   :  { %v4251_v41 = vpop.permute.xlu1 %4250 }
0x2594   :  { %v4256_v0 = vsel %vm1199_vm3, %v4251_v41, 0  ;;  %v6648_v41 = vld [vmem:[%s8256_s18 + $0x1c] sm:$0xf] }
0x2597   :  { %v4199_v24 = vpop.permute.xlu1 %4198 }
0x2599   :  { %v7829_v17 = vpop.eup %7828 }
0x259a   :  { %v4038_v18 = vsel %vm1297_vm4, %v7829_v17, 0.0  ;;  %v7831_v35 = vpop.eup %7830 }
0x259b   :  { %4039 = vadd.xlane.f32.xlu0 %v4038_v18  ;;  %v4047_v25 = vmul.f32 %v7831_v35, %v7827_v1 }
0x259d   :  { %v4049_v29 = vpack.c.bf16 %v4047_v25, %v4047_v25 }
0x25b1   :  { %4098 = vrot.lane.b32.xlu0 %v8680_v48, %s9290_s10 }
0x25b5   :  { %4248 = vrot.lane.b32.xlu0 %v8680_v48, %s9292_s14 }
0x2624   :  { %v4040_v19 = vpop.xlane.xlu0 %4039 }
0x2625   :  { %7832 = vrcp.f32 %v4040_v19 }
0x2628   :  { %v4099_v33 = vpop.permute.xlu0 %4098 }
0x2629   :  { %v4104_v47 = vsel %vm1328_vm5, %v4099_v33, 0 }
0x262a   :  { %7400 = vmatpush3.bf16.msra.mxu0 %v4104_v47 }
0x262b   :  { %7411 = vmatprep.subr.bf16.mxu0 %v7913_v44 }
0x262c   :  { %v4249_v2 = vpop.permute.xlu0 %4248 }
0x262d   :  { %7402 = vmatmul.mubr.msk.bf16.vlgmr.msra.gmra.mxu0 %vm1324_vm6, %v4049_v29 }
0x262e   :  { %7412 = vmatpush3.bf16.xpose.msra.mxu0 %v4206_v22  ;;  %7413 = vmatprep.mubr.msk.bf16.mxu0 %vm7914_vm0, %v7913_v44 }
0x262f   :  { %7423 = vmatprep.subr.bf16.mxu0 %v7913_v44 }
0x2632   :  { %v7833_v15 = vpop.eup %7832 }
0x2633   :  { %v4046_v37 = vmul.f32 %v7833_v15, %v7829_v17  ;;  %v4429_v15 = vsel %vm1655_vm7, %v6648_v41, 0 }
0x2635   :  { %7414 = vmatmul.mubr.msk.bf16.vlgmr.msra.gmra.mxu0 %vm1199_vm3, %v4199_v24  ;;  %v4048_v30 = vpack.c.bf16 %v4046_v37, %v4046_v37 }
0x2636   :  { %7425 = vmatprep.mubr.msk.bf16.mxu0 %vm7914_vm0, %v7913_v44 }
0x2637   :  { %7396 = vmatmul.mubr.msk.bf16.vlgmr.msra.gmra.mxu1 %vm1324_vm6, %v4048_v30 }
0x2638   :  { %7407 = vmatprep.mubr.msk.bf16.mxu1 %vm7914_vm0, %v7913_v44  ;;  %7406 = vmatpush3.bf16.msra.mxu1 %v4155_v46 }
0x2639   :  { %7417 = vmatprep.subr.bf16.mxu1 %v7913_v44 }
0x26ed   :  { %v4140_v20 = vpop.f32.mrf.mxu0 }
0x26ef   :  { %v7403_v49 = vpop.f32.mrf.mxu0 }
0x26f1   :  { %v4143_v32 = vpop.f32.mrf.mxu0 }
0x26f3   :  { %v7404_v23 = vpop.f32.mrf.mxu0 }
0x26f5   :  { %v4242_v53 = vpop.f32.mrf.mxu0 }
0x26f6   :  { %v4298_v54 = vmul.f32 0.35355338, %v4242_v53 }
0x26f7   :  { %v4092_v31 = vpop.f32.mrf.mxu1  ;;  %v7415_v55 = vpop.f32.mrf.mxu0 }
0x26f8   :  { %v4148_v56 = vcombine.low %v4092_v31, %v4140_v20  ;;  %v4300_v58 = vsel %vm1297_vm4, %v4298_v54, -inf }
0x26f9   :  { %4301 = vmax.xlane.f32.xlu1 %v4300_v58  ;;  %v7397_v59 = vpop.f32.mrf.mxu1  ;;  %v4245_v60 = vpop.f32.mrf.mxu0 }
0x26fa   :  { %v4150_v61 = vpack.c.bf16 %v4148_v56, %v4148_v56 }
0x26fb   :  { %v4095_v62 = vpop.f32.mrf.mxu1  ;;  %v7416_v63 = vpop.f32.mrf.mxu0 }
0x26fc   :  { %7408 = vmatmul.mubr.msk.bf16.vlgmr.msra.gmra.mxu1 %vm1199_vm3, %v4150_v61  ;;  %v6670_v61 = vld [vmem:[%s8364_s1 + $0x1] ss:$0 sm:$0xff] }
0x26fd   :  { %7418 = vmatpush3.bf16.xpose.msra.mxu1 %v4256_v0  ;;  %v7398_v1 = vpop.f32.mrf.mxu1  ;;  %7419 = vmatprep.mubr.msk.bf16.mxu1 %vm7914_vm0, %v7913_v44 }
0x26fe   :  { %7429 = vmatprep.subr.bf16.mxu1 %v7913_v44 }
0x2704   :  { %7420 = vmatmul.mubr.msk.bf16.vlgmr.msra.gmra.mxu1 %vm1199_vm3, %v4249_v2 }
0x2705   :  { %7431 = vmatprep.mubr.msk.bf16.mxu1 %vm7914_vm0, %v7913_v44 }
0x270a   :  { %4324 = vrot.lane.b32.xlu1 %v8676_v39, %s9293_s16 }
0x2782   :  { %v4302_v34 = vpop.xlane.xlu1 %4301 }
0x2783   :  { %v4306_v40 = vsub.f32 %v4298_v54, %v4302_v34 }
0x2785   :  { %v4308_v13 = vmul.f32 1.442695, %v4306_v40 }
0x2786   :  { %v4325_v4 = vpop.permute.xlu1 %4324 }
0x2787   :  { %v4330_v26 = vsel %vm1328_vm5, %v4325_v4, 0  ;;  %7834 = vpow2.f32 %v4308_v13 }
0x2788   :  { %7424 = vmatpush3.bf16.msra.mxu0 %v4330_v26 }
0x2789   :  { %7435 = vmatprep.subr.bf16.mxu0 %v7913_v44 }
0x2794   :  { %v7835_v17 = vpop.eup %7834 }
0x2795   :  { %v4312_v35 = vsel %vm1297_vm4, %v7835_v17, 0.0 }
0x27bc   :  { %v4191_v57 = vpop.f32.mrf.mxu1 }
0x27bd   :  { %v4197_v5 = vadd.f32 %v4191_v57, %v3919_v27  ;;  %v7716_v57 = vld [vmem:[%s8377_s17 + $0x18] sm:$0xff]  }
0x27be   :  { %v7409_v8 = vpop.f32.mrf.mxu1 }
0x27c0   :  { %v4194_v11 = vpop.f32.mrf.mxu1 }
0x27c2   :  { %v7410_v42 = vpop.f32.mrf.mxu1 }
0x27c4   :  { %v4292_v21 = vpop.f32.mrf.mxu1 }
0x27c5   :  { %v4299_v39 = vmul.f32 0.35355338, %v4292_v21  ;;  %v6673_v21 = vld [vmem:[%s8386_s2 + $0x1] ss:$0 sm:$0xff] }
0x27c6   :  { %v7421_v16 = vpop.f32.mrf.mxu1 }
0x27c7   :  { %v4303_v43 = vsel %vm1297_vm4, %v4299_v39, -inf  ;;  %v6674_v16 = vld [vmem:[%s8391_s22 + $0x1] ss:$0 sm:$0xff]  ;;  %s7953_s22 = smov 31  }
0x27c8   :  { %4304 = vmax.xlane.f32.xlu0 %v4303_v43  ;;  %v4295_v18 = vpop.f32.mrf.mxu1  ;;  %s9026_s2 = sld [smem:[%s9263_s0 + %s7953_s22]]   ;;  %s7963_s22 = smov 34  }
0x27ca   :  { %v7422_v36 = vpop.f32.mrf.mxu1 }
0x27cb   :  { %v6680_v36 = vld [vmem:[%s8401_s24 + $0x1] ss:$0 sm:$0xff] }
0x27cc   :  { %4313 = vadd.xlane.f32.xlu0 %v4312_v35 }
0x2851   :  { %v4305_v51 = vpop.xlane.xlu0 %4304 }
0x2852   :  { %v4307_v3 = vsub.f32 %v4299_v39, %v4305_v51 }
0x2854   :  { %v4310_v19 = vmul.f32 1.442695, %v4307_v3 }
0x2855   :  { %v4314_v25 = vpop.xlane.xlu0 %4313 }
0x2856   :  { %7836 = vpow2.f32 %v4310_v19 }
0x2857   :  { %7838 = vrcp.f32 %v4314_v25 }
0x2863   :  { %v7837_v28 = vpop.eup %7836 }
0x2864   :  { %v7839_v33 = vpop.eup %7838  ;;  %v4315_v47 = vsel %vm1297_vm4, %v7837_v28, 0.0 }
0x2865   :  { %4316 = vadd.xlane.f32.xlu0 %v4315_v47  ;;  %v4320_v29 = vmul.f32 %v7839_v33, %v7835_v17 }
0x2867   :  { %v4322_v22 = vpack.c.bf16 %v4320_v29, %v4320_v29  ;;  %v7718_v29 = vld [vmem:[%s8407_s20 + $0x18] sm:$0xff]  }
0x2869   :  { %7426 = vmatmul.mubr.msk.bf16.vlgmr.msra.gmra.mxu0 %vm1324_vm6, %v4322_v22  ;;  %v7719_v22 = vld [vmem:[%s8407_s20 + $0x10] sm:$0xff]  }
0x286a   :  { %7437 = vmatprep.mubr.msk.bf16.mxu0 %vm7914_vm0, %v7913_v44  ;;  %7436 = vmatpush3.bf16.msra.mxu0 %v4429_v15  ;;  %v6685_v15 = vld [vmem:[%s8417_s21 + $0x28] sm:$0xff] }
0x286b   :  { %7449 = vmatprep.subr.bf16.mxu0 %v7913_v44 }
0x287b   :  { %4372 = vrot.lane.b32.xlu0 %v8680_v48, %s9293_s16 }
0x28ee   :  { %v4317_v37 = vpop.xlane.xlu0 %4316 }
0x28ef   :  { %7840 = vrcp.f32 %v4317_v37  ;;  %v6686_v37 = vld [vmem:[%s8417_s21 + $0x30] sm:$0xff] }
0x28f2   :  { %v4373_v24 = vpop.permute.xlu0 %4372 }
0x28f3   :  { %v4378_v30 = vsel %vm1328_vm5, %v4373_v24, 0  ;;  %v8883_v24 = vrot.slane %v6685_v15, %v2416_v52  ;;  %v8900_v52 = vrot.slane %v6685_v15, %v2540_v50 }
0x28f4   :  { %7430 = vmatpush3.bf16.msra.mxu1 %v4378_v30  ;;  %v8886_v30 = vrot.slane %v6686_v37, %v8422_v7 }
0x28f5   :  { %7441 = vmatprep.subr.bf16.mxu1 %v7913_v44  ;;  %v4728_v50 = vrot.slane %v8900_v52, 1 }
0x28fc   :  { %v7841_v45 = vpop.eup %7840 }
0x28fd   :  { %v4321_v46 = vmul.f32 %v7841_v45, %v7837_v28  ;;  %v4632_v45 = vrot.slane %v6686_v37, %v2446_v9  ;;  %v4614_v9 = vrot.slane %v8886_v30, 7 }
0x28ff   :  { %v4323_v20 = vpack.c.bf16 %v4321_v46, %v4321_v46  ;;  %v4653_v46 = vrot.slane %v6686_v37, %v2467_v10  ;;  %v4634_v10 = vrot.slane %v4632_v45, 6 }
0x2901   :  { %7432 = vmatmul.mubr.msk.bf16.vlgmr.msra.gmra.mxu1 %vm1324_vm6, %v4323_v20  ;;  %v8894_v20 = vrot.slane %v6685_v15, %v2488_v12  ;;  %v4695_v12 = vrot.slane %v8886_v30, 6 }
0x2902   :  { %7445 = vmatprep.mubr.msk.bf16.mxu1 %vm7914_vm0, %v7913_v44  ;;  %7442 = vmatpush3.bf16.msra.mxu1 %v7716_v57 }
0x2903   :  { %7443 = vmatprep.subr.bf16.mxu1 %v7913_v44 }
0x2929   :  { %v4366_v48 = vpop.f32.mrf.mxu0 }
0x292b   :  { %v7427_v49 = vpop.f32.mrf.mxu0 }
0x292c   :  { %v4681_v49 = vrot.slane %v8883_v24, 7 }
0x292d   :  { %v4369_v32 = vpop.f32.mrf.mxu0 }
0x292e   :  { %v8904_v32 = vrot.slane %v6685_v15, %v2592_v14  ;;  %v4747_v14 = vrot.slane %v8883_v24, 6 }
0x292f   :  { %v7428_v23 = vpop.f32.mrf.mxu0 }
0x2930   :  { %v4655_v23 = vrot.slane %v4653_v46, 5 }
0x29c1   :  { %v4414_v53 = vpop.f32.mrf.mxu1 }
0x29c2   :  { %v4422_v54 = vcombine.low %v4366_v48, %v4414_v53  ;;  %v4604_v48 = vrot.slane %v8883_v24, 1 }
0x29c3   :  { %v7433_v31 = vpop.f32.mrf.mxu1 }
0x29c4   :  { %v4424_v55 = vpack.c.bf16 %v4422_v54, %v4422_v54  ;;  %v4635_v54 = vrot.slane %v4632_v45, 7  ;;  %v4656_v31 = vrot.slane %v4653_v46, 6 }
0x29c5   :  { %v4417_v56 = vpop.f32.mrf.mxu1 }
0x29c6   :  { %7438 = vmatmul.mubr.msk.bf16.vlgmr.msra.gmra.mxu0 %vm1199_vm3, %v4424_v55  ;;  %v4676_v55 = vrot.slane %v8894_v20, 1  ;;  %v4709_v56 = vrot.slane %v4632_v45, 5 }
0x29c7   :  { %v7434_v58 = vpop.f32.mrf.mxu1  ;;  %7453 = vmatprep.mubr.msk.bf16.mxu0 %vm7914_vm0, %v7913_v44  ;;  %7450 = vmatpush3.bf16.msra.mxu0 %v7718_v29 }
0x29c8   :  { %7451 = vmatprep.subr.bf16.mxu0 %v7913_v44 }
0x29cb   :  { %7452 = vmatpush3.bf16.msra.mxu0 %v7719_v22 }
0x29cc   :  { %7465 = vmatprep.subr.bf16.mxu0 %v7913_v44 }
0x2a86   :  { %v4465_v59 = vpop.f32.mrf.mxu0 }
0x2a87   :  { %v4471_v60 = vadd.f32 %v4465_v59, %v4197_v5  ;;  %v4733_v59 = vrot.slane %v8894_v20, 7 }
0x2a88   :  { %v7439_v62 = vpop.f32.mrf.mxu0 }
0x2a89   :  { %v4472_v63 = vadd.f32 %v4471_v60, %v8660_v38  ;;  %v7717_v38 = vld [vmem:[%s8377_s17 + $0x10] sm:$0xff]   ;;  %v6711_v60 = vld [vmem:[%s8432_s26 + $0x1] sm:$0x1]  ;;  %v4780_v62 = vrot.slane %v8904_v32, 1 }
0x2a8a   :  { %v4468_v0 = vpop.f32.mrf.mxu0  ;;  %7444 = vmatpush3.bf16.msra.mxu1 %v7717_v38  ;;  %v8932_v57 = vmul.f32 0.999995, %v6711_v60 }
0x2a8b   :  { %v8858_v1 = vadd.f32 %v6670_v61, %v4472_v63  ;;  %7457 = vmatprep.subr.bf16.mxu1 %v7913_v44  ;;  %v4761_v61 = vrot.slane %v8886_v30, 5  ;;  %v4785_v63 = vrot.slane %v8900_v52, 7  ;;  %v4799_v0 = vrot.slane %v8894_v20, 6 }
0x2a8c   :  { %v7440_v2 = vpop.f32.mrf.mxu0 }
0x2a8d   :  { %v4486_v34 = vsel %vm896_vm2, %v8858_v1, 0.0 }
0x2a8e   :  { %4487 = vadd.xlane.f32.xlu1 %v4486_v34 }
0x2b17   :  { %v4488_v4 = vpop.xlane.xlu1 %4487 }
0x2b18   :  { %v4489_v26 = vmul.f32 0.03125, %v4488_v4 }
0x2b1a   :  { %v4490_v40 = vsub.f32 %v8858_v1, %v4489_v26  ;;  %v4813_v26 = vrot.slane %v8883_v24, 5 }
0x2b1c   :  { %v4491_v13 = vmul.f32 %v4490_v40, %v4490_v40 }
0x2b1e   :  { %v4492_v27 = vsel %vm896_vm2, %v4491_v13, 0.0 }
0x2b1f   :  { %4493 = vadd.xlane.f32.xlu0 %v4492_v27 }
0x2ba8   :  { %v4494_v5 = vpop.xlane.xlu0 %4493 }
0x2ba9   :  { %v4495_v8 = vmul.f32 0.03125, %v4494_v5 }
0x2bab   :  { %v4496_v11 = vadd.f32 1e-05, %v4495_v8 }
0x2bad   :  { %7842 = vrsqrt.f32 %v4496_v11 }
0x2bba   :  { %v7843_v42 = vpop.eup %7842 }
0x2bbb   :  { %v4498_v39 = vmul.f32 %v7843_v42, %v4490_v40 }
0x2bbd   :  { %v4505_v43 = vmul.f32 %v6673_v21, %v4498_v39 }
0x2bbf   :  { %v4512_v17 = vadd.f32 %v6674_v16, %v4505_v43 }
0x2bc1   :  { %v4520_v18 = vpack.c.bf16 %v4512_v17, %v4512_v17 }
0x2bc3   :  { %7446 = vmatmul.mubr.msk.bf16.vlgmr.msra.gmra.mxu1 %vm896_vm2, %v4520_v18 }
0x2bc4   :  { %7461 = vmatprep.mubr.msk.bf16.mxu1 %vm7914_vm0, %v7913_v44 }
0x2c83   :  { %v4576_v35 = vpop.f32.mrf.mxu1 }
0x2c84   :  { %v4577_v51 = vadd.f32 %v6680_v36, %v4576_v35 }
0x2c85   :  { %v7447_v3 = vpop.f32.mrf.mxu1 }
0x2c86   :  { %v6684_v19 = vmul.f32 -1.442695, %v4577_v51 }
0x2c87   :  { %v4579_v25 = vpop.f32.mrf.mxu1 }
0x2c88   :  { %7844 = vpow2.f32 %v6684_v19 }
0x2c89   :  { %v7448_v28 = vpop.f32.mrf.mxu1 }
0x2c95   :  { %v7845_v33 = vpop.eup %7844 }
0x2c96   :  { %v4585_v47 = vadd.f32 1.0, %v7845_v33 }
0x2c98   :  { %7846 = vrcp.f32 %v4585_v47 }
0x2ca5   :  { %v7847_v41 = vpop.eup %7846 }
0x2ca6   :  { %4589 = vrot.lane.b32.xlu1 %v7847_v41, %s7928_s5  ;;  %s7952_s5 = smov 29  }
0x2ca7   :  { %s9020_s20 = sld [smem:[%s9263_s0 + %s7952_s5]]   ;;  %s7962_s5 = smov 36  }
0x2d18   :  { %v4590_v53 = vpop.permute.xlu1 %4589 }
0x2d19   :  { %v8909_v58 = vmul.f32 %v4590_v53, %v4577_v51 }
0x2d1b   :  { %v8921_v2 = vcombine.high %v8909_v58, %v8909_v58  ;;  %v4617_v34 = vmul.f32 %v4614_v9, %v8909_v58  ;;  %v4638_v4 = vmul.f32 %v4634_v10, %v8909_v58  ;;  %v4607_v40 = vmul.f32 %v8883_v24, %v8909_v58 }
0x2d1c   :  { %v4659_v13 = vmul.f32 %v4655_v23, %v8909_v58  ;;  %v4683_v27 = vmul.f32 %v4681_v49, %v8909_v58  ;;  %v4679_v11 = vmul.f32 %v8894_v20, %v8909_v58  ;;  %v4697_v16 = vmul.f32 %v4695_v12, %v8909_v58 }
0x2d1d   :  { %v4618_v38 = vmul.f32 %v8886_v30, %v8921_v2  ;;  %v6687_v5 = vrot.slane %v4617_v34, 9  ;;  %v4639_v8 = vmul.f32 %v4635_v54, %v8921_v2  ;;  %v4608_v42 = vmul.f32 %v4604_v48, %v8921_v2 }
0x2d1e   :  { %v6689_v21 = vrot.slane %v4638_v4, 10  ;;  %v4660_v39 = vmul.f32 %v4656_v31, %v8921_v2  ;;  %v6691_v18 = vrot.slane %v4659_v13, 11  ;;  %v4684_v36 = vmul.f32 %v8883_v24, %v8921_v2 }
0x2d1f   :  { %v6688_v43 = vrot.slane %v4618_v38, 9  ;;  %v4627_v17 = vadd.f32 %v6687_v5, %v4607_v40  ;;  %v6690_v35 = vrot.slane %v4639_v8, 10  ;;  %v4680_v51 = vmul.f32 %v4676_v55, %v8921_v2 }
0x2d20   :  { %v6693_v3 = vrot.slane %v4683_v27, 9  ;;  %v4698_v19 = vmul.f32 %v4614_v9, %v8921_v2  ;;  %v6694_v33 = vrot.slane %v4684_v36, 9  ;;  %v4711_v47 = vmul.f32 %v4709_v56, %v8909_v58 }
0x2d21   :  { %v4628_v25 = vadd.f32 %v6688_v43, %v4608_v42  ;;  %v4648_v28 = vadd.f32 %v6689_v21, %v4627_v17  ;;  %v6692_v29 = vrot.slane %v4660_v39, 11  ;;  %v6695_v41 = vrot.slane %v4697_v16, 10 }
0x2d22   :  { %v4693_v22 = vadd.f32 %v6693_v3, %v4679_v11  ;;  %v4712_v15 = vmul.f32 %v4634_v10, %v8921_v2  ;;  %v4694_v45 = vadd.f32 %v6694_v33, %v4680_v51  ;;  %v6696_v46 = vrot.slane %v4698_v19, 10 }
0x2d23   :  { %v4649_v37 = vadd.f32 %v6690_v35, %v4628_v25  ;;  %v4731_v48 = vmul.f32 %v8900_v52, %v8909_v58  ;;  %v4669_v23 = vadd.f32 %v6691_v18, %v4648_v28  ;;  %v6697_v54 = vrot.slane %v4711_v47, 11 }
0x2d24   :  { %v4707_v53 = vadd.f32 %v6695_v41, %v4693_v22  ;;  %v4735_v9 = vmul.f32 %v4733_v59, %v8909_v58  ;;  %v4708_v31 = vadd.f32 %v6696_v46, %v4694_v45  ;;  %v6698_v55 = vrot.slane %v4712_v15, 11 }
0x2d25   :  { %v4736_v56 = vmul.f32 %v8894_v20, %v8921_v2  ;;  %v4749_v10 = vmul.f32 %v4747_v14, %v8909_v58  ;;  %v4732_v60 = vmul.f32 %v4728_v50, %v8921_v2  ;;  %v4750_v4 = vmul.f32 %v4681_v49, %v8921_v2 }
0x2d26   :  { %v6699_v34 = vrot.slane %v4735_v9, 9  ;;  %v4763_v40 = vmul.f32 %v4761_v61, %v8909_v58  ;;  %v4670_v13 = vadd.f32 %v6692_v29, %v4649_v37  ;;  %v4721_v27 = vadd.f32 %v6697_v54, %v4707_v53  ;;  %v6713_v37 = vld [vmem:[%s8530_s27 + $0x1] ss:$0 sm:$0xff] }
0x2d27   :  { %v6700_v38 = vrot.slane %v4736_v56, 9  ;;  %v4764_v5 = vmul.f32 %v4695_v12, %v8921_v2  ;;  %v4722_v8 = vadd.f32 %v6698_v55, %v4708_v31  ;;  %v6701_v42 = vrot.slane %v4749_v10, 10 }
0x2d28   :  { %v4745_v11 = vadd.f32 %v6699_v34, %v4731_v48  ;;  %v6702_v21 = vrot.slane %v4750_v4, 10  ;;  %v6703_v50 = vrot.slane %v4763_v40, 11  ;;  %v4783_v16 = vmul.f32 %v8904_v32, %v8909_v58 }
0x2d29   :  { %v4746_v39 = vadd.f32 %v6700_v38, %v4732_v60  ;;  %v4787_v49 = vmul.f32 %v4785_v63, %v8909_v58  ;;  %v4788_v61 = vmul.f32 %v8900_v52, %v8921_v2  ;;  %v4801_v30 = vmul.f32 %v4799_v0, %v8909_v58 }
0x2d2a   :  { %v4759_v43 = vadd.f32 %v6701_v42, %v4745_v11  ;;  %v4802_v12 = vmul.f32 %v4733_v59, %v8921_v2  ;;  %v6704_v18 = vrot.slane %v4764_v5, 11  ;;  %v4815_v35 = vmul.f32 %v4813_v26, %v8909_v58 }
0x2d2b   :  { %v4760_v17 = vadd.f32 %v6702_v21, %v4746_v39  ;;  %v6705_v36 = vrot.slane %v4787_v49, 9  ;;  %v4784_v52 = vmul.f32 %v4780_v62, %v8921_v2  ;;  %v6706_v51 = vrot.slane %v4788_v61, 9  ;;  %v6721_v21 = vld [vmem:[%s8570_s13 + $0x1] ss:$0 sm:$0xff] }
0x2d2c   :  { %v4773_v63 = vadd.f32 %v6703_v50, %v4759_v43  ;;  %v4816_v0 = vmul.f32 %v4747_v14, %v8921_v2  ;;  %v6707_v59 = vrot.slane %v4801_v30, 10  ;;  %v6708_v19 = vrot.slane %v4802_v12, 10 }
0x2d2d   :  { %v4774_v3 = vadd.f32 %v6704_v18, %v4760_v17  ;;  %v4797_v20 = vadd.f32 %v6705_v36, %v4783_v16  ;;  %v4798_v25 = vadd.f32 %v6706_v51, %v4784_v52  ;;  %v4832_v28 = vrot.slane %v4721_v27, %v8422_v7  ;;  %v7721_v52 = vld [vmem:[%s8083_s25 + $0x30] sm:$0xff]  }
0x2d2e   :  { %v4836_v58 = vrot.slane %v4722_v8, %v8422_v7  ;;  %v4844_v26 = vrot.slane %v4773_v63, %v8422_v7  ;;  %v6709_v32 = vrot.slane %v4815_v35, 11  ;;  %v4876_v24 = vrot.slane %v8932_v57, %v8422_v7  ;;  %v7720_v63 = vld [vmem:[%s8083_s25 + $0x38] sm:$0xff]   ;;  %s7954_s25 = smov 28  }
0x2d2f   :  { %v4811_v33 = vadd.f32 %v6707_v59, %v4797_v20  ;;  %v4848_v62 = vrot.slane %v4774_v3, %v8422_v7  ;;  %v4812_v14 = vadd.f32 %v6708_v19, %v4798_v25  ;;  %v6710_v2 = vrot.slane %v4816_v0, 11  ;;  %7458 = vmatpush3.bf16.msra.mxu1 %v7720_v63  ;;  %s6395_s26 = sld [smem:[%s9263_s0 + %s7954_s25]]  }
0x2d30   :  { %v4863_v47 = vsel %vm2678_vm8, %v4669_v23, %v4832_v28  ;;  %v4864_v29 = vsel %vm2678_vm8, %v4670_v13, %v4836_v58  ;;  %v4878_v48 = vcombine.high %v4876_v24, %v4876_v24  ;;  %v4890_v54 = vcombine.high %v6713_v37, %v6713_v37  ;;  %7459 = vmatprep.subr.bf16.mxu1 %v7913_v44 }
0x2d31   :  { %v4825_v22 = vadd.f32 %v6709_v32, %v4811_v33  ;;  %v4826_v41 = vadd.f32 %v6710_v2, %v4812_v14  ;;  %v4865_v15 = vsel %vm1328_vm5, %v4863_v47, %v4844_v26  ;;  %v4866_v46 = vsel %vm1328_vm5, %v4864_v29, %v4848_v62  ;;  %v6749_v33 = vld [vmem:[%s8092_s29 + $0x3] ss:$0 sm:$0xff]  ;;  %s7957_s29 = smov 30  }
0x2d32   :  { %v7955_v3 = vmov 1983009808   ;;  %v6750_v2 = vld [vmem:[%s8097_s3 + $0x3] ss:$0 sm:$0xff]  ;;  %s6397_s23 = sld [smem:[%s9263_s0 + %s7957_s29]]  }
0x2d33   :  { %v4856_v45 = vrot.slane %v4825_v22, %v8422_v7  ;;  %v4860_v53 = vrot.slane %v4826_v41, %v8422_v7  ;;  %7460 = vmatpush3.bf16.msra.mxu1 %v7721_v52  ;;  %v5256_v20 = vunpack.c.l.s4 %v7955_v3 }
0x2d34   :  { %7485 = vmatprep.subr.bf16.mxu1 %v7913_v44 }
0x2d35   :  { %v4867_v57 = vsel %vm2683_vm9, %v4865_v15, %v4856_v45  ;;  %v4868_v9 = vsel %vm2683_vm9, %v4866_v46, %v4860_v53  ;;  %v5257_v59 = vunpack.c.0.s8 %v5256_v20  ;;  %v5236_v19 = vld [vmem:[%s6395_s26] sm:$0x3]  ;;  %v5237_v25 = vld [vmem:[%s6395_s26 + $0x2] sm:$0x3]  ;;  %v5238_v28 = vld [vmem:[%s6395_s26 + $0x4] sm:$0x3] }
0x2d36   :  { %v4880_v23 = vmul.f32 %v4876_v24, %v4867_v57  ;;  %v4881_v31 = vmul.f32 %v4878_v48, %v4868_v9  ;;  %v5239_v58 = vld [vmem:[%s6395_s26 + $0x6] sm:$0x3]  ;;  %v5253_v24 = vcombine.low %v5236_v19, %v5237_v25  ;;  %v5240_v47 = vld [vmem:[%s6395_s26 + $0x8] sm:$0x3]  ;;  %v5241_v29 = vld [vmem:[%s6395_s26 + $0xa] sm:$0x3] }
0x2d37   :  { %v9033_v32 = vsub.s32 %v5257_v59, %v8419_v6  ;;  %v5254_v14 = vcombine.low %v5238_v28, %v5239_v58  ;;  %v5270_v45 = vcombine.low %v5240_v47, %v5241_v29  ;;  %v7722_v46 = vld [vmem:[%s9020_s20 + $0x8] sm:$0xff]  }
0x2d38   :  { %v4892_v55 = vadd.f32 %v6713_v37, %v4880_v23  ;;  %v4893_v56 = vadd.f32 %v4890_v54, %v4881_v31  ;;  %v7723_v54 = vld [vmem:[%s9020_s20] sm:$0xff]   ;;  %v9046_v23 = vld [vmem:[%s9026_s2 + $0x8] sm:$0xff]   ;;  %s6403_s20 = sld [smem:[%s9263_s0 + %s7962_s5]]  }
0x2d39   :  { %v5261_v15 = vrot.slane %v5253_v24, %v9033_v32  ;;  %v5268_v37 = vrot.slane %v5254_v14, %v9033_v32  ;;  %v5277_v57 = vrot.slane %v5270_v45, %v9033_v32  ;;  %v9052_v31 = vld [vmem:[%s9026_s2] sm:$0xff]   ;;  %s6401_s2 = sld [smem:[%s9263_s0 + %s7963_s22]]  }
0x2d3a   :  { %v6714_v10 = vmul.f32 -1.442695, %v4892_v55  ;;  %v6715_v60 = vmul.f32 -1.442695, %v4893_v56 }
0x2d3b   :  { %v5269_v53 = vcombine.low %v5261_v15, %v5268_v37 }
0x2d3c   :  { %7848 = vpow2.f32 %v6714_v10  ;;  %v7727_v10 = vld [vmem:[%s8107_s7 + $0xf0] sm:$0xff]  }
0x2d3d   :  { %7850 = vpow2.f32 %v6715_v60  ;;  %v5280_v9 = vpack.c.bf16 %v5277_v57, %v5269_v53  ;;  %v7728_v60 = vld [vmem:[%s8107_s7 + $0xe8] sm:$0xff]  }
0x2d49   :  { %v7849_v34 = vpop.eup %7848 }
0x2d4a   :  { %v7851_v4 = vpop.eup %7850  ;;  %v4900_v40 = vadd.f32 1.0, %v7849_v34  ;;  %v7729_v34 = vld [vmem:[%s8107_s7 + $0xe0] sm:$0xff]  }
0x2d4b   :  { %v4901_v13 = vadd.f32 1.0, %v7851_v4  ;;  %v7730_v4 = vld [vmem:[%s8107_s7 + $0xd8] sm:$0xff]  }
0x2d4c   :  { %7852 = vrcp.f32 %v4900_v40  ;;  %v7731_v40 = vld [vmem:[%s8107_s7 + $0xd0] sm:$0xff]  }
0x2d4d   :  { %7854 = vrcp.f32 %v4901_v13  ;;  %v7732_v13 = vld [vmem:[%s8107_s7 + $0xc8] sm:$0xff]  }
0x2d59   :  { %v7853_v27 = vpop.eup %7852 }
0x2d5a   :  { %v7855_v38 = vpop.eup %7854  ;;  %v4906_v5 = vmul.f32 %v7853_v27, %v4892_v55  ;;  %v7956_v55 = vmov 0   ;;  %v7733_v27 = vld [vmem:[%s8107_s7 + $0xc0] sm:$0xff]  }
0x2d5b   :  { %v4907_v8 = vmul.f32 %v7855_v38, %v4893_v56  ;;  %v7726_v56 = vld [vmem:[%s8107_s7 + $0xf8] sm:$0xff]   ;;  %v6751_v38 = vld [vmem:[%s8128_s11 + $0x3] ss:$0 sm:$0xff]  ;;  %s7960_s11 = smov 33  }
0x2d5c   :  { %s6400_s30 = sld [smem:[%s9263_s0 + %s7960_s11]]  }
0x2d5d   :  { %v4917_v11 = vcombine.low %v4906_v5, %v4907_v8 }
0x2d5f   :  { %v4919_v42 = vpack.c.bf16 %v4917_v11, %v4917_v11 }
0x2d61   :  { %7454 = vmatmul.mubr.msk.bf16.vlgmr.msra.gmra.mxu0 %vm896_vm2, %v4919_v42 }
0x2d62   :  { %7481 = vmatprep.mubr.msk.bf16.mxu0 %vm7914_vm0, %v7913_v44  ;;  %7466 = vmatpush3.bf16.msra.mxu0 %v7726_v56 }
0x2d63   :  { %7467 = vmatprep.subr.bf16.mxu0 %v7913_v44 }
0x2d66   :  { %7468 = vmatpush3.bf16.msra.mxu0 %v7727_v10 }
0x2d67   :  { %7469 = vmatprep.subr.bf16.mxu0 %v7913_v44 }
0x2d6a   :  { %7470 = vmatpush3.bf16.msra.mxu0 %v7728_v60 }
0x2d6b   :  { %7471 = vmatprep.subr.bf16.mxu0 %v7913_v44 }
0x2d6e   :  { %7472 = vmatpush3.bf16.msra.mxu0 %v7729_v34 }
0x2d6f   :  { %7473 = vmatprep.subr.bf16.mxu0 %v7913_v44 }
0x2d72   :  { %7474 = vmatpush3.bf16.msra.mxu0 %v7730_v4 }
0x2d73   :  { %7475 = vmatprep.subr.bf16.mxu0 %v7913_v44 }
0x2d76   :  { %7476 = vmatpush3.bf16.msra.mxu0 %v7731_v40 }
0x2d77   :  { %7477 = vmatprep.subr.bf16.mxu0 %v7913_v44 }
0x2d7a   :  { %7478 = vmatpush3.bf16.msra.mxu0 %v7732_v13 }
0x2d7b   :  { %7479 = vmatprep.subr.bf16.mxu0 %v7913_v44 }
0x2d7e   :  { %7480 = vmatpush3.bf16.msra.mxu0 %v7733_v27 }
0x2d7f   :  { %7517 = vmatprep.subr.bf16.mxu0 %v7913_v44 }
0x2e21   :  { %v4975_v39 = vpop.f32.mrf.mxu0 }
0x2e22   :  { %v4976_v50 = vadd.f32 %v6721_v21, %v4975_v39 }
0x2e23   :  { %v7455_v16 = vpop.f32.mrf.mxu0 }
0x2e24   :  { %v9008_v49 = vadd.f32 %v4976_v50, %v8858_v1  ;;  %v6769_v16 = vld [vmem:[%s6397_s23] ss:$0 sm:$0xff] }
0x2e25   :  { %v4978_v43 = vpop.f32.mrf.mxu0 }
0x2e26   :  { %v5012_v61 = vsel %vm896_vm2, %v9008_v49, 0.0 }
0x2e27   :  { %5013 = vadd.xlane.f32.xlu0 %v5012_v61  ;;  %v7456_v30 = vpop.f32.mrf.mxu0 }
0x2eb0   :  { %v5014_v12 = vpop.xlane.xlu0 %5013 }
0x2eb1   :  { %v5015_v17 = vmul.f32 0.03125, %v5014_v12 }
0x2eb3   :  { %v5016_v18 = vsub.f32 %v9008_v49, %v5015_v17 }
0x2eb5   :  { %v5017_v36 = vmul.f32 %v5016_v18, %v5016_v18 }
0x2eb7   :  { %v5018_v35 = vsel %vm896_vm2, %v5017_v36, 0.0 }
0x2eb8   :  { %5019 = vadd.xlane.f32.xlu0 %v5018_v35 }
0x2f41   :  { %v5020_v1 = vpop.xlane.xlu0 %5019 }
0x2f42   :  { %v5021_v51 = vmul.f32 0.03125, %v5020_v1 }
0x2f44   :  { %v5022_v0 = vadd.f32 1e-05, %v5021_v51 }
0x2f46   :  { %7856 = vrsqrt.f32 %v5022_v0 }
0x2f53   :  { %v7857_v26 = vpop.eup %7856 }
0x2f54   :  { %v5024_v62 = vmul.f32 %v7857_v26, %v5016_v18  ;;  %v9093_v18 = vld [vmem:[%s6399_s8] ss:$0 sm:$0xff] }
0x2f56   :  { %v5031_v22 = vmul.f32 %v6749_v33, %v5024_v62 }
0x2f58   :  { %v5038_v41 = vadd.f32 %v6750_v2, %v5031_v22 }
0x2f5a   :  { %v5039_v48 = vpack.c.bf16 %v5038_v41, %v5038_v41 }
0x2f5c   :  { %7462 = vmatmul.mubr.msk.bf16.vlgmr.msra.gmra.mxu1 %vm896_vm2, %v5039_v48 }
0x2f5d   :  { %7486 = vmatpush3.bf16.msra.mxu1 %v7722_v46  ;;  %7489 = vmatprep.mubr.msk.bf16.mxu1 %vm7914_vm0, %v7913_v44 }
0x2f5e   :  { %7487 = vmatprep.subr.bf16.mxu1 %v7913_v44 }
0x2f61   :  { %7488 = vmatpush3.bf16.msra.mxu1 %v7723_v54 }
0x2f62   :  { %7493 = vmatprep.subr.bf16.mxu1 %v7913_v44 }
0x2f64   :  { %7490 = vmatmul.mubr.msk.bf16.vlgmr.msra.gmra.mxu1 %vm896_vm2, %v5280_v9 }
0x2f65   :  { %7494 = vmatpush3.bf16.msra.mxu1 %v9046_v23  ;;  %7497 = vmatprep.mubr.msk.bf16.mxu1 %vm7914_vm0, %v7913_v44 }
0x2f66   :  { %7495 = vmatprep.subr.bf16.mxu1 %v7913_v44 }
0x2f69   :  { %7496 = vmatpush3.bf16.msra.mxu1 %v9052_v31 }
0x2f6a   :  { %7501 = vmatprep.subr.bf16.mxu1 %v7913_v44 }
0x2f6c   :  { %7498 = vmatmul.mubr.bf16.vlgmr.msra.gmra.mxu1 %v7956_v55 }
0x2f6d   :  { %7502 = vmatpush3.bf16.msra.mxu1 %v9046_v23  ;;  %7505 = vmatprep.mubr.msk.bf16.mxu1 %vm7914_vm0, %v7913_v44 }
0x2f6e   :  { %7503 = vmatprep.subr.bf16.mxu1 %v7913_v44 }
0x2f71   :  { %7504 = vmatpush3.bf16.msra.mxu1 %v9052_v31 }
0x2f72   :  { %7509 = vmatprep.subr.bf16.mxu1 %v7913_v44 }
0x301c   :  { %v5095_v5 = vpop.f32.mrf.mxu1 }
0x301d   :  { %v5096_v8 = vadd.f32 %v6751_v38, %v5095_v5 }
0x301e   :  { %v7463_v11 = vpop.f32.mrf.mxu1 }
0x301f   :  { %v6755_v42 = vmul.f32 -1.442695, %v5096_v8 }
0x3020   :  { %v5098_v21 = vpop.f32.mrf.mxu1 }
0x3021   :  { %7858 = vpow2.f32 %v6755_v42 }
0x3022   :  { %v7464_v39 = vpop.f32.mrf.mxu1 }
0x3024   :  { %v5336_v50 = vpop.f32.mrf.mxu1 }
0x3025   :  { %v9089_v30 = vadd.f32 %v6769_v16, %v5336_v50  ;;  %v7959_v50 = vmov 1966171168  }
0x3026   :  { %v7491_v43 = vpop.f32.mrf.mxu1 }
0x3027   :  { %v5352_v35 = vrot.slane %v9089_v30, %v9033_v32 }
0x3028   :  { %v5339_v61 = vpop.f32.mrf.mxu1 }
0x3029   :  { %v9091_v12 = vadd.f32 %v6769_v16, %v5339_v61  ;;  %v5360_v9 = vcombine.high %v5352_v35, %v5352_v35  ;;  %v5829_v16 = vunpack.c.l.s4 %v7959_v50 }
0x302a   :  { %v7492_v17 = vpop.f32.mrf.mxu1 }
0x302b   :  { %v5830_v43 = vunpack.c.0.s8 %v5829_v16 }
0x302c   :  { %v5436_v36 = vpop.f32.mrf.mxu1 }
0x302d   :  { %v5437_v63 = vadd.f32 %v9093_v18, %v5436_v36  ;;  %v9122_v61 = vsub.s32 %v5830_v43, %v8419_v6 }
0x302e   :  { %v7859_v52 = vpop.eup %7858  ;;  %v7499_v1 = vpop.f32.mrf.mxu1 }
0x302f   :  { %v5104_v51 = vadd.f32 1.0, %v7859_v52  ;;  %v5442_v0 = vadd.f32 %v5437_v63, %v5352_v35 }
0x3030   :  { %v5439_v3 = vpop.f32.mrf.mxu1 }
0x3031   :  { %7860 = vrcp.f32 %v5104_v51  ;;  %v6776_v58 = vmul.f32 -1.442695, %v5442_v0 }
0x3032   :  { %7862 = vtanh.f32 %v5442_v0  ;;  %v7500_v20 = vpop.f32.mrf.mxu1 }
0x3033   :  { %7864 = vpow2.f32 %v6776_v58 }
0x303e   :  { %v7861_v59 = vpop.eup %7860 }
0x303f   :  { %v7863_v19 = vpop.eup %7862  ;;  %v5107_v25 = vmul.f32 %v7861_v59, %v5096_v8 }
0x3040   :  { %5452 = vrot.lane.b32.xlu0 %v7863_v19, %s9284_s19  ;;  %v7865_v26 = vpop.eup %7864  ;;  %v5345_v19 = vcombine.high %v9089_v30, %v9089_v30 }
0x3041   :  { %v5108_v28 = vpack.c.bf16 %v5107_v25, %v5107_v25  ;;  %v5446_v33 = vadd.f32 1.0, %v7865_v26 }
0x3043   :  { %7482 = vmatmul.mubr.bf16.vlgmr.msra.gmra.mxu0 %v5108_v28  ;;  %7866 = vrcp.f32 %v5446_v33  ;;  %v5359_v28 = vrot.slane %v5345_v19, %v9033_v32 }
0x3044   :  { %7518 = vmatpush3.bf16.msra.mxu0 %v9046_v23  ;;  %7521 = vmatprep.mubr.msk.bf16.mxu0 %vm7914_vm0, %v7913_v44 }
0x3045   :  { %7519 = vmatprep.subr.bf16.mxu0 %v7913_v44 }
0x3048   :  { %7520 = vmatpush3.bf16.msra.mxu0 %v9052_v31 }
0x3049   :  { %7533 = vmatprep.subr.bf16.mxu0 %v7913_v44 }
0x3050   :  { %v7867_v62 = vpop.eup %7866 }
0x3051   :  { %v5450_v41 = vmul.f32 0.0, %v7867_v62 }
0x30b2   :  { %v5453_v24 = vpop.permute.xlu0 %5452 }
0x30b3   :  { %v5455_v14 = vmul.f32 %v7867_v62, %v5453_v24 }
0x30b5   :  { %5457 = vrot.lane.b32.xlu1 %v5455_v14, %s7958_s28 }
0x3103   :  { %v9106_v2 = vpop.f32.mrf.mxu0 }
0x3105   :  { %v7483_v47 = vpop.f32.mrf.mxu0 }
0x3107   :  { %v5200_v29 = vpop.f32.mrf.mxu0 }
0x3109   :  { %v7484_v22 = vpop.f32.mrf.mxu0 }
0x3127   :  { %v5458_v15 = vpop.permute.xlu1 %5457 }
0x3128   :  { %v5460_v37 = vadd.f32 %v5458_v15, %v5450_v41 }
0x312a   :  { %7868 = vtanh.f32 %v5460_v37 }
0x3137   :  { %v7869_v45 = vpop.eup %7868 }
0x3138   :  { %5463 = vrot.lane.b32.xlu1 %v7869_v45, %s9284_s19 }
0x31aa   :  { %v5464_v46 = vpop.permute.xlu1 %5463 }
0x31ab   :  { %v5466_v48 = vmul.f32 %v7867_v62, %v5464_v46 }
0x31ad   :  { %v5467_v53 = vpack.c.bf16 %v5466_v48, %v5466_v48  ;;  %v5834_v35 = vrot.slane %v5466_v48, %v9122_v61 }
0x31af   :  { %5469 = vrot.lane.b32.xlu1 %v5467_v53, %s7958_s28  ;;  %v5835_v0 = vcombine.high %v5834_v35, %v5834_v35 }
0x3221   :  { %v5470_v57 = vpop.permute.xlu1 %5469 }
0x3222   :  { %7506 = vmatmul.mubr.msk.bf16.vlgmr.msra.gmra.mxu1 %vm896_vm2, %v5470_v57 }
0x3223   :  { %7510 = vmatpush3.bf16.msra.mxu1 %v9046_v23  ;;  %7513 = vmatprep.mubr.msk.bf16.mxu1 %vm7914_vm0, %v7913_v44 }
0x3224   :  { %7511 = vmatprep.subr.bf16.mxu1 %v7913_v44 }
0x3227   :  { %7512 = vmatpush3.bf16.msra.mxu1 %v9052_v31 }
0x3228   :  { %7525 = vmatprep.subr.bf16.mxu1 %v7913_v44 }
0x32e2   :  { %v5508_v54 = vpop.f32.mrf.mxu1 }
0x32e3   :  { %v5509_v55 = vadd.f32 %v9093_v18, %v5508_v54 }
0x32e4   :  { %v7507_v56 = vpop.f32.mrf.mxu1 }
0x32e5   :  { %v5514_v10 = vadd.f32 %v5509_v55, %v5360_v9 }
0x32e6   :  { %v5511_v60 = vpop.f32.mrf.mxu1 }
0x32e7   :  { %7870 = vtanh.f32 %v5514_v10  ;;  %v6778_v40 = vmul.f32 -1.442695, %v5514_v10 }
0x32e8   :  { %v7508_v34 = vpop.f32.mrf.mxu1 }
0x32e9   :  { %7872 = vpow2.f32 %v6778_v40 }
0x32f4   :  { %v7871_v4 = vpop.eup %7870 }
0x32f5   :  { %5524 = vrot.lane.b32.xlu1 %v7871_v4, %s9284_s19 }
0x32f6   :  { %v7873_v13 = vpop.eup %7872 }
0x32f7   :  { %v5518_v27 = vadd.f32 1.0, %v7873_v13  ;;  %v5361_v13 = vcombine.high %v5359_v28, %v5359_v28 }
0x32f9   :  { %7874 = vrcp.f32 %v5518_v27 }
0x3306   :  { %v7875_v38 = vpop.eup %7874 }
0x3307   :  { %v5522_v11 = vmul.f32 %v7875_v38, %v5460_v37 }
0x3367   :  { %v5525_v5 = vpop.permute.xlu1 %5524 }
0x3368   :  { %v5527_v8 = vmul.f32 %v7875_v38, %v5525_v5 }
0x336a   :  { %5529 = vrot.lane.b32.xlu1 %v5527_v8, %s7958_s28 }
0x33dc   :  { %v5530_v42 = vpop.permute.xlu1 %5529 }
0x33dd   :  { %v5532_v21 = vadd.f32 %v5530_v42, %v5522_v11 }
0x33df   :  { %7876 = vtanh.f32 %v5532_v21 }
0x33ec   :  { %v7877_v39 = vpop.eup %7876 }
0x33ed   :  { %5535 = vrot.lane.b32.xlu0 %v7877_v39, %s9284_s19 }
0x345f   :  { %v5536_v17 = vpop.permute.xlu0 %5535 }
0x3460   :  { %v5538_v36 = vmul.f32 %v7875_v38, %v5536_v17 }
0x3462   :  { %v5539_v63 = vpack.c.bf16 %v5538_v36, %v5538_v36  ;;  %v5845_v52 = vrot.slane %v5538_v36, %v9122_v61 }
0x3464   :  { %v5846_v1 = vcombine.high %v5845_v52, %v5845_v52  ;;  %v5886_v51 = vrot.slane %v5845_v52, %v8422_v7  ;;  %5541 = vrot.lane.b32.xlu1 %v5539_v63, %s7958_s28 }
0x3466   :  { %v5890_v3 = vrot.slane %v5846_v1, %v8422_v7  ;;  %v5933_v20 = vsel %vm2678_vm8, %v5834_v35, %v5886_v51 }
0x3468   :  { %v5934_v6 = vsel %vm2678_vm8, %v5835_v0, %v5890_v3 }
0x34d6   :  { %v5542_v59 = vpop.permute.xlu1 %5541 }
0x34d7   :  { %7514 = vmatmul.mubr.msk.bf16.vlgmr.msra.gmra.mxu1 %vm896_vm2, %v5542_v59 }
0x34d8   :  { %7526 = vmatpush3.bf16.msra.mxu1 %v9046_v23  ;;  %7529 = vmatprep.mubr.msk.bf16.mxu1 %vm7914_vm0, %v7913_v44 }
0x34d9   :  { %7527 = vmatprep.subr.bf16.mxu1 %v7913_v44 }
0x34dc   :  { %7528 = vmatpush3.bf16.msra.mxu1 %v9052_v31 }
0x34dd   :  { %7541 = vmatprep.subr.bf16.mxu1 %v7913_v44 }
0x3597   :  { %v5580_v25 = vpop.f32.mrf.mxu1 }
0x3598   :  { %v5581_v58 = vadd.f32 %v9093_v18, %v5580_v25 }
0x3599   :  { %v7515_v26 = vpop.f32.mrf.mxu1 }
0x359a   :  { %v5586_v33 = vadd.f32 %v5581_v58, %v5359_v28  ;;  %v5368_v28 = vrot.slane %v9091_v12, %v9033_v32 }
0x359b   :  { %v5583_v62 = vpop.f32.mrf.mxu1 }
0x359c   :  { %7878 = vtanh.f32 %v5586_v33  ;;  %v6780_v47 = vmul.f32 -1.442695, %v5586_v33 }
0x359d   :  { %v7516_v24 = vpop.f32.mrf.mxu1 }
0x359e   :  { %7880 = vpow2.f32 %v6780_v47 }
0x35a9   :  { %v7879_v14 = vpop.eup %7878 }
0x35aa   :  { %5596 = vrot.lane.b32.xlu0 %v7879_v14, %s9284_s19 }
0x35ab   :  { %v7881_v29 = vpop.eup %7880 }
0x35ac   :  { %v5590_v22 = vadd.f32 1.0, %v7881_v29 }
0x35ae   :  { %7882 = vrcp.f32 %v5590_v22 }
0x35bb   :  { %v7883_v41 = vpop.eup %7882 }
0x35bc   :  { %v5594_v37 = vmul.f32 %v7883_v41, %v5532_v21 }
0x361c   :  { %v5597_v30 = vpop.permute.xlu0 %5596 }
0x361d   :  { %v5599_v15 = vmul.f32 %v7883_v41, %v5597_v30 }
0x361f   :  { %5601 = vrot.lane.b32.xlu1 %v5599_v15, %s7958_s28 }
0x3691   :  { %v5602_v45 = vpop.permute.xlu1 %5601 }
0x3692   :  { %v5604_v46 = vadd.f32 %v5602_v45, %v5594_v37 }
0x3694   :  { %7884 = vtanh.f32 %v5604_v46 }
0x36a1   :  { %v7885_v48 = vpop.eup %7884 }
0x36a2   :  { %5607 = vrot.lane.b32.xlu0 %v7885_v48, %s9284_s19 }
0x3714   :  { %v5608_v53 = vpop.permute.xlu0 %5607 }
0x3715   :  { %v5610_v57 = vmul.f32 %v7883_v41, %v5608_v53 }
0x3717   :  { %v5611_v54 = vpack.c.bf16 %v5610_v57, %v5610_v57  ;;  %v5854_v9 = vrot.slane %v5610_v57, %v9122_v61 }
0x3719   :  { %v5855_v55 = vcombine.high %v5854_v9, %v5854_v9  ;;  %v5896_v56 = vrot.slane %v5854_v9, %v8422_v7  ;;  %5613 = vrot.lane.b32.xlu1 %v5611_v54, %s7958_s28 }
0x371b   :  { %v5900_v10 = vrot.slane %v5855_v55, %v8422_v7  ;;  %v5935_v60 = vsel %vm1328_vm5, %v5933_v20, %v5896_v56 }
0x371d   :  { %v5936_v34 = vsel %vm1328_vm5, %v5934_v6, %v5900_v10 }
0x378b   :  { %v5614_v4 = vpop.permute.xlu1 %5613 }
0x378c   :  { %7522 = vmatmul.mubr.msk.bf16.vlgmr.msra.gmra.mxu0 %vm896_vm2, %v5614_v4 }
0x378d   :  { %7534 = vmatpush3.bf16.msra.mxu0 %v9046_v23  ;;  %7537 = vmatprep.mubr.msk.bf16.mxu0 %vm7914_vm0, %v7913_v44 }
0x378e   :  { %7535 = vmatprep.subr.bf16.mxu0 %v7913_v44 }
0x3791   :  { %7536 = vmatpush3.bf16.msra.mxu0 %v9052_v31 }
0x3792   :  { %7549 = vmatprep.subr.bf16.mxu0 %v7913_v44 }
0x384c   :  { %v5652_v40 = vpop.f32.mrf.mxu0 }
0x384d   :  { %v5653_v27 = vadd.f32 %v9093_v18, %v5652_v40  ;;  %v5369_v40 = vcombine.high %v5368_v28, %v5368_v28 }
0x384e   :  { %v7523_v38 = vpop.f32.mrf.mxu0 }
0x384f   :  { %v5658_v5 = vadd.f32 %v5653_v27, %v5361_v13 }
0x3850   :  { %v5655_v8 = vpop.f32.mrf.mxu0 }
0x3851   :  { %7886 = vtanh.f32 %v5658_v5  ;;  %v6782_v23 = vmul.f32 -1.442695, %v5658_v5 }
0x3852   :  { %v7524_v11 = vpop.f32.mrf.mxu0 }
0x3853   :  { %7888 = vpow2.f32 %v6782_v23 }
0x385e   :  { %v7887_v42 = vpop.eup %7886 }
0x385f   :  { %5668 = vrot.lane.b32.xlu0 %v7887_v42, %s9284_s19 }
0x3860   :  { %v7889_v21 = vpop.eup %7888 }
0x3861   :  { %v5662_v39 = vadd.f32 1.0, %v7889_v21 }
0x3863   :  { %7890 = vrcp.f32 %v5662_v39 }
0x3870   :  { %v7891_v31 = vpop.eup %7890 }
0x3871   :  { %v5666_v43 = vmul.f32 %v7891_v31, %v5604_v46 }
0x38d1   :  { %v5669_v50 = vpop.permute.xlu0 %5668 }
0x38d2   :  { %v5671_v16 = vmul.f32 %v7891_v31, %v5669_v50 }
0x38d4   :  { %5673 = vrot.lane.b32.xlu1 %v5671_v16, %s7958_s28 }
0x3946   :  { %v5674_v17 = vpop.permute.xlu1 %5673 }
0x3947   :  { %v5676_v36 = vadd.f32 %v5674_v17, %v5666_v43 }
0x3949   :  { %7892 = vtanh.f32 %v5676_v36 }
0x3956   :  { %v7893_v35 = vpop.eup %7892 }
0x3957   :  { %5679 = vrot.lane.b32.xlu0 %v7893_v35, %s9284_s19 }
0x39c9   :  { %v5680_v63 = vpop.permute.xlu0 %5679 }
0x39ca   :  { %v5682_v52 = vmul.f32 %v7891_v31, %v5680_v63 }
0x39cc   :  { %v5683_v1 = vpack.c.bf16 %v5682_v52, %v5682_v52  ;;  %v5863_v51 = vrot.slane %v5682_v52, %v9122_v61 }
0x39ce   :  { %v5864_v0 = vcombine.high %v5863_v51, %v5863_v51  ;;  %v5906_v3 = vrot.slane %v5863_v51, %v8422_v7  ;;  %5685 = vrot.lane.b32.xlu1 %v5683_v1, %s7958_s28  ;;  %v7734_v51 = vld [vmem:[%s6400_s30 + $0x8] sm:$0xff]  }
0x39d0   :  { %v5910_v20 = vrot.slane %v5864_v0, %v8422_v7  ;;  %v5937_v6 = vsel %vm2683_vm9, %v5935_v60, %v5906_v3  ;;  %v7735_v0 = vld [vmem:[%s6400_s30] sm:$0xff]  }
0x39d2   :  { %v5938_v59 = vsel %vm2683_vm9, %v5936_v34, %v5910_v20 }
0x3a40   :  { %v5686_v19 = vpop.permute.xlu1 %5685 }
0x3a41   :  { %7530 = vmatmul.mubr.msk.bf16.vlgmr.msra.gmra.mxu1 %vm896_vm2, %v5686_v19 }
0x3a42   :  { %7545 = vmatprep.mubr.msk.bf16.mxu1 %vm7914_vm0, %v7913_v44  ;;  %7542 = vmatpush3.bf16.msra.mxu1 %v7734_v51 }
0x3a43   :  { %7543 = vmatprep.subr.bf16.mxu1 %v7913_v44 }
0x3a46   :  { %7544 = vmatpush3.bf16.msra.mxu1 %v7735_v0 }
0x3a47   :  { %7557 = vmatprep.subr.bf16.mxu1 %v7913_v44 }
0x3b01   :  { %v5724_v25 = vpop.f32.mrf.mxu1 }
0x3b02   :  { %v5725_v58 = vadd.f32 %v9093_v18, %v5724_v25 }
0x3b03   :  { %v7531_v26 = vpop.f32.mrf.mxu1 }
0x3b04   :  { %v5730_v33 = vadd.f32 %v5725_v58, %v5368_v28 }
0x3b05   :  { %v5727_v62 = vpop.f32.mrf.mxu1 }
0x3b06   :  { %7894 = vtanh.f32 %v5730_v33  ;;  %v6784_v47 = vmul.f32 -1.442695, %v5730_v33 }
0x3b07   :  { %v7532_v24 = vpop.f32.mrf.mxu1 }
0x3b08   :  { %7896 = vpow2.f32 %v6784_v47 }
0x3b13   :  { %v7895_v14 = vpop.eup %7894 }
0x3b14   :  { %5740 = vrot.lane.b32.xlu0 %v7895_v14, %s9284_s19 }
0x3b15   :  { %v7897_v29 = vpop.eup %7896 }
0x3b16   :  { %v5734_v22 = vadd.f32 1.0, %v7897_v29 }
0x3b18   :  { %7898 = vrcp.f32 %v5734_v22 }
0x3b25   :  { %v7899_v41 = vpop.eup %7898 }
0x3b26   :  { %v5738_v12 = vmul.f32 %v7899_v41, %v5676_v36  ;;  %v6756_v36 = vld [vmem:[%s8136_s15 + $0x3] ss:$0 sm:$0xff]  ;;  %s7961_s15 = smov 35  }
0x3b27   :  { %v5198_v35 = vadd.f32 %v6756_v36, %v9106_v2  ;;  %s6402_s16 = sld [smem:[%s9263_s0 + %s7961_s15]]  }
0x3b29   :  { %v5203_v63 = vmul.f32 0.5, %v5198_v35 }
0x3b2b   :  { %v5204_v52 = vadd.f32 %v5203_v63, %v9008_v49 }
0x3b2d   :  { %v5209_v1 = vsel %vm896_vm2, %v5204_v52, 0.0 }
0x3b86   :  { %v5741_v30 = vpop.permute.xlu0 %5740 }
0x3b87   :  { %v5743_v15 = vmul.f32 %v7899_v41, %v5741_v30 }
0x3b89   :  { %5745 = vrot.lane.b32.xlu1 %v5743_v15, %s7958_s28 }
0x3bfb   :  { %v5746_v37 = vpop.permute.xlu1 %5745 }
0x3bfc   :  { %v5748_v45 = vadd.f32 %v5746_v37, %v5738_v12 }
0x3bfe   :  { %7900 = vtanh.f32 %v5748_v45 }
0x3c0b   :  { %v7901_v46 = vpop.eup %7900 }
0x3c0c   :  { %5751 = vrot.lane.b32.xlu0 %v7901_v46, %s9284_s19 }
0x3c7e   :  { %v5752_v48 = vpop.permute.xlu0 %5751 }
0x3c7f   :  { %v5754_v53 = vmul.f32 %v7899_v41, %v5752_v48 }
0x3c81   :  { %v5755_v57 = vpack.c.bf16 %v5754_v53, %v5754_v53  ;;  %v5872_v54 = vrot.slane %v5754_v53, %v9122_v61 }
0x3c83   :  { %v5873_v9 = vcombine.high %v5872_v54, %v5872_v54  ;;  %v5916_v55 = vrot.slane %v5872_v54, %v8422_v7  ;;  %5757 = vrot.lane.b32.xlu1 %v5755_v57, %s7958_s28 }
0x3c85   :  { %v5920_v56 = vrot.slane %v5873_v9, %v8422_v7  ;;  %v5939_v10 = vsel %vm1655_vm7, %v5937_v6, %v5916_v55  ;;  %v7736_v9 = vld [vmem:[%s6402_s16 + $0x8] sm:$0xff]   ;;  %v7737_v55 = vld [vmem:[%s6402_s16] sm:$0xff]  }
0x3c87   :  { %v5940_v60 = vsel %vm1655_vm7, %v5938_v59, %v5920_v56 }
0x3cf5   :  { %v5758_v34 = vpop.permute.xlu1 %5757 }
0x3cf6   :  { %7538 = vmatmul.mubr.msk.bf16.vlgmr.msra.gmra.mxu0 %vm896_vm2, %v5758_v34 }
0x3cf7   :  { %7553 = vmatprep.mubr.msk.bf16.mxu0 %vm7914_vm0, %v7913_v44  ;;  %7550 = vmatpush3.bf16.msra.mxu0 %v7736_v9 }
0x3cf8   :  { %7551 = vmatprep.subr.bf16.mxu0 %v7913_v44 }
0x3cfb   :  { %7552 = vmatpush3.bf16.msra.mxu0 %v7737_v55 }
0x3db6   :  { %v5796_v4 = vpop.f32.mrf.mxu0 }
0x3db7   :  { %v5797_v13 = vadd.f32 %v9093_v18, %v5796_v4  ;;  %v7738_v4 = vld [vmem:[%s6403_s20 + $0x8] sm:$0xff]  }
0x3db8   :  { %v7539_v27 = vpop.f32.mrf.mxu0 }
0x3db9   :  { %v5802_v38 = vadd.f32 %v5797_v13, %v5369_v40  ;;  %v7739_v40 = vld [vmem:[%s6403_s20] sm:$0xff]  }
0x3dba   :  { %v5799_v5 = vpop.f32.mrf.mxu0  ;;  %v6767_v27 = vld [vmem:[%s8615_s12 + $0x1] ss:$0 sm:$0xff] }
0x3dbb   :  { %7902 = vtanh.f32 %v5802_v38  ;;  %v6786_v42 = vmul.f32 -1.442695, %v5802_v38  ;;  %v6768_v5 = vld [vmem:[%s8620_s6 + $0x1] ss:$0 sm:$0xff]  ;;  %s7964_s6 = smov 37  }
0x3dbc   :  { %v7540_v8 = vpop.f32.mrf.mxu0  ;;  %s9240_s24 = sld [smem:[%s9263_s0 + %s7964_s6]]  }
0x3dbd   :  { %7904 = vpow2.f32 %v6786_v42 }
0x3dc8   :  { %v7903_v11 = vpop.eup %7902 }
0x3dc9   :  { %5812 = vrot.lane.b32.xlu0 %v7903_v11, %s9284_s19 }
0x3dca   :  { %v7905_v23 = vpop.eup %7904 }
0x3dcb   :  { %v5806_v21 = vadd.f32 1.0, %v7905_v23 }
0x3dcd   :  { %7906 = vrcp.f32 %v5806_v21  ;;  %v6787_v21 = vld [vmem:[%s6401_s2] ss:$0 sm:$0xff] }
0x3dda   :  { %v7907_v39 = vpop.eup %7906 }
0x3ddb   :  { %v5810_v18 = vmul.f32 %v7907_v39, %v5748_v45 }
0x3e3b   :  { %v5813_v31 = vpop.permute.xlu0 %5812 }
0x3e3c   :  { %v5815_v50 = vmul.f32 %v7907_v39, %v5813_v31 }
0x3e3e   :  { %5817 = vrot.lane.b32.xlu1 %v5815_v50, %s7958_s28 }
0x3eb0   :  { %v5818_v16 = vpop.permute.xlu1 %5817 }
0x3eb1   :  { %v5820_v43 = vadd.f32 %v5818_v16, %v5810_v18 }
0x3eb3   :  { %7908 = vtanh.f32 %v5820_v43 }
0x3ec0   :  { %v7909_v17 = vpop.eup %7908 }
0x3ec1   :  { %5823 = vrot.lane.b32.xlu0 %v7909_v17, %s9284_s19 }
0x3ee0   :  { %5210 = vadd.xlane.f32.xlu0 %v5209_v1 }
0x3f33   :  { %v5824_v2 = vpop.permute.xlu0 %5823 }
0x3f34   :  { %v5826_v3 = vmul.f32 %v7907_v39, %v5824_v2 }
0x3f36   :  { %v5881_v49 = vrot.slane %v5826_v3, %v9122_v61 }
0x3f38   :  { %v5882_v20 = vcombine.high %v5881_v49, %v5881_v49  ;;  %v5926_v6 = vrot.slane %v5881_v49, %v8422_v7 }
0x3f3a   :  { %v5930_v59 = vrot.slane %v5882_v20, %v8422_v7  ;;  %v5942_v19 = vsel %vm5941_vm10, %v5939_v10, %v5926_v6 }
0x3f3b   :  { %v5946_v25 = vcombine.high %v5942_v19, %v5942_v19  ;;  %v5953_v28 = vrot.slane %v5942_v19, %v9033_v32 }
0x3f3c   :  { %v5943_v58 = vsel %vm5941_vm10, %v5940_v60, %v5930_v59 }
0x3f3d   :  { %v5960_v26 = vrot.slane %v5946_v25, %v9033_v32  ;;  %v5961_v33 = vcombine.high %v5953_v28, %v5953_v28  ;;  %v5962_v62 = vcombine.high %v5943_v58, %v5943_v58  ;;  %v5969_v24 = vrot.slane %v5943_v58, %v9033_v32 }
0x3f3f   :  { %v5983_v14 = vcombine.low %v5953_v28, %v5961_v33  ;;  %v5976_v47 = vrot.slane %v5962_v62, %v9033_v32  ;;  %v5977_v29 = vcombine.high %v5969_v24, %v5969_v24  ;;  %v5984_v22 = vcombine.low %v5960_v26, %v5969_v24 }
0x3f41   :  { %v5991_v41 = vrot.slane %v5983_v14, %v9033_v32  ;;  %v5998_v30 = vrot.slane %v5984_v22, %v9033_v32  ;;  %v6000_v15 = vcombine.low %v5977_v29, %v5976_v47 }
0x3f43   :  { %v5999_v12 = vcombine.low %v5991_v41, %v5998_v30  ;;  %v6007_v37 = vrot.slane %v6000_v15, %v9033_v32 }
0x3f45   :  { %v6010_v45 = vpack.c.bf16 %v6007_v37, %v5999_v12 }
0x3f47   :  { %6018 = vrot.lane.b32.xlu1 %v6010_v45, %s7958_s28 }
0x3f69   :  { %v5211_v46 = vpop.xlane.xlu0 %5210 }
0x3f6a   :  { %v5212_v48 = vmul.f32 0.03125, %v5211_v46 }
0x3f6c   :  { %v5213_v53 = vsub.f32 %v5204_v52, %v5212_v48 }
0x3f6e   :  { %v5214_v57 = vmul.f32 %v5213_v53, %v5213_v53 }
0x3f70   :  { %v5215_v54 = vsel %vm896_vm2, %v5214_v57, 0.0 }
0x3f71   :  { %5216 = vadd.xlane.f32.xlu1 %v5215_v54 }
0x3fb9   :  { %v6019_v56 = vpop.permute.xlu1 %6018 }
0x3fba   :  { %7546 = vmatmul.mubr.msk.bf16.vlgmr.msra.gmra.mxu1 %vm896_vm2, %v6019_v56 }
0x3fbb   :  { %7561 = vmatprep.mubr.msk.bf16.mxu1 %vm7914_vm0, %v7913_v44  ;;  %7558 = vmatpush3.bf16.msra.mxu1 %v7738_v4 }
0x3fbc   :  { %7559 = vmatprep.subr.bf16.mxu1 %v7913_v44 }
0x3fbf   :  { %7560 = vmatpush3.bf16.msra.mxu1 %v7739_v40 }
0x3ffa   :  { %v5217_v10 = vpop.xlane.xlu1 %5216 }
0x3ffb   :  { %v5218_v60 = vmul.f32 0.03125, %v5217_v10 }
0x3ffd   :  { %v5219_v34 = vadd.f32 1e-05, %v5218_v60 }
0x3fff   :  { %7910 = vrsqrt.f32 %v5219_v34 }
0x400c   :  { %v7911_v13 = vpop.eup %7910 }
0x400d   :  { %v5221_v38 = vmul.f32 %v7911_v13, %v5213_v53 }
0x400f   :  { %v5228_v8 = vmul.f32 %v6767_v27, %v5221_v38 }
0x4011   :  { %v5235_v11 = vadd.f32 %v6768_v5, %v5228_v8 }
0x4013   :  { %v6080_v42 = vpack.c.bf16 %v5235_v11, %v5235_v11 }
0x4015   :  { %7554 = vmatmul.mubr.msk.bf16.vlgmr.msra.gmra.mxu0 %vm896_vm2, %v6080_v42 }
0x407a   :  { %v6069_v23 = vpop.f32.mrf.mxu1 }
0x407b   :  { %v6070_v31 = vadd.f32 %v6787_v21, %v6069_v23 }
0x407c   :  { %v7547_v39 = vpop.f32.mrf.mxu1 }
0x407e   :  { %v6072_v44 = vpop.f32.mrf.mxu1 }
0x407f   :  { %v6073_v50 = vadd.f32 %v6787_v21, %v6072_v44 }
0x4080   :  { %v7548_v18 = vpop.f32.mrf.mxu1 }
0x4081   :  { %v6140_v16 = vpack.c.bf16 %v6073_v50, %v6070_v31 }
0x4083   :  { %7562 = vmatmul.mubr.msk.bf16.vlgmr.msra.gmra.mxu1 %vm896_vm2, %v6140_v16 }
0x40d5   :  { %v6130_v43 = vpop.f32.mrf.mxu0 }
0x40d6   :  { %v6198_v63 = vcombine.high %v6130_v43, %v6130_v43  ;;  %v6205_v52 = vrot.slane %v6130_v43, %v9122_v61 }
0x40d7   :  { %v7555_v17 = vpop.f32.mrf.mxu0 }
0x40d8   :  { %v6212_v1 = vrot.slane %v6198_v63, %v9122_v61  ;;  %v6213_v51 = vcombine.high %v6205_v52, %v6205_v52  ;;  %v6221_v2 = vrot.slane %v6205_v52, %v9122_v61 }
0x40d9   :  { %v6133_v36 = vpop.f32.mrf.mxu0 }
0x40da   :  { %v6214_v0 = vcombine.high %v6212_v1, %v6212_v1  ;;  %v6235_v49 = vrot.slane %v6213_v51, %v9122_v61  ;;  %v6228_v28 = vrot.slane %v6212_v1, %v9122_v61  ;;  %v6243_v26 = vcombine.high %v6221_v2, %v6221_v2 }
0x40db   :  { %v7556_v35 = vpop.f32.mrf.mxu0  ;;  %v6277_v29 = vrot.slane %v6221_v2, %v8422_v7 }
0x40dc   :  { %v6242_v58 = vrot.slane %v6214_v0, %v9122_v61  ;;  %v6245_v62 = vcombine.high %v6235_v49, %v6235_v49  ;;  %v6244_v12 = vcombine.high %v6228_v28, %v6228_v28  ;;  %v6281_v45 = vrot.slane %v6235_v49, %v8422_v7 }
0x40dd   :  { %v6285_v46 = vrot.slane %v6243_v26, %v8422_v7  ;;  %v6293_v9 = vrot.slane %v6228_v28, %v8422_v7 }
0x40de   :  { %v6246_v37 = vcombine.high %v6242_v58, %v6242_v58  ;;  %v6289_v48 = vrot.slane %v6245_v62, %v8422_v7  ;;  %v6297_v34 = vrot.slane %v6242_v58, %v8422_v7  ;;  %v6301_v4 = vrot.slane %v6244_v12, %v8422_v7 }
0x40e0   :  { %v6305_v40 = vrot.slane %v6246_v37, %v8422_v7 }
0x4143   :  { %v6190_v3 = vpop.f32.mrf.mxu1 }
0x4144   :  { %v6249_v20 = vcombine.high %v6190_v3, %v6190_v3  ;;  %v6256_v6 = vrot.slane %v6190_v3, %v9033_v32 }
0x4145   :  { %v7563_v59 = vpop.f32.mrf.mxu1 }
0x4146   :  { %v6263_v19 = vrot.slane %v6249_v20, %v9033_v32  ;;  %v6264_v25 = vcombine.high %v6256_v6, %v6256_v6 }
0x4147   :  { %v6193_v33 = vpop.f32.mrf.mxu1 }
0x4148   :  { %v6314_v24 = vcombine.low %v6256_v6, %v6264_v25  ;;  %v6265_v14 = vcombine.high %v6263_v19, %v6263_v19  ;;  %v6272_v47 = vrot.slane %v6193_v33, %v9033_v32  ;;  %v6328_v61 = vrot.slane %v6263_v19, %v9033_v32 }
0x4149   :  { %v7564_v22 = vpop.f32.mrf.mxu1 }
0x414a   :  { %v6321_v41 = vrot.slane %v6314_v24, %v9033_v32  ;;  %v6273_v30 = vcombine.high %v6272_v47, %v6272_v47  ;;  %v6330_v15 = vcombine.low %v6265_v14, %v6272_v47 }
0x414c   :  { %v6329_v53 = vcombine.low %v6321_v41, %v6328_v61  ;;  %v6337_v57 = vrot.slane %v6330_v15, %v9033_v32  ;;  %v6344_v54 = vrot.slane %v6273_v30, %v9033_v32 }
0x414e   :  { %v6348_v55 = vadd.f32 %v6329_v53, %v6277_v29  ;;  %v6349_v56 = vadd.f32 %v6329_v53, %v6281_v45  ;;  %v6350_v10 = vadd.f32 %v6329_v53, %v6285_v46  ;;  %v6351_v60 = vadd.f32 %v6329_v53, %v6289_v48 }
0x414f   :  { %v6345_v13 = vcombine.low %v6337_v57, %v6344_v54 }
0x4150   :  { %6356 = vst [vmem:[%s9240_s24] sm:$0x3f] %v6348_v55  ;;  %6357 = vst [vmem:[%s9240_s24 + $0x8] sm:$0x3f] %v6349_v56 }
0x4151   :  { %6358 = vst [vmem:[%s9240_s24 + $0x10] sm:$0x3f] %v6350_v10  ;;  %6359 = vst [vmem:[%s9240_s24 + $0x18] sm:$0x3f] %v6351_v60  ;;  %v6352_v32 = vadd.f32 %v6345_v13, %v6293_v9  ;;  %v6353_v27 = vadd.f32 %v6345_v13, %v6297_v34  ;;  %v6354_v38 = vadd.f32 %v6345_v13, %v6301_v4 }
0x4152   :  { %v6355_v5 = vadd.f32 %v6345_v13, %v6305_v40 }
0x4153   :  { %6360 = vst [vmem:[%s9240_s24 + $0x20] sm:$0x3f] %v6352_v32  ;;  %6361 = vst [vmem:[%s9240_s24 + $0x28] sm:$0x3f] %v6353_v27 }
0x4154   :  { %6362 = vst [vmem:[%s9240_s24 + $0x30] sm:$0x3f] %v6354_v38  ;;  %6363 = vst [vmem:[%s9240_s24 + $0x38] sm:$0x3f] %v6355_v5 }

</bundles_post_ra>
